<compile_context>
chip_gen: v7x
topology: tpu7x:2x2x1
jax: 0.10.0
libtpu: 0.0.40
codegen_flags: <defaults>
</compile_context>

<pallas_src>
import functools

import jax
import jax.numpy as jnp
from jax import lax
from jax.experimental import pallas as pl
from jax.experimental.pallas import tpu as pltpu

EPS = 1e-5          # norm_op_kwargs['eps']
NEG_SLOPE = 0.01    # nonlin_kwargs['negative_slope']
LANE = 128


def _round_up(x, m):
    return (x + m - 1) // m * m


def _conv_stats_kernel(x_ref, w_ref, b_ref, mask_ref, y_ref, s_ref, *, wp):
    """Conv3x3(+bias) on one halo'd row-tile + partial BN statistics.

    x_ref    : ((tile_h+3)*wp, Cin)  bf16  zero-padded halo tile, flat row-major (h, w)
    w_ref    : (9, Cin, Cpad)        bf16  tap k = dy*3 + dx
    b_ref    : (1, Cpad)             f32   conv bias (zero-padded channels)
    mask_ref : (tile_h*wp, 1)        f32   1.0 on valid output pixels (cols < W, rows < H)
    y_ref    : (tile_h*wp, Cpad)     f32   conv+bias output (garbage cols/rows masked later)
    s_ref    : (2, Cpad)             f32   [sum, sum_sq] over this tile's valid pixels
    """
    mt_out, cpad = y_ref.shape
    acc = jnp.zeros((mt_out, cpad), jnp.float32)
    # 3x3 conv as 9 shifted matmuls on the MXU, accumulated in f32.
    for dy in range(3):
        for dx in range(3):
            off = dy * wp + dx                       # static flat tap offset
            xs = x_ref[pl.ds(off, mt_out), :]        # (mt_out, Cin) bf16
            acc = acc + jnp.dot(xs, w_ref[dy * 3 + dx],
                                preferred_element_type=jnp.float32)
    y = acc + b_ref[...]
    y_ref[...] = y

    # Partial BatchNorm statistics (single pass: sum and sum of squares), masked to
    # the valid pixels of this tile; combined across all tiles in the wrapper.
    m = mask_ref[...]
    ym = y * m
    s_sum = jnp.sum(ym, axis=0, keepdims=True)       # (1, Cpad)
    s_sq = jnp.sum(ym * y, axis=0, keepdims=True)    # (1, Cpad)
    s_ref[...] = jnp.concatenate([s_sum, s_sq], axis=0)


def _norm_lrelu_kernel(y_ref, sc_ref, sh_ref, o_ref):
    """Per-channel affine (fused BatchNorm) + LeakyReLU on one lane-dense tile."""
    z = y_ref[...] * sc_ref[...] + sh_ref[...]
    o_ref[...] = jnp.where(z >= 0.0, z, NEG_SLOPE * z)


def conv_bn_lrelu_block(x_nhwc, w, b, gamma, beta, *, tile_h=8):
    """One ConvDropoutNormNonlin block. x_nhwc: (N,H,W,Cin) f32, w: (3,3,Cin,Cout)."""
    N, H, W, Cin = x_nhwc.shape
    Cout = w.shape[-1]
    Cpad = _round_up(Cout, LANE)                 # lane-dense output channels
    Wp = W + 2                                   # width incl. left/right zero padding
    n_ht = pl.cdiv(H, tile_h)
    Hp = n_ht * tile_h
    mt_in = (tile_h + 3) * Wp                    # halo tile rows (flat), +1 row slack
    mt_out = tile_h * Wp                         # output rows (flat, incl. 2 garbage cols)

    # ---- glue: halo row-tiles of the zero-padded bf16 activation (layout plumbing) ----
    xb = x_nhwc.astype(jnp.bfloat16)             # bf16 MXU operand
    xp = jnp.pad(xb, ((0, 0), (1, Hp - H + 2), (1, 1), (0, 0)))   # (N, Hp+3, Wp, Cin)
    x_tiles = jnp.stack(
        [xp[:, t * tile_h: t * tile_h + tile_h + 3] for t in range(n_ht)], axis=1)
    x_tiles = x_tiles.reshape(N, n_ht, mt_in, Cin)

    w9 = jnp.pad(w.astype(jnp.float32).reshape(9, Cin, Cout),
                 ((0, 0), (0, 0), (0, Cpad - Cout))).astype(jnp.bfloat16)
    b2 = jnp.pad(b.astype(jnp.float32), (0, Cpad - Cout)).reshape(1, Cpad)

    # Per-tile validity mask: 1.0 where column < W and global row < H.
    r = jnp.arange(tile_h)
    c = jnp.arange(Wp)
    t_idx = jnp.arange(n_ht)
    row_ok = (t_idx[:, None] * tile_h + r[None, :]) < H        # (n_ht, tile_h)
    col_ok = c < W                                             # (Wp,)
    mask = (row_ok[:, :, None] & col_ok[None, None, :]).astype(jnp.float32)
    mask = mask.reshape(n_ht, mt_out, 1)

    cparams = pltpu.CompilerParams(
        dimension_semantics=("parallel", "parallel"),
        vmem_limit_bytes=32 * 1024 * 1024)

    # ---- pass 1: conv + bias + per-tile BN partial statistics ----
    y, stats = pl.pallas_call(
        functools.partial(_conv_stats_kernel, wp=Wp),
        out_shape=(
            jax.ShapeDtypeStruct((N, n_ht, mt_out, Cpad), jnp.float32),
            jax.ShapeDtypeStruct((N, n_ht, 2, Cpad), jnp.float32),
        ),
        grid=(N, n_ht),
        in_specs=[
            pl.BlockSpec((None, None, mt_in, Cin), lambda n, t: (n, t, 0, 0)),
            pl.BlockSpec((9, Cin, Cpad), lambda n, t: (0, 0, 0)),
            pl.BlockSpec((1, Cpad), lambda n, t: (0, 0)),
            pl.BlockSpec((None, mt_out, 1), lambda n, t: (t, 0, 0)),
        ],
        out_specs=(
            pl.BlockSpec((None, None, mt_out, Cpad), lambda n, t: (n, t, 0, 0)),
            pl.BlockSpec((None, None, 2, Cpad), lambda n, t: (n, t, 0, 0)),
        ),
        compiler_params=cparams,
    )(x_tiles, w9, b2, mask)

    # ---- combine statistics (tiny per-channel math) and fold BN into scale/shift ----
    count = jnp.float32(N * H * W)
    s = jnp.sum(stats, axis=(0, 1))                            # (2, Cpad)
    mean = s[0] / count
    var = jnp.maximum(s[1] / count - mean * mean, 0.0)         # biased variance
    g_pad = jnp.pad(gamma.astype(jnp.float32), (0, Cpad - Cout))
    bt_pad = jnp.pad(beta.astype(jnp.float32), (0, Cpad - Cout))
    scale = g_pad * lax.rsqrt(var + EPS)
    shift = bt_pad - mean * scale

    # ---- pass 2: normalize + LeakyReLU (lane-dense elementwise) ----
    z = pl.pallas_call(
        _norm_lrelu_kernel,
        out_shape=jax.ShapeDtypeStruct((N, n_ht, mt_out, Cpad), jnp.float32),
        grid=(N, n_ht),
        in_specs=[
            pl.BlockSpec((None, None, mt_out, Cpad), lambda n, t: (n, t, 0, 0)),
            pl.BlockSpec((1, Cpad), lambda n, t: (0, 0)),
            pl.BlockSpec((1, Cpad), lambda n, t: (0, 0)),
        ],
        out_specs=pl.BlockSpec((None, None, mt_out, Cpad), lambda n, t: (n, t, 0, 0)),
        compiler_params=cparams,
    )(y, scale.reshape(1, Cpad), shift.reshape(1, Cpad))

    # ---- glue: strip garbage columns / padded rows / padded channels ----
    z = z.reshape(N, n_ht, tile_h, Wp, Cpad)[:, :, :, :W, :Cout]
    z = z.reshape(N, Hp, W, Cout)[:, :H]
    return z


def stacked_conv_layers(x_nchw, params, *, tile_h=8):
    """params: list of (w(3,3,Cin,Cout), b(Cout,), gamma(Cout,), beta(Cout,))."""
    x = jnp.transpose(x_nchw, (0, 2, 3, 1)).astype(jnp.float32)   # NCHW -> NHWC
    for (w, b, g, bt) in params:
        x = conv_bn_lrelu_block(x, w, b, g, bt, tile_h=tile_h)
    return jnp.transpose(x, (0, 3, 1, 2))                         # NHWC -> NCHW


# ---------------- pure-JAX reference (for correctness check) ----------------
# Conv operands are cast to bf16 (f32 accumulation) to mirror the TPU-MXU practice used
# in the kernel; BN stats / normalization / LeakyReLU are f32, as in the kernel.
def _reference(x_nchw, params):
    x = jnp.transpose(x_nchw, (0, 2, 3, 1)).astype(jnp.float32)
    for (w, b, g, bt) in params:
        y = lax.conv_general_dilated(
            x.astype(jnp.bfloat16), w.astype(jnp.bfloat16),
            window_strides=(1, 1), padding=((1, 1), (1, 1)),
            dimension_numbers=("NHWC", "HWIO", "NHWC"),
            preferred_element_type=jnp.float32,
        ) + b.astype(jnp.float32)
        mean = jnp.mean(y, axis=(0, 1, 2), keepdims=True)
        var = jnp.mean((y - mean) ** 2, axis=(0, 1, 2), keepdims=True)
        yn = (y - mean) * (g * lax.rsqrt(var + EPS)) + bt
        x = jnp.where(yn >= 0.0, yn, NEG_SLOPE * yn)
    return jnp.transpose(x, (0, 3, 1, 2))


if __name__ == "__main__":
    key = jax.random.PRNGKey(0)
    N, C_IN, C_OUT, H, W = 2, 4, 8, 16, 16
    NUM_CONVS = 2
    TILE_H = 8   # multiple of 8; sized vs scoped VMEM at production shapes

    key, kx = jax.random.split(key)
    x = jax.random.normal(kx, (N, C_IN, H, W), dtype=jnp.float32)

    params = []
    cin = C_IN
    for _ in range(NUM_CONVS):
        key, kw, kb, kg, kbt = jax.random.split(key, 5)
        w = 0.1 * jax.random.normal(kw, (3, 3, cin, C_OUT), dtype=jnp.float32)
        b = 0.1 * jax.random.normal(kb, (C_OUT,), dtype=jnp.float32)
        gamma = 1.0 + 0.1 * jax.random.normal(kg, (C_OUT,), dtype=jnp.float32)
        beta = 0.05 * jax.random.normal(kbt, (C_OUT,), dtype=jnp.float32)
        params.append((w, b, gamma, beta))
        cin = C_OUT

    fwd = jax.jit(functools.partial(stacked_conv_layers, tile_h=TILE_H))
    out = jax.block_until_ready(fwd(x, params))
    ref = jax.block_until_ready(_reference(x, params))

    assert out.shape == (N, C_OUT, H, W), out.shape
    max_err = float(jnp.max(jnp.abs(out - ref)))
    assert max_err < 3e-3, max_err   # bf16 MXU operands; structural bugs would be O(1)
    print("KERNEL_OK")
</pallas_src>

<mosaic_0001>
module attributes {stable_mosaic.version = 11 : i64} {
  func.func @_conv_stats_kernel(%arg0: i32, %arg1: i32, %arg2: memref<1x1x198x4xbf16, #tpu.memory_space<vmem>>, %arg3: memref<9x4x128xbf16, #tpu.memory_space<vmem>>, %arg4: memref<1x128xf32, #tpu.memory_space<vmem>>, %arg5: memref<1x144x1xf32, #tpu.memory_space<vmem>>, %arg6: memref<1x1x144x128xf32, #tpu.memory_space<vmem>>, %arg7: memref<1x1x2x128xf32, #tpu.memory_space<vmem>>) attributes {dimension_semantics = [#tpu.dimension_semantics<parallel>, #tpu.dimension_semantics<parallel>], iteration_bounds = array<i64: 2, 2>, scalar_prefetch = 0 : i64, scratch_operands = 0 : i64, tpu.core_type = #tpu.core_type<tc>, window_params = [{transform_indices = @transform_0, window_bounds = array<i64: 1, 1, 198, 4>}, {pipeline_mode = #tpu.pipeline_mode<synchronous>, transform_indices = @transform_1, window_bounds = array<i64: 9, 4, 128>}, {pipeline_mode = #tpu.pipeline_mode<synchronous>, transform_indices = @transform_2, window_bounds = array<i64: 1, 128>}, {transform_indices = @transform_3, window_bounds = array<i64: 1, 144, 1>}, {transform_indices = @transform_4, window_bounds = array<i64: 1, 1, 144, 128>}, {transform_indices = @transform_5, window_bounds = array<i64: 1, 1, 2, 128>}]} {
    %cst = arith.constant 0.000000e+00 : f32
    %0 = vector.broadcast %cst : f32 to vector<144x128xf32>
    %c0 = arith.constant 0 : index
    %c0_0 = arith.constant 0 : index
    %c0_1 = arith.constant 0 : index
    %c0_2 = arith.constant 0 : index
    %1 = vector.load %arg2[%c0, %c0_0, %c0_1, %c0_2] : memref<1x1x198x4xbf16, #tpu.memory_space<vmem>>, vector<1x1x144x4xbf16>
    %2 = vector.shape_cast %1 : vector<1x1x144x4xbf16> to vector<144x4xbf16>
    %c0_3 = arith.constant 0 : index
    %c0_4 = arith.constant 0 : index
    %c0_5 = arith.constant 0 : index
    %3 = vector.load %arg3[%c0_3, %c0_4, %c0_5] : memref<9x4x128xbf16, #tpu.memory_space<vmem>>, vector<1x4x128xbf16>
    %4 = vector.shape_cast %3 : vector<1x4x128xbf16> to vector<4x128xbf16>
    %cst_6 = arith.constant dense<0.000000e+00> : vector<144x128xf32>
    %5 = tpu.matmul %2, %4, %cst_6 {dimension_numbers = #tpu.dot_dimension_numbers<[1], [0], [0], [1], [0, 0, 1, 1], [], []>} : vector<144x4xbf16>, vector<4x128xbf16>, vector<144x128xf32> -> vector<144x128xf32>
    %6 = arith.addf %0, %5 : vector<144x128xf32>
    %c0_7 = arith.constant 0 : index
    %c0_8 = arith.constant 0 : index
    %c1 = arith.constant 1 : index
    %c0_9 = arith.constant 0 : index
    %7 = vector.load %arg2[%c0_7, %c0_8, %c1, %c0_9] : memref<1x1x198x4xbf16, #tpu.memory_space<vmem>>, vector<1x1x144x4xbf16>
    %8 = vector.shape_cast %7 : vector<1x1x144x4xbf16> to vector<144x4xbf16>
    %c1_10 = arith.constant 1 : index
    %c0_11 = arith.constant 0 : index
    %c0_12 = arith.constant 0 : index
    %9 = vector.load %arg3[%c1_10, %c0_11, %c0_12] : memref<9x4x128xbf16, #tpu.memory_space<vmem>>, vector<1x4x128xbf16>
    %10 = vector.shape_cast %9 : vector<1x4x128xbf16> to vector<4x128xbf16>
    %cst_13 = arith.constant dense<0.000000e+00> : vector<144x128xf32>
    %11 = tpu.matmul %8, %10, %cst_13 {dimension_numbers = #tpu.dot_dimension_numbers<[1], [0], [0], [1], [0, 0, 1, 1], [], []>} : vector<144x4xbf16>, vector<4x128xbf16>, vector<144x128xf32> -> vector<144x128xf32>
    %12 = arith.addf %6, %11 : vector<144x128xf32>
    %c0_14 = arith.constant 0 : index
    %c0_15 = arith.constant 0 : index
    %c2 = arith.constant 2 : index
    %c0_16 = arith.constant 0 : index
    %13 = vector.load %arg2[%c0_14, %c0_15, %c2, %c0_16] : memref<1x1x198x4xbf16, #tpu.memory_space<vmem>>, vector<1x1x144x4xbf16>
    %14 = vector.shape_cast %13 : vector<1x1x144x4xbf16> to vector<144x4xbf16>
    %c2_17 = arith.constant 2 : index
    %c0_18 = arith.constant 0 : index
    %c0_19 = arith.constant 0 : index
    %15 = vector.load %arg3[%c2_17, %c0_18, %c0_19] : memref<9x4x128xbf16, #tpu.memory_space<vmem>>, vector<1x4x128xbf16>
    %16 = vector.shape_cast %15 : vector<1x4x128xbf16> to vector<4x128xbf16>
    %cst_20 = arith.constant dense<0.000000e+00> : vector<144x128xf32>
    %17 = tpu.matmul %14, %16, %cst_20 {dimension_numbers = #tpu.dot_dimension_numbers<[1], [0], [0], [1], [0, 0, 1, 1], [], []>} : vector<144x4xbf16>, vector<4x128xbf16>, vector<144x128xf32> -> vector<144x128xf32>
    %18 = arith.addf %12, %17 : vector<144x128xf32>
    %c0_21 = arith.constant 0 : index
    %c0_22 = arith.constant 0 : index
    %c18 = arith.constant 18 : index
    %c0_23 = arith.constant 0 : index
    %19 = vector.load %arg2[%c0_21, %c0_22, %c18, %c0_23] : memref<1x1x198x4xbf16, #tpu.memory_space<vmem>>, vector<1x1x144x4xbf16>
    %20 = vector.shape_cast %19 : vector<1x1x144x4xbf16> to vector<144x4xbf16>
    %c3 = arith.constant 3 : index
    %c0_24 = arith.constant 0 : index
    %c0_25 = arith.constant 0 : index
    %21 = vector.load %arg3[%c3, %c0_24, %c0_25] : memref<9x4x128xbf16, #tpu.memory_space<vmem>>, vector<1x4x128xbf16>
    %22 = vector.shape_cast %21 : vector<1x4x128xbf16> to vector<4x128xbf16>
    %cst_26 = arith.constant dense<0.000000e+00> : vector<144x128xf32>
    %23 = tpu.matmul %20, %22, %cst_26 {dimension_numbers = #tpu.dot_dimension_numbers<[1], [0], [0], [1], [0, 0, 1, 1], [], []>} : vector<144x4xbf16>, vector<4x128xbf16>, vector<144x128xf32> -> vector<144x128xf32>
    %24 = arith.addf %18, %23 : vector<144x128xf32>
    %c0_27 = arith.constant 0 : index
    %c0_28 = arith.constant 0 : index
    %c19 = arith.constant 19 : index
    %c0_29 = arith.constant 0 : index
    %25 = vector.load %arg2[%c0_27, %c0_28, %c19, %c0_29] : memref<1x1x198x4xbf16, #tpu.memory_space<vmem>>, vector<1x1x144x4xbf16>
    %26 = vector.shape_cast %25 : vector<1x1x144x4xbf16> to vector<144x4xbf16>
    %c4 = arith.constant 4 : index
    %c0_30 = arith.constant 0 : index
    %c0_31 = arith.constant 0 : index
    %27 = vector.load %arg3[%c4, %c0_30, %c0_31] : memref<9x4x128xbf16, #tpu.memory_space<vmem>>, vector<1x4x128xbf16>
    %28 = vector.shape_cast %27 : vector<1x4x128xbf16> to vector<4x128xbf16>
    %cst_32 = arith.constant dense<0.000000e+00> : vector<144x128xf32>
    %29 = tpu.matmul %26, %28, %cst_32 {dimension_numbers = #tpu.dot_dimension_numbers<[1], [0], [0], [1], [0, 0, 1, 1], [], []>} : vector<144x4xbf16>, vector<4x128xbf16>, vector<144x128xf32> -> vector<144x128xf32>
    %30 = arith.addf %24, %29 : vector<144x128xf32>
    %c0_33 = arith.constant 0 : index
    %c0_34 = arith.constant 0 : index
    %c20 = arith.constant 20 : index
    %c0_35 = arith.constant 0 : index
    %31 = vector.load %arg2[%c0_33, %c0_34, %c20, %c0_35] : memref<1x1x198x4xbf16, #tpu.memory_space<vmem>>, vector<1x1x144x4xbf16>
    %32 = vector.shape_cast %31 : vector<1x1x144x4xbf16> to vector<144x4xbf16>
    %c5 = arith.constant 5 : index
    %c0_36 = arith.constant 0 : index
    %c0_37 = arith.constant 0 : index
    %33 = vector.load %arg3[%c5, %c0_36, %c0_37] : memref<9x4x128xbf16, #tpu.memory_space<vmem>>, vector<1x4x128xbf16>
    %34 = vector.shape_cast %33 : vector<1x4x128xbf16> to vector<4x128xbf16>
    %cst_38 = arith.constant dense<0.000000e+00> : vector<144x128xf32>
    %35 = tpu.matmul %32, %34, %cst_38 {dimension_numbers = #tpu.dot_dimension_numbers<[1], [0], [0], [1], [0, 0, 1, 1], [], []>} : vector<144x4xbf16>, vector<4x128xbf16>, vector<144x128xf32> -> vector<144x128xf32>
    %36 = arith.addf %30, %35 : vector<144x128xf32>
    %c0_39 = arith.constant 0 : index
    %c0_40 = arith.constant 0 : index
    %c36 = arith.constant 36 : index
    %c0_41 = arith.constant 0 : index
    %37 = vector.load %arg2[%c0_39, %c0_40, %c36, %c0_41] : memref<1x1x198x4xbf16, #tpu.memory_space<vmem>>, vector<1x1x144x4xbf16>
    %38 = vector.shape_cast %37 : vector<1x1x144x4xbf16> to vector<144x4xbf16>
    %c6 = arith.constant 6 : index
    %c0_42 = arith.constant 0 : index
    %c0_43 = arith.constant 0 : index
    %39 = vector.load %arg3[%c6, %c0_42, %c0_43] : memref<9x4x128xbf16, #tpu.memory_space<vmem>>, vector<1x4x128xbf16>
    %40 = vector.shape_cast %39 : vector<1x4x128xbf16> to vector<4x128xbf16>
    %cst_44 = arith.constant dense<0.000000e+00> : vector<144x128xf32>
    %41 = tpu.matmul %38, %40, %cst_44 {dimension_numbers = #tpu.dot_dimension_numbers<[1], [0], [0], [1], [0, 0, 1, 1], [], []>} : vector<144x4xbf16>, vector<4x128xbf16>, vector<144x128xf32> -> vector<144x128xf32>
    %42 = arith.addf %36, %41 : vector<144x128xf32>
    %c0_45 = arith.constant 0 : index
    %c0_46 = arith.constant 0 : index
    %c37 = arith.constant 37 : index
    %c0_47 = arith.constant 0 : index
    %43 = vector.load %arg2[%c0_45, %c0_46, %c37, %c0_47] : memref<1x1x198x4xbf16, #tpu.memory_space<vmem>>, vector<1x1x144x4xbf16>
    %44 = vector.shape_cast %43 : vector<1x1x144x4xbf16> to vector<144x4xbf16>
    %c7 = arith.constant 7 : index
    %c0_48 = arith.constant 0 : index
    %c0_49 = arith.constant 0 : index
    %45 = vector.load %arg3[%c7, %c0_48, %c0_49] : memref<9x4x128xbf16, #tpu.memory_space<vmem>>, vector<1x4x128xbf16>
    %46 = vector.shape_cast %45 : vector<1x4x128xbf16> to vector<4x128xbf16>
    %cst_50 = arith.constant dense<0.000000e+00> : vector<144x128xf32>
    %47 = tpu.matmul %44, %46, %cst_50 {dimension_numbers = #tpu.dot_dimension_numbers<[1], [0], [0], [1], [0, 0, 1, 1], [], []>} : vector<144x4xbf16>, vector<4x128xbf16>, vector<144x128xf32> -> vector<144x128xf32>
    %48 = arith.addf %42, %47 : vector<144x128xf32>
    %c0_51 = arith.constant 0 : index
    %c0_52 = arith.constant 0 : index
    %c38 = arith.constant 38 : index
    %c0_53 = arith.constant 0 : index
    %49 = vector.load %arg2[%c0_51, %c0_52, %c38, %c0_53] : memref<1x1x198x4xbf16, #tpu.memory_space<vmem>>, vector<1x1x144x4xbf16>
    %50 = vector.shape_cast %49 : vector<1x1x144x4xbf16> to vector<144x4xbf16>
    %c8 = arith.constant 8 : index
    %c0_54 = arith.constant 0 : index
    %c0_55 = arith.constant 0 : index
    %51 = vector.load %arg3[%c8, %c0_54, %c0_55] : memref<9x4x128xbf16, #tpu.memory_space<vmem>>, vector<1x4x128xbf16>
    %52 = vector.shape_cast %51 : vector<1x4x128xbf16> to vector<4x128xbf16>
    %cst_56 = arith.constant dense<0.000000e+00> : vector<144x128xf32>
    %53 = tpu.matmul %50, %52, %cst_56 {dimension_numbers = #tpu.dot_dimension_numbers<[1], [0], [0], [1], [0, 0, 1, 1], [], []>} : vector<144x4xbf16>, vector<4x128xbf16>, vector<144x128xf32> -> vector<144x128xf32>
    %54 = arith.addf %48, %53 : vector<144x128xf32>
    %c0_57 = arith.constant 0 : index
    %c0_58 = arith.constant 0 : index
    %55 = vector.load %arg4[%c0_57, %c0_58] : memref<1x128xf32, #tpu.memory_space<vmem>>, vector<1x128xf32>
    %56 = vector.broadcast %55 : vector<1x128xf32> to vector<144x128xf32>
    %57 = arith.addf %54, %56 : vector<144x128xf32>
    %c0_59 = arith.constant 0 : index
    %c0_60 = arith.constant 0 : index
    %c0_61 = arith.constant 0 : index
    %c0_62 = arith.constant 0 : index
    %58 = vector.load %arg6[%c0_59, %c0_60, %c0_61, %c0_62] : memref<1x1x144x128xf32, #tpu.memory_space<vmem>>, vector<1x1x144x128xf32>
    %59 = vector.shape_cast %58 : vector<1x1x144x128xf32> to vector<144x128xf32>
    %60 = vector.shape_cast %57 : vector<144x128xf32> to vector<1x1x144x128xf32>
    tpu.vector_store %arg6[%c0_59, %c0_60, %c0_61, %c0_62], %60 {strides = array<i32>} : memref<1x1x144x128xf32, #tpu.memory_space<vmem>>, vector<1x1x144x128xf32>,
    %c0_63 = arith.constant 0 : index
    %c0_64 = arith.constant 0 : index
    %c0_65 = arith.constant 0 : index
    %61 = vector.load %arg5[%c0_63, %c0_64, %c0_65] : memref<1x144x1xf32, #tpu.memory_space<vmem>>, vector<1x144x1xf32>
    %62 = vector.shape_cast %61 : vector<1x144x1xf32> to vector<144x1xf32>
    %63 = vector.broadcast %62 : vector<144x1xf32> to vector<144x128xf32>
    %64 = arith.mulf %57, %63 : vector<144x128xf32>
    %cst_66 = arith.constant dense<0.000000e+00> : vector<128xf32>
    %65 = vector.multi_reduction <add>, %64, %cst_66 [0] : vector<144x128xf32> to vector<128xf32>
    %66 = vector.shape_cast %65 : vector<128xf32> to vector<1x128xf32>
    %67 = arith.mulf %64, %57 : vector<144x128xf32>
    %cst_67 = arith.constant dense<0.000000e+00> : vector<128xf32>
    %68 = vector.multi_reduction <add>, %67, %cst_67 [0] : vector<144x128xf32> to vector<128xf32>
    %69 = vector.shape_cast %68 : vector<128xf32> to vector<1x128xf32>
    %70 = tpu.concatenate %66, %69 in 0 : vector<1x128xf32>, vector<1x128xf32> -> vector<2x128xf32>
    %c0_68 = arith.constant 0 : index
    %c0_69 = arith.constant 0 : index
    %c0_70 = arith.constant 0 : index
    %c0_71 = arith.constant 0 : index
    %71 = vector.load %arg7[%c0_68, %c0_69, %c0_70, %c0_71] : memref<1x1x2x128xf32, #tpu.memory_space<vmem>>, vector<1x1x2x128xf32>
    %72 = vector.shape_cast %71 : vector<1x1x2x128xf32> to vector<2x128xf32>
    %73 = vector.shape_cast %70 : vector<2x128xf32> to vector<1x1x2x128xf32>
    tpu.vector_store %arg7[%c0_68, %c0_69, %c0_70, %c0_71], %73 {strides = array<i32>} : memref<1x1x2x128xf32, #tpu.memory_space<vmem>>, vector<1x1x2x128xf32>,
    return
  }
  func.func @transform_0(%arg0: i32, %arg1: i32) -> (i32, i32, i32, i32) {
    %c0_i32 = arith.constant 0 : i32
    %c0_i32_0 = arith.constant 0 : i32
    %c0_i32_1 = arith.constant 0 : i32
    return %arg0, %arg1, %c0_i32, %c0_i32_0 : i32, i32, i32, i32
  }
  func.func @transform_1(%arg0: i32, %arg1: i32) -> (i32, i32, i32) {
    %c0_i32 = arith.constant 0 : i32
    %c0_i32_0 = arith.constant 0 : i32
    %c0_i32_1 = arith.constant 0 : i32
    %c0_i32_2 = arith.constant 0 : i32
    return %c0_i32, %c0_i32_0, %c0_i32_1 : i32, i32, i32
  }
  func.func @transform_2(%arg0: i32, %arg1: i32) -> (i32, i32) {
    %c0_i32 = arith.constant 0 : i32
    %c0_i32_0 = arith.constant 0 : i32
    %c0_i32_1 = arith.constant 0 : i32
    return %c0_i32, %c0_i32_0 : i32, i32
  }
  func.func @transform_3(%arg0: i32, %arg1: i32) -> (i32, i32, i32) {
    %c0_i32 = arith.constant 0 : i32
    %c0_i32_0 = arith.constant 0 : i32
    %c0_i32_1 = arith.constant 0 : i32
    return %arg1, %c0_i32, %c0_i32_0 : i32, i32, i32
  }
  func.func @transform_4(%arg0: i32, %arg1: i32) -> (i32, i32, i32, i32) {
    %c0_i32 = arith.constant 0 : i32
    %c0_i32_0 = arith.constant 0 : i32
    %c0_i32_1 = arith.constant 0 : i32
    return %arg0, %arg1, %c0_i32, %c0_i32_0 : i32, i32, i32, i32
  }
  func.func @transform_5(%arg0: i32, %arg1: i32) -> (i32, i32, i32, i32) {
    %c0_i32 = arith.constant 0 : i32
    %c0_i32_0 = arith.constant 0 : i32
    %c0_i32_1 = arith.constant 0 : i32
    return %arg0, %arg1, %c0_i32, %c0_i32_0 : i32, i32, i32, i32
  }
}

module attributes {stable_mosaic.version = 11 : i64} {
  func.func @_norm_lrelu_kernel(%arg0: i32, %arg1: i32, %arg2: memref<1x1x144x128xf32, #tpu.memory_space<vmem>>, %arg3: memref<1x128xf32, #tpu.memory_space<vmem>>, %arg4: memref<1x128xf32, #tpu.memory_space<vmem>>, %arg5: memref<1x1x144x128xf32, #tpu.memory_space<vmem>>) attributes {dimension_semantics = [#tpu.dimension_semantics<parallel>, #tpu.dimension_semantics<parallel>], iteration_bounds = array<i64: 2, 2>, scalar_prefetch = 0 : i64, scratch_operands = 0 : i64, tpu.core_type = #tpu.core_type<tc>, window_params = [{transform_indices = @transform_0, window_bounds = array<i64: 1, 1, 144, 128>}, {pipeline_mode = #tpu.pipeline_mode<synchronous>, transform_indices = @transform_1, window_bounds = array<i64: 1, 128>}, {pipeline_mode = #tpu.pipeline_mode<synchronous>, transform_indices = @transform_2, window_bounds = array<i64: 1, 128>}, {transform_indices = @transform_3, window_bounds = array<i64: 1, 1, 144, 128>}]} {
    %c0 = arith.constant 0 : index
    %c0_0 = arith.constant 0 : index
    %c0_1 = arith.constant 0 : index
    %c0_2 = arith.constant 0 : index
    %0 = vector.load %arg2[%c0, %c0_0, %c0_1, %c0_2] : memref<1x1x144x128xf32, #tpu.memory_space<vmem>>, vector<1x1x144x128xf32>
    %1 = vector.shape_cast %0 : vector<1x1x144x128xf32> to vector<144x128xf32>
    %c0_3 = arith.constant 0 : index
    %c0_4 = arith.constant 0 : index
    %2 = vector.load %arg3[%c0_3, %c0_4] : memref<1x128xf32, #tpu.memory_space<vmem>>, vector<1x128xf32>
    %3 = vector.broadcast %2 : vector<1x128xf32> to vector<144x128xf32>
    %4 = arith.mulf %1, %3 : vector<144x128xf32>
    %c0_5 = arith.constant 0 : index
    %c0_6 = arith.constant 0 : index
    %5 = vector.load %arg4[%c0_5, %c0_6] : memref<1x128xf32, #tpu.memory_space<vmem>>, vector<1x128xf32>
    %6 = vector.broadcast %5 : vector<1x128xf32> to vector<144x128xf32>
    %7 = arith.addf %4, %6 : vector<144x128xf32>
    %cst = arith.constant 0.000000e+00 : f32
    %8 = vector.broadcast %cst : f32 to vector<144x128xf32>
    %9 = arith.cmpf oge, %7, %8 : vector<144x128xf32>
    %cst_7 = arith.constant 0.00999999977 : f32
    %10 = vector.broadcast %cst_7 : f32 to vector<144x128xf32>
    %11 = arith.mulf %10, %7 : vector<144x128xf32>
    %12 = arith.select %9, %7, %11 : vector<144x128xi1>, vector<144x128xf32>
    %c0_8 = arith.constant 0 : index
    %c0_9 = arith.constant 0 : index
    %c0_10 = arith.constant 0 : index
    %c0_11 = arith.constant 0 : index
    %13 = vector.load %arg5[%c0_8, %c0_9, %c0_10, %c0_11] : memref<1x1x144x128xf32, #tpu.memory_space<vmem>>, vector<1x1x144x128xf32>
    %14 = vector.shape_cast %13 : vector<1x1x144x128xf32> to vector<144x128xf32>
    %15 = vector.shape_cast %12 : vector<144x128xf32> to vector<1x1x144x128xf32>
    tpu.vector_store %arg5[%c0_8, %c0_9, %c0_10, %c0_11], %15 {strides = array<i32>} : memref<1x1x144x128xf32, #tpu.memory_space<vmem>>, vector<1x1x144x128xf32>,
    return
  }
  func.func @transform_0(%arg0: i32, %arg1: i32) -> (i32, i32, i32, i32) {
    %c0_i32 = arith.constant 0 : i32
    %c0_i32_0 = arith.constant 0 : i32
    %c0_i32_1 = arith.constant 0 : i32
    return %arg0, %arg1, %c0_i32, %c0_i32_0 : i32, i32, i32, i32
  }
  func.func @transform_1(%arg0: i32, %arg1: i32) -> (i32, i32) {
    %c0_i32 = arith.constant 0 : i32
    %c0_i32_0 = arith.constant 0 : i32
    %c0_i32_1 = arith.constant 0 : i32
    return %c0_i32, %c0_i32_0 : i32, i32
  }
  func.func @transform_2(%arg0: i32, %arg1: i32) -> (i32, i32) {
    %c0_i32 = arith.constant 0 : i32
    %c0_i32_0 = arith.constant 0 : i32
    %c0_i32_1 = arith.constant 0 : i32
    return %c0_i32, %c0_i32_0 : i32, i32
  }
  func.func @transform_3(%arg0: i32, %arg1: i32) -> (i32, i32, i32, i32) {
    %c0_i32 = arith.constant 0 : i32
    %c0_i32_0 = arith.constant 0 : i32
    %c0_i32_1 = arith.constant 0 : i32
    return %arg0, %arg1, %c0_i32, %c0_i32_0 : i32, i32, i32, i32
  }
}

module attributes {stable_mosaic.version = 11 : i64} {
  func.func @_conv_stats_kernel(%arg0: i32, %arg1: i32, %arg2: memref<1x1x198x8xbf16, #tpu.memory_space<vmem>>, %arg3: memref<9x8x128xbf16, #tpu.memory_space<vmem>>, %arg4: memref<1x128xf32, #tpu.memory_space<vmem>>, %arg5: memref<1x144x1xf32, #tpu.memory_space<vmem>>, %arg6: memref<1x1x144x128xf32, #tpu.memory_space<vmem>>, %arg7: memref<1x1x2x128xf32, #tpu.memory_space<vmem>>) attributes {dimension_semantics = [#tpu.dimension_semantics<parallel>, #tpu.dimension_semantics<parallel>], iteration_bounds = array<i64: 2, 2>, scalar_prefetch = 0 : i64, scratch_operands = 0 : i64, tpu.core_type = #tpu.core_type<tc>, window_params = [{transform_indices = @transform_0, window_bounds = array<i64: 1, 1, 198, 8>}, {pipeline_mode = #tpu.pipeline_mode<synchronous>, transform_indices = @transform_1, window_bounds = array<i64: 9, 8, 128>}, {pipeline_mode = #tpu.pipeline_mode<synchronous>, transform_indices = @transform_2, window_bounds = array<i64: 1, 128>}, {transform_indices = @transform_3, window_bounds = array<i64: 1, 144, 1>}, {transform_indices = @transform_4, window_bounds = array<i64: 1, 1, 144, 128>}, {transform_indices = @transform_5, window_bounds = array<i64: 1, 1, 2, 128>}]} {
    %cst = arith.constant 0.000000e+00 : f32
    %0 = vector.broadcast %cst : f32 to vector<144x128xf32>
    %c0 = arith.constant 0 : index
    %c0_0 = arith.constant 0 : index
    %c0_1 = arith.constant 0 : index
    %c0_2 = arith.constant 0 : index
    %1 = vector.load %arg2[%c0, %c0_0, %c0_1, %c0_2] : memref<1x1x198x8xbf16, #tpu.memory_space<vmem>>, vector<1x1x144x8xbf16>
    %2 = vector.shape_cast %1 : vector<1x1x144x8xbf16> to vector<144x8xbf16>
    %c0_3 = arith.constant 0 : index
    %c0_4 = arith.constant 0 : index
    %c0_5 = arith.constant 0 : index
    %3 = vector.load %arg3[%c0_3, %c0_4, %c0_5] : memref<9x8x128xbf16, #tpu.memory_space<vmem>>, vector<1x8x128xbf16>
    %4 = vector.shape_cast %3 : vector<1x8x128xbf16> to vector<8x128xbf16>
    %cst_6 = arith.constant dense<0.000000e+00> : vector<144x128xf32>
    %5 = tpu.matmul %2, %4, %cst_6 {dimension_numbers = #tpu.dot_dimension_numbers<[1], [0], [0], [1], [0, 0, 1, 1], [], []>} : vector<144x8xbf16>, vector<8x128xbf16>, vector<144x128xf32> -> vector<144x128xf32>
    %6 = arith.addf %0, %5 : vector<144x128xf32>
    %c0_7 = arith.constant 0 : index
    %c0_8 = arith.constant 0 : index
    %c1 = arith.constant 1 : index
    %c0_9 = arith.constant 0 : index
    %7 = vector.load %arg2[%c0_7, %c0_8, %c1, %c0_9] : memref<1x1x198x8xbf16, #tpu.memory_space<vmem>>, vector<1x1x144x8xbf16>
    %8 = vector.shape_cast %7 : vector<1x1x144x8xbf16> to vector<144x8xbf16>
    %c1_10 = arith.constant 1 : index
    %c0_11 = arith.constant 0 : index
    %c0_12 = arith.constant 0 : index
    %9 = vector.load %arg3[%c1_10, %c0_11, %c0_12] : memref<9x8x128xbf16, #tpu.memory_space<vmem>>, vector<1x8x128xbf16>
    %10 = vector.shape_cast %9 : vector<1x8x128xbf16> to vector<8x128xbf16>
    %cst_13 = arith.constant dense<0.000000e+00> : vector<144x128xf32>
    %11 = tpu.matmul %8, %10, %cst_13 {dimension_numbers = #tpu.dot_dimension_numbers<[1], [0], [0], [1], [0, 0, 1, 1], [], []>} : vector<144x8xbf16>, vector<8x128xbf16>, vector<144x128xf32> -> vector<144x128xf32>
    %12 = arith.addf %6, %11 : vector<144x128xf32>
    %c0_14 = arith.constant 0 : index
    %c0_15 = arith.constant 0 : index
    %c2 = arith.constant 2 : index
    %c0_16 = arith.constant 0 : index
    %13 = vector.load %arg2[%c0_14, %c0_15, %c2, %c0_16] : memref<1x1x198x8xbf16, #tpu.memory_space<vmem>>, vector<1x1x144x8xbf16>
    %14 = vector.shape_cast %13 : vector<1x1x144x8xbf16> to vector<144x8xbf16>
    %c2_17 = arith.constant 2 : index
    %c0_18 = arith.constant 0 : index
    %c0_19 = arith.constant 0 : index
    %15 = vector.load %arg3[%c2_17, %c0_18, %c0_19] : memref<9x8x128xbf16, #tpu.memory_space<vmem>>, vector<1x8x128xbf16>
    %16 = vector.shape_cast %15 : vector<1x8x128xbf16> to vector<8x128xbf16>
    %cst_20 = arith.constant dense<0.000000e+00> : vector<144x128xf32>
    %17 = tpu.matmul %14, %16, %cst_20 {dimension_numbers = #tpu.dot_dimension_numbers<[1], [0], [0], [1], [0, 0, 1, 1], [], []>} : vector<144x8xbf16>, vector<8x128xbf16>, vector<144x128xf32> -> vector<144x128xf32>
    %18 = arith.addf %12, %17 : vector<144x128xf32>
    %c0_21 = arith.constant 0 : index
    %c0_22 = arith.constant 0 : index
    %c18 = arith.constant 18 : index
    %c0_23 = arith.constant 0 : index
    %19 = vector.load %arg2[%c0_21, %c0_22, %c18, %c0_23] : memref<1x1x198x8xbf16, #tpu.memory_space<vmem>>, vector<1x1x144x8xbf16>
    %20 = vector.shape_cast %19 : vector<1x1x144x8xbf16> to vector<144x8xbf16>
    %c3 = arith.constant 3 : index
    %c0_24 = arith.constant 0 : index
    %c0_25 = arith.constant 0 : index
    %21 = vector.load %arg3[%c3, %c0_24, %c0_25] : memref<9x8x128xbf16, #tpu.memory_space<vmem>>, vector<1x8x128xbf16>
    %22 = vector.shape_cast %21 : vector<1x8x128xbf16> to vector<8x128xbf16>
    %cst_26 = arith.constant dense<0.000000e+00> : vector<144x128xf32>
    %23 = tpu.matmul %20, %22, %cst_26 {dimension_numbers = #tpu.dot_dimension_numbers<[1], [0], [0], [1], [0, 0, 1, 1], [], []>} : vector<144x8xbf16>, vector<8x128xbf16>, vector<144x128xf32> -> vector<144x128xf32>
    %24 = arith.addf %18, %23 : vector<144x128xf32>
    %c0_27 = arith.constant 0 : index
    %c0_28 = arith.constant 0 : index
    %c19 = arith.constant 19 : index
    %c0_29 = arith.constant 0 : index
    %25 = vector.load %arg2[%c0_27, %c0_28, %c19, %c0_29] : memref<1x1x198x8xbf16, #tpu.memory_space<vmem>>, vector<1x1x144x8xbf16>
    %26 = vector.shape_cast %25 : vector<1x1x144x8xbf16> to vector<144x8xbf16>
    %c4 = arith.constant 4 : index
    %c0_30 = arith.constant 0 : index
    %c0_31 = arith.constant 0 : index
    %27 = vector.load %arg3[%c4, %c0_30, %c0_31] : memref<9x8x128xbf16, #tpu.memory_space<vmem>>, vector<1x8x128xbf16>
    %28 = vector.shape_cast %27 : vector<1x8x128xbf16> to vector<8x128xbf16>
    %cst_32 = arith.constant dense<0.000000e+00> : vector<144x128xf32>
    %29 = tpu.matmul %26, %28, %cst_32 {dimension_numbers = #tpu.dot_dimension_numbers<[1], [0], [0], [1], [0, 0, 1, 1], [], []>} : vector<144x8xbf16>, vector<8x128xbf16>, vector<144x128xf32> -> vector<144x128xf32>
    %30 = arith.addf %24, %29 : vector<144x128xf32>
    %c0_33 = arith.constant 0 : index
    %c0_34 = arith.constant 0 : index
    %c20 = arith.constant 20 : index
    %c0_35 = arith.constant 0 : index
    %31 = vector.load %arg2[%c0_33, %c0_34, %c20, %c0_35] : memref<1x1x198x8xbf16, #tpu.memory_space<vmem>>, vector<1x1x144x8xbf16>
    %32 = vector.shape_cast %31 : vector<1x1x144x8xbf16> to vector<144x8xbf16>
    %c5 = arith.constant 5 : index
    %c0_36 = arith.constant 0 : index
    %c0_37 = arith.constant 0 : index
    %33 = vector.load %arg3[%c5, %c0_36, %c0_37] : memref<9x8x128xbf16, #tpu.memory_space<vmem>>, vector<1x8x128xbf16>
    %34 = vector.shape_cast %33 : vector<1x8x128xbf16> to vector<8x128xbf16>
    %cst_38 = arith.constant dense<0.000000e+00> : vector<144x128xf32>
    %35 = tpu.matmul %32, %34, %cst_38 {dimension_numbers = #tpu.dot_dimension_numbers<[1], [0], [0], [1], [0, 0, 1, 1], [], []>} : vector<144x8xbf16>, vector<8x128xbf16>, vector<144x128xf32> -> vector<144x128xf32>
    %36 = arith.addf %30, %35 : vector<144x128xf32>
    %c0_39 = arith.constant 0 : index
    %c0_40 = arith.constant 0 : index
    %c36 = arith.constant 36 : index
    %c0_41 = arith.constant 0 : index
    %37 = vector.load %arg2[%c0_39, %c0_40, %c36, %c0_41] : memref<1x1x198x8xbf16, #tpu.memory_space<vmem>>, vector<1x1x144x8xbf16>
    %38 = vector.shape_cast %37 : vector<1x1x144x8xbf16> to vector<144x8xbf16>
    %c6 = arith.constant 6 : index
    %c0_42 = arith.constant 0 : index
    %c0_43 = arith.constant 0 : index
    %39 = vector.load %arg3[%c6, %c0_42, %c0_43] : memref<9x8x128xbf16, #tpu.memory_space<vmem>>, vector<1x8x128xbf16>
    %40 = vector.shape_cast %39 : vector<1x8x128xbf16> to vector<8x128xbf16>
    %cst_44 = arith.constant dense<0.000000e+00> : vector<144x128xf32>
    %41 = tpu.matmul %38, %40, %cst_44 {dimension_numbers = #tpu.dot_dimension_numbers<[1], [0], [0], [1], [0, 0, 1, 1], [], []>} : vector<144x8xbf16>, vector<8x128xbf16>, vector<144x128xf32> -> vector<144x128xf32>
    %42 = arith.addf %36, %41 : vector<144x128xf32>
    %c0_45 = arith.constant 0 : index
    %c0_46 = arith.constant 0 : index
    %c37 = arith.constant 37 : index
    %c0_47 = arith.constant 0 : index
    %43 = vector.load %arg2[%c0_45, %c0_46, %c37, %c0_47] : memref<1x1x198x8xbf16, #tpu.memory_space<vmem>>, vector<1x1x144x8xbf16>
    %44 = vector.shape_cast %43 : vector<1x1x144x8xbf16> to vector<144x8xbf16>
    %c7 = arith.constant 7 : index
    %c0_48 = arith.constant 0 : index
    %c0_49 = arith.constant 0 : index
    %45 = vector.load %arg3[%c7, %c0_48, %c0_49] : memref<9x8x128xbf16, #tpu.memory_space<vmem>>, vector<1x8x128xbf16>
    %46 = vector.shape_cast %45 : vector<1x8x128xbf16> to vector<8x128xbf16>
    %cst_50 = arith.constant dense<0.000000e+00> : vector<144x128xf32>
    %47 = tpu.matmul %44, %46, %cst_50 {dimension_numbers = #tpu.dot_dimension_numbers<[1], [0], [0], [1], [0, 0, 1, 1], [], []>} : vector<144x8xbf16>, vector<8x128xbf16>, vector<144x128xf32> -> vector<144x128xf32>
    %48 = arith.addf %42, %47 : vector<144x128xf32>
    %c0_51 = arith.constant 0 : index
    %c0_52 = arith.constant 0 : index
    %c38 = arith.constant 38 : index
    %c0_53 = arith.constant 0 : index
    %49 = vector.load %arg2[%c0_51, %c0_52, %c38, %c0_53] : memref<1x1x198x8xbf16, #tpu.memory_space<vmem>>, vector<1x1x144x8xbf16>
    %50 = vector.shape_cast %49 : vector<1x1x144x8xbf16> to vector<144x8xbf16>
    %c8 = arith.constant 8 : index
    %c0_54 = arith.constant 0 : index
    %c0_55 = arith.constant 0 : index
    %51 = vector.load %arg3[%c8, %c0_54, %c0_55] : memref<9x8x128xbf16, #tpu.memory_space<vmem>>, vector<1x8x128xbf16>
    %52 = vector.shape_cast %51 : vector<1x8x128xbf16> to vector<8x128xbf16>
    %cst_56 = arith.constant dense<0.000000e+00> : vector<144x128xf32>
    %53 = tpu.matmul %50, %52, %cst_56 {dimension_numbers = #tpu.dot_dimension_numbers<[1], [0], [0], [1], [0, 0, 1, 1], [], []>} : vector<144x8xbf16>, vector<8x128xbf16>, vector<144x128xf32> -> vector<144x128xf32>
    %54 = arith.addf %48, %53 : vector<144x128xf32>
    %c0_57 = arith.constant 0 : index
    %c0_58 = arith.constant 0 : index
    %55 = vector.load %arg4[%c0_57, %c0_58] : memref<1x128xf32, #tpu.memory_space<vmem>>, vector<1x128xf32>
    %56 = vector.broadcast %55 : vector<1x128xf32> to vector<144x128xf32>
    %57 = arith.addf %54, %56 : vector<144x128xf32>
    %c0_59 = arith.constant 0 : index
    %c0_60 = arith.constant 0 : index
    %c0_61 = arith.constant 0 : index
    %c0_62 = arith.constant 0 : index
    %58 = vector.load %arg6[%c0_59, %c0_60, %c0_61, %c0_62] : memref<1x1x144x128xf32, #tpu.memory_space<vmem>>, vector<1x1x144x128xf32>
    %59 = vector.shape_cast %58 : vector<1x1x144x128xf32> to vector<144x128xf32>
    %60 = vector.shape_cast %57 : vector<144x128xf32> to vector<1x1x144x128xf32>
    tpu.vector_store %arg6[%c0_59, %c0_60, %c0_61, %c0_62], %60 {strides = array<i32>} : memref<1x1x144x128xf32, #tpu.memory_space<vmem>>, vector<1x1x144x128xf32>,
    %c0_63 = arith.constant 0 : index
    %c0_64 = arith.constant 0 : index
    %c0_65 = arith.constant 0 : index
    %61 = vector.load %arg5[%c0_63, %c0_64, %c0_65] : memref<1x144x1xf32, #tpu.memory_space<vmem>>, vector<1x144x1xf32>
    %62 = vector.shape_cast %61 : vector<1x144x1xf32> to vector<144x1xf32>
    %63 = vector.broadcast %62 : vector<144x1xf32> to vector<144x128xf32>
    %64 = arith.mulf %57, %63 : vector<144x128xf32>
    %cst_66 = arith.constant dense<0.000000e+00> : vector<128xf32>
    %65 = vector.multi_reduction <add>, %64, %cst_66 [0] : vector<144x128xf32> to vector<128xf32>
    %66 = vector.shape_cast %65 : vector<128xf32> to vector<1x128xf32>
    %67 = arith.mulf %64, %57 : vector<144x128xf32>
    %cst_67 = arith.constant dense<0.000000e+00> : vector<128xf32>
    %68 = vector.multi_reduction <add>, %67, %cst_67 [0] : vector<144x128xf32> to vector<128xf32>
    %69 = vector.shape_cast %68 : vector<128xf32> to vector<1x128xf32>
    %70 = tpu.concatenate %66, %69 in 0 : vector<1x128xf32>, vector<1x128xf32> -> vector<2x128xf32>
    %c0_68 = arith.constant 0 : index
    %c0_69 = arith.constant 0 : index
    %c0_70 = arith.constant 0 : index
    %c0_71 = arith.constant 0 : index
    %71 = vector.load %arg7[%c0_68, %c0_69, %c0_70, %c0_71] : memref<1x1x2x128xf32, #tpu.memory_space<vmem>>, vector<1x1x2x128xf32>
    %72 = vector.shape_cast %71 : vector<1x1x2x128xf32> to vector<2x128xf32>
    %73 = vector.shape_cast %70 : vector<2x128xf32> to vector<1x1x2x128xf32>
    tpu.vector_store %arg7[%c0_68, %c0_69, %c0_70, %c0_71], %73 {strides = array<i32>} : memref<1x1x2x128xf32, #tpu.memory_space<vmem>>, vector<1x1x2x128xf32>,
    return
  }
  func.func @transform_0(%arg0: i32, %arg1: i32) -> (i32, i32, i32, i32) {
    %c0_i32 = arith.constant 0 : i32
    %c0_i32_0 = arith.constant 0 : i32
    %c0_i32_1 = arith.constant 0 : i32
    return %arg0, %arg1, %c0_i32, %c0_i32_0 : i32, i32, i32, i32
  }
  func.func @transform_1(%arg0: i32, %arg1: i32) -> (i32, i32, i32) {
    %c0_i32 = arith.constant 0 : i32
    %c0_i32_0 = arith.constant 0 : i32
    %c0_i32_1 = arith.constant 0 : i32
    %c0_i32_2 = arith.constant 0 : i32
    return %c0_i32, %c0_i32_0, %c0_i32_1 : i32, i32, i32
  }
  func.func @transform_2(%arg0: i32, %arg1: i32) -> (i32, i32) {
    %c0_i32 = arith.constant 0 : i32
    %c0_i32_0 = arith.constant 0 : i32
    %c0_i32_1 = arith.constant 0 : i32
    return %c0_i32, %c0_i32_0 : i32, i32
  }
  func.func @transform_3(%arg0: i32, %arg1: i32) -> (i32, i32, i32) {
    %c0_i32 = arith.constant 0 : i32
    %c0_i32_0 = arith.constant 0 : i32
    %c0_i32_1 = arith.constant 0 : i32
    return %arg1, %c0_i32, %c0_i32_0 : i32, i32, i32
  }
  func.func @transform_4(%arg0: i32, %arg1: i32) -> (i32, i32, i32, i32) {
    %c0_i32 = arith.constant 0 : i32
    %c0_i32_0 = arith.constant 0 : i32
    %c0_i32_1 = arith.constant 0 : i32
    return %arg0, %arg1, %c0_i32, %c0_i32_0 : i32, i32, i32, i32
  }
  func.func @transform_5(%arg0: i32, %arg1: i32) -> (i32, i32, i32, i32) {
    %c0_i32 = arith.constant 0 : i32
    %c0_i32_0 = arith.constant 0 : i32
    %c0_i32_1 = arith.constant 0 : i32
    return %arg0, %arg1, %c0_i32, %c0_i32_0 : i32, i32, i32, i32
  }
}

</mosaic_0001>

<bundles_post_ra>
// kernel: stacked_conv_layers.5
= control target key start
LH: loop header
LB: loop body
LE: loop exit
PB: predicated region body
PF: predicated region fallthrough
CT: control target
= control target key end

     0   :  { %s555_s12 = smov 0   ;;  %s557_s13 = smov 0   ;;  %s695_s0 = inlined_call_operand.vmem [shape: f32[2,2,144,128], index: 0, kind: input, shape index: {}]   ;;  %s696_s1 = inlined_call_operand.vmem [shape: f32[1,128], index: 1, kind: input, shape index: {}]   ;;  %s697_s2 = inlined_call_operand.vmem [shape: f32[1,128], index: 2, kind: input, shape index: {}]   ;;  %s698_s3 = inlined_call_operand.vmem [shape: f32[2,2,144,128], index: 3, kind: output, shape index: {}]  }
   0x1   :  { %s559_s14 = smov 0   ;;  %s561_s15 = smov 0  }
   0x2   :  { %s563_s16 = smov 0  }
   0x3 LB: > { %s22_s17 = sadd.s32 1, %s525_s14  ;;  %s25_s18 = sadd.s32 1, %s529_s15  ;;  %s533_s16 = sphi %s563_s16, %s13_s16   ;;  %s529_s15 = sphi %s561_s15, %s702_s15   ;;  %s525_s14 = sphi %s559_s14, %s701_s14   ;;  %s521_s13 = sphi %s557_s13, %s700_s13   ;;  %s517_s12 = sphi %s555_s12, %s699_s12  }
   0x4   : > { %p23_p0 = scmp.ge.s32.totalorder %s22_s17, 2  ;;  %p446_p1 = scmp.ge.s32.totalorder %s533_s16, 1 }
   0x5   : > { %p157_p2 = scmp.lt.s32.totalorder %s533_s16, 5 }
   0x6   : > { %s704_s17 = smov (%p23_p0, %s22_s17), 0  ;;  %s706_s18 = smov (!%p23_p0, %s25_s18), %s529_s15 }
   0x7   : > { %p158_p3 = pnand %p446_p1, %p157_p2  ;;  %p27_p4 = scmp.ge.s32.totalorder %s706_s18, 2 }
   0x8   : > { %p189_p5 = scmp.lt.s32.totalorder (!%p158_p3), %s521_s13, 1  ;;  %p191_p6 = scmp.lt.s32.totalorder (!%p158_p3), %s517_s12, 1  ;;  %v591_v0 = vld [vmem:[%s696_s1] ss:$0 sm:$0xff] (!%p158_p3) }
   0x9   : > { %s708_s18 = smov (%p27_p4, %s706_s18), 0  ;;  %161 = sbr.rel (%p158_p3) target bundleno = 52 (0x34), region = 32 }
   0xa   : > { %v601_v1 = vld [vmem:[%s697_s2] ss:$0 sm:$0xff] (!%p158_p3) }
  0x10   : > { %s710_s13 = smov (!%p189_p5, %s521_s13), 1  ;;  %s712_s12 = smov (!%p191_p6, %s517_s12), 1 }
  0x11   : > { %s454_s19 = smul.u32 36, %s710_s13 }
  0x12   : > { %s453_s20 = smul.u32 18, %s712_s12 }
  0x14   : > { %s585_s21 = sadd.s32 %s454_s19, %s453_s20 }
  0x15   : > { %s447_s22 = sshll.u32 %s585_s21, 3 }
  0x16   : > { %s596_s27 = scalar_lea.vmem %s695_s0, %s447_s22  ;;  %s629_s5 = scalar_lea.vmem %s698_s3, %s447_s22 }
  0x17   : > { %v207_v2 = vld [vmem:[%s596_s27] sm:$0xff]  ;;  %v208_v3 = vld [vmem:[%s596_s27 + $0x8] sm:$0xff]  ;;  %v209_v4 = vld [vmem:[%s596_s27 + $0x10] sm:$0xff] }
  0x18   : > { %v232_v5 = vmul.f32 %v591_v0, %v207_v2  ;;  %v233_v6 = vmul.f32 %v591_v0, %v208_v3  ;;  %v234_v7 = vmul.f32 %v591_v0, %v209_v4  ;;  %v210_v8 = vld [vmem:[%s596_s27 + $0x18] sm:$0xff]  ;;  %v211_v9 = vld [vmem:[%s596_s27 + $0x20] sm:$0xff]  ;;  %v212_v10 = vld [vmem:[%s596_s27 + $0x28] sm:$0xff] }
  0x19   : > { %v235_v11 = vmul.f32 %v591_v0, %v210_v8  ;;  %v236_v12 = vmul.f32 %v591_v0, %v211_v9  ;;  %v237_v13 = vmul.f32 %v591_v0, %v212_v10  ;;  %v213_v14 = vld [vmem:[%s596_s27 + $0x30] sm:$0xff]  ;;  %v214_v15 = vld [vmem:[%s596_s27 + $0x38] sm:$0xff]  ;;  %v215_v24 = vld [vmem:[%s596_s27 + $0x40] sm:$0xff] }
  0x1a   : > { %v257_v16 = vadd.f32 %v601_v1, %v232_v5  ;;  %v258_v17 = vadd.f32 %v601_v1, %v233_v6  ;;  %v259_v18 = vadd.f32 %v601_v1, %v234_v7  ;;  %v238_v19 = vmul.f32 %v591_v0, %v213_v14  ;;  %v216_v32 = vld [vmem:[%s596_s27 + $0x48] sm:$0xff]  ;;  %v217_v33 = vld [vmem:[%s596_s27 + $0x50] sm:$0xff]  ;;  %v218_v34 = vld [vmem:[%s596_s27 + $0x58] sm:$0xff] }
  0x1b   : > { %v260_v20 = vadd.f32 %v601_v1, %v235_v11  ;;  %v261_v21 = vadd.f32 %v601_v1, %v236_v12  ;;  %v262_v22 = vadd.f32 %v601_v1, %v237_v13  ;;  %v239_v23 = vmul.f32 %v591_v0, %v214_v15  ;;  %v219_v46 = vld [vmem:[%s596_s27 + $0x60] sm:$0xff]  ;;  %v220_v47 = vld [vmem:[%s596_s27 + $0x68] sm:$0xff]  ;;  %v221_v58 = vld [vmem:[%s596_s27 + $0x70] sm:$0xff] }
  0x1c   : > { %vm275_vm0 = vcmp.ge.f32.partialorder %v257_v16, 0.0  ;;  %v293_v25 = vmul.f32 0.01, %v257_v16  ;;  %vm276_vm1 = vcmp.ge.f32.partialorder %v258_v17, 0.0  ;;  %v294_v26 = vmul.f32 0.01, %v258_v17 }
  0x1d   : > { %vm277_vm2 = vcmp.ge.f32.partialorder %v259_v18, 0.0  ;;  %v295_v27 = vmul.f32 0.01, %v259_v18  ;;  %vm278_vm3 = vcmp.ge.f32.partialorder %v260_v20, 0.0  ;;  %v296_v28 = vmul.f32 0.01, %v260_v20 }
  0x1e   : > { %v311_v29 = vsel %vm275_vm0, %v257_v16, %v293_v25  ;;  %v312_v30 = vsel %vm276_vm1, %v258_v17, %v294_v26  ;;  %vm279_vm4 = vcmp.ge.f32.partialorder %v261_v21, 0.0  ;;  %v297_v31 = vmul.f32 0.01, %v261_v21  ;;  %v222_v59 = vld [vmem:[%s596_s27 + $0x78] sm:$0xff]  ;;  %v223_v6 = vld [vmem:[%s596_s27 + $0x80] sm:$0xff]  ;;  %v224_v7 = vld [vmem:[%s596_s27 + $0x88] sm:$0xff] }
  0x1f   : > { %329 = vst [vmem:[%s629_s5] sm:$0xff] %v311_v29  ;;  %330 = vst [vmem:[%s629_s5 + $0x8] sm:$0xff] %v312_v30  ;;  %v313_v35 = vsel %vm277_vm2, %v259_v18, %v295_v27  ;;  %v314_v36 = vsel %vm278_vm3, %v260_v20, %v296_v28  ;;  %vm280_vm5 = vcmp.ge.f32.partialorder %v262_v22, 0.0  ;;  %v298_v37 = vmul.f32 0.01, %v262_v22 }
  0x20   : > { %331 = vst [vmem:[%s629_s5 + $0x10] sm:$0xff] %v313_v35  ;;  %332 = vst [vmem:[%s629_s5 + $0x18] sm:$0xff] %v314_v36  ;;  %v315_v38 = vsel %vm279_vm4, %v261_v21, %v297_v31  ;;  %v263_v39 = vadd.f32 %v601_v1, %v238_v19  ;;  %v264_v40 = vadd.f32 %v601_v1, %v239_v23 }
  0x21   : > { %v240_v41 = vmul.f32 %v591_v0, %v215_v24  ;;  %333 = vst [vmem:[%s629_s5 + $0x20] sm:$0xff] %v315_v38  ;;  %v316_v42 = vsel %vm280_vm5, %v262_v22, %v298_v37  ;;  %v241_v43 = vmul.f32 %v591_v0, %v216_v32  ;;  %v242_v44 = vmul.f32 %v591_v0, %v217_v33 }
  0x22   : > { %v243_v45 = vmul.f32 %v591_v0, %v218_v34  ;;  %334 = vst [vmem:[%s629_s5 + $0x28] sm:$0xff] %v316_v42  ;;  %vm281_vm6 = vcmp.ge.f32.partialorder %v263_v39, 0.0  ;;  %v299_v48 = vmul.f32 0.01, %v263_v39  ;;  %vm282_vm7 = vcmp.ge.f32.partialorder %v264_v40, 0.0 }
  0x23   : > { %v300_v49 = vmul.f32 0.01, %v264_v40  ;;  %v265_v50 = vadd.f32 %v601_v1, %v240_v41  ;;  %v266_v51 = vadd.f32 %v601_v1, %v241_v43  ;;  %v267_v52 = vadd.f32 %v601_v1, %v242_v44 }
  0x24   : > { %v268_v53 = vadd.f32 %v601_v1, %v243_v45  ;;  %v317_v54 = vsel %vm281_vm6, %v263_v39, %v299_v48  ;;  %v244_v56 = vmul.f32 %v591_v0, %v219_v46  ;;  %v245_v57 = vmul.f32 %v591_v0, %v220_v47 }
  0x25   : > { %v318_v55 = vsel %vm282_vm7, %v264_v40, %v300_v49  ;;  %335 = vst [vmem:[%s629_s5 + $0x30] sm:$0xff] %v317_v54  ;;  %vm283_vm8 = vcmp.ge.f32.partialorder %v265_v50, 0.0  ;;  %v301_v60 = vmul.f32 0.01, %v265_v50  ;;  %vm284_vm9 = vcmp.ge.f32.partialorder %v266_v51, 0.0 }
  0x26   : > { %336 = vst [vmem:[%s629_s5 + $0x38] sm:$0xff] %v318_v55  ;;  %v302_v61 = vmul.f32 0.01, %v266_v51  ;;  %vm285_vm10 = vcmp.ge.f32.partialorder %v267_v52, 0.0  ;;  %v303_v62 = vmul.f32 0.01, %v267_v52  ;;  %v269_v4 = vadd.f32 %v601_v1, %v244_v56 }
  0x27   : > { %vm286_vm11 = vcmp.ge.f32.partialorder %v268_v53, 0.0  ;;  %v304_v63 = vmul.f32 0.01, %v268_v53  ;;  %v319_v2 = vsel %vm283_vm8, %v265_v50, %v301_v60  ;;  %v270_v5 = vadd.f32 %v601_v1, %v245_v57 }
  0x28   : > { %v320_v3 = vsel %vm284_vm9, %v266_v51, %v302_v61  ;;  %337 = vst [vmem:[%s629_s5 + $0x40] sm:$0xff] %v319_v2  ;;  %v321_v8 = vsel %vm285_vm10, %v267_v52, %v303_v62  ;;  %v246_v10 = vmul.f32 %v591_v0, %v221_v58  ;;  %v247_v11 = vmul.f32 %v591_v0, %v222_v59 }
  0x29   : > { %338 = vst [vmem:[%s629_s5 + $0x48] sm:$0xff] %v320_v3  ;;  %v322_v9 = vsel %vm286_vm11, %v268_v53, %v304_v63  ;;  %339 = vst [vmem:[%s629_s5 + $0x50] sm:$0xff] %v321_v8  ;;  %vm287_vm12 = vcmp.ge.f32.partialorder %v269_v4, 0.0  ;;  %v305_v12 = vmul.f32 0.01, %v269_v4  ;;  %vm288_vm13 = vcmp.ge.f32.partialorder %v270_v5, 0.0 }
  0x2a   : > { %340 = vst [vmem:[%s629_s5 + $0x58] sm:$0xff] %v322_v9  ;;  %v306_v13 = vmul.f32 0.01, %v270_v5  ;;  %v271_v14 = vadd.f32 %v601_v1, %v246_v10  ;;  %v272_v15 = vadd.f32 %v601_v1, %v247_v11  ;;  %v248_v16 = vmul.f32 %v591_v0, %v223_v6 }
  0x2b   : > { %v249_v17 = vmul.f32 %v591_v0, %v224_v7  ;;  %v323_v18 = vsel %vm287_vm12, %v269_v4, %v305_v12 }
  0x2c   : > { %v324_v19 = vsel %vm288_vm13, %v270_v5, %v306_v13  ;;  %341 = vst [vmem:[%s629_s5 + $0x60] sm:$0xff] %v323_v18  ;;  %vm289_vm14 = vcmp.ge.f32.partialorder %v271_v14, 0.0  ;;  %v307_v20 = vmul.f32 0.01, %v271_v14  ;;  %vm290_vm15 = vcmp.ge.f32.partialorder %v272_v15, 0.0 }
  0x2d   : > { %342 = vst [vmem:[%s629_s5 + $0x68] sm:$0xff] %v324_v19  ;;  %v308_v21 = vmul.f32 0.01, %v272_v15  ;;  %v273_v22 = vadd.f32 %v601_v1, %v248_v16  ;;  %v274_v23 = vadd.f32 %v601_v1, %v249_v17 }
  0x2e   : > { %v325_v24 = vsel %vm289_vm14, %v271_v14, %v307_v20 }
  0x2f   : > { %v326_v25 = vsel %vm290_vm15, %v272_v15, %v308_v21  ;;  %343 = vst [vmem:[%s629_s5 + $0x70] sm:$0xff] %v325_v24  ;;  %vm291_vm0 = vcmp.ge.f32.partialorder %v273_v22, 0.0  ;;  %v309_v0 = vmul.f32 0.01, %v273_v22  ;;  %vm292_vm1 = vcmp.ge.f32.partialorder %v274_v23, 0.0 }
  0x30   : > { %344 = vst [vmem:[%s629_s5 + $0x78] sm:$0xff] %v326_v25  ;;  %v310_v26 = vmul.f32 0.01, %v274_v23 }
  0x31   : > { %v327_v27 = vsel %vm291_vm0, %v273_v22, %v309_v0 }
  0x32   : > { %v328_v28 = vsel %vm292_vm1, %v274_v23, %v310_v26  ;;  %345 = vst [vmem:[%s629_s5 + $0x80] sm:$0xff] %v327_v27 }
  0x33   : > { %346 = vst [vmem:[%s629_s5 + $0x88] sm:$0xff] %v328_v28 }
  0x34 PF: > { %s13_s16 = sadd.s32 1, %s533_s16   ;;  %s699_s12 = smov %s525_s14 }
  0x35   : > { %p10_p7 = scmp.ge.s32.totalorder %s13_s16, 6   ;;  %s700_s13 = smov %s529_s15 }
  0x36   : > { %s701_s14 = smov %s704_s17  ;;  %s702_s15 = smov %s708_s18 }
  0x37   :  { %12 = sbr.rel (!%p10_p7) target bundleno = 3 (0x3), region = 62 }

// kernel: stacked_conv_layers.4
= control target key start
LH: loop header
LB: loop body
LE: loop exit
PB: predicated region body
PF: predicated region fallthrough
CT: control target
= control target key end

     0   :  { %s3349_s18 = smov 0   ;;  %s3351_s19 = smov 0   ;;  %s4298_s0 = inlined_call_operand.vmem [shape: bf16[2,2,198,4], index: 0, kind: input, shape index: {}]   ;;  %s4299_s1 = inlined_call_operand.vmem [shape: bf16[9,4,128], index: 1, kind: input, shape index: {}]   ;;  %s4300_s2 = inlined_call_operand.vmem [shape: f32[1,128], index: 2, kind: input, shape index: {}]   ;;  %s4301_s3 = inlined_call_operand.vmem [shape: f32[2,144,1], index: 3, kind: input, shape index: {}]   ;;  %s4302_s4 = inlined_call_operand.vmem [shape: f32[2,2,144,128], index: 4, kind: output, shape index: {0}]   ;;  %s4303_s5 = inlined_call_operand.vmem [shape: f32[2,2,2,128], index: 5, kind: output, shape index: {1}]  }
   0x1   :  { %s3353_s20 = smov 0   ;;  %s3355_s21 = smov 0  }
   0x2   :  { %s3357_s22 = smov 0  }
   0x3 LB: > { %s25_s23 = sadd.s32 1, %s3306_s20  ;;  %s28_s24 = sadd.s32 1, %s3310_s21  ;;  %s3314_s22 = sphi %s3357_s22, %s16_s22   ;;  %s3310_s21 = sphi %s3355_s21, %s4307_s21   ;;  %s3306_s20 = sphi %s3353_s20, %s4306_s20   ;;  %s3302_s19 = sphi %s3351_s19, %s4305_s19   ;;  %s3298_s18 = sphi %s3349_s18, %s4304_s18  }
   0x4   : > { %p26_p0 = scmp.ge.s32.totalorder %s25_s23, 2  ;;  %p2624_p1 = scmp.ge.s32.totalorder %s3314_s22, 1 }
   0x5   : > { %p222_p2 = scmp.lt.s32.totalorder %s3314_s22, 5 }
   0x6   : > { %s4309_s23 = smov (%p26_p0, %s25_s23), 0  ;;  %s4311_s24 = smov (!%p26_p0, %s28_s24), %s3310_s21 }
   0x7   : > { %p223_p3 = pnand %p2624_p1, %p222_p2  ;;  %p30_p4 = scmp.ge.s32.totalorder %s4311_s24, 2 }
   0x8   : > { %v2630_v0 = vld [vmem:[%s4299_s1 + $0x2] sm:$0x3] (!%p223_p3)  ;;  %vm478_vm0 = vcmask (!%p223_p3), 1041408   ;;  %p271_p5 = scmp.lt.s32.totalorder (!%p223_p3), %s3302_s19, 1  ;;  %v3316_v1 = vmov (!%p223_p3), 0.0   ;;  %p273_p6 = scmp.lt.s32.totalorder (!%p223_p3), %s3298_s18, 1 }
   0x9   : > { %s4313_s24 = smov (%p30_p4, %s4311_s24), 0  ;;  %226 = sbr.rel (%p223_p3) target bundleno = 591 (0x24f), region = 36 }
   0xa   : > { %2847 = vmatprep.subr.bf16.mxu0 (!%p223_p3), %v3316_v1  ;;  %3189 = vmatprep.subr.bf16.mxu1 (!%p223_p3), %v3316_v1  ;;  %v480_v2 = vsel (!%p223_p3), %vm478_vm0, %v2630_v0, 0  ;;  %vm3317_vm1 = vmmov (!%p223_p3), 0   ;;  %vm373_vm2 = vsmask.f32 (!%p223_p3), 7424  ;;  %v2659_v12 = vld [vmem:[%s4299_s1 + $0x4] sm:$0x3] (!%p223_p3) }
   0xb   : > { %2848 = vmatpush3.bf16.msra.mxu0 (!%p223_p3), %v480_v2  ;;  %3190 = vmatpush3.bf16.msra.mxu1 (!%p223_p3), %v480_v2  ;;  %vm450_vm3 = vcmask (!%p223_p3), 31744   ;;  %v321_v20 = vld [vmem:[%s4299_s1] sm:$0x3] (!%p223_p3)  ;;  %v767_v26 = vsel (!%p223_p3), %vm478_vm0, %v2659_v12, 0  ;;  %vm719_vm4 = vcmask (!%p223_p3), 1046528   ;;  %vm1388_vm5 = vcmask (!%p223_p3), 1045504  }
   0xc   : > { %2849 = vmatprep.mubr.msk.bf16.mxu0 (!%p223_p3), %vm3317_vm1, %v3316_v1  ;;  %2869 = vmatprep.mubr.msk.bf16.mxu1 (!%p223_p3), %vm3317_vm1, %v3316_v1  ;;  %v606_v31 = vsel (!%p223_p3), %vm478_vm0, %v321_v20, 0  ;;  %v2670_v12 = vld [vmem:[%s4299_s1 + $0x6] sm:$0x3] (!%p223_p3)  ;;  %vm1139_vm6 = vsmask.f32 (!%p223_p3), 6400  ;;  %vm2057_vm8 = vcmask (!%p223_p3), 1044480  }
   0xd   : > { %2923 = vmatprep.subr.bf16.mxu0 (!%p223_p3), %v3316_v1  ;;  %2885 = vmatprep.subr.bf16.mxu1 (!%p223_p3), %v3316_v1  ;;  %vm1808_vm7 = vsmask.f32 (!%p223_p3), 5376  ;;  %vm2463_vm9 = vcmask (!%p223_p3), 1040384  }
  0x10   : > { %s4315_s19 = smov (!%p271_p5, %s3302_s19), 1  ;;  %s4317_s18 = smov (!%p273_p6, %s3298_s18), 1 }
  0x11   : > { %s3192_s27 = smul.u32 50, %s4315_s19 }
  0x12   : > { %s3191_s28 = smul.u32 25, %s4317_s18 }
  0x13   : > { %s3193_s7 = smul.u32 144, %s4317_s18 }
  0x14   : > { %s277_s29 = sadd.s32 %s3192_s27, %s3191_s28  ;;  %s3195_s12 = smul.u32 36, %s4315_s19 }
  0x15   : > { %s2625_s30 = sshll.u32 %s277_s29, 2  ;;  %s3858_s11 = scalar_lea.vmem %s4301_s3, %s3193_s7 }
  0x16   : > { %s3404_s8 = scalar_lea.vmem %s4298_s0, %s2625_s30  ;;  %s2628_s27 = sshll.u32 %s4315_s19, 1 }
  0x17   : > { %v303_v3 = vld [vmem:[%s3404_s8] sm:$0xf]  ;;  %v3408_v4 = vld [vmem:[%s3404_s8 + $0x4] sm:$0xf]  ;;  %v3414_v6 = vld [vmem:[%s3404_s8 + $0x8] sm:$0xff]   ;;  %s299_s28 = sadd.s32 %s2628_s27, %s4317_s18 }
  0x18   : > { %v3411_v5 = vcombine.low %v303_v3, %v3408_v4  ;;  %v382_v9 = vshll.u32 %v3414_v6, 16  ;;  %v3420_v10 = vld [vmem:[%s3404_s8 + $0x28] sm:$0xff]   ;;  %v3423_v11 = vld [vmem:[%s3404_s8 + $0x30] sm:$0xff]   ;;  %v3432_v14 = vld [vmem:[%s3404_s8 + $0x38] sm:$0xff]   ;;  %v386_v21 = vshrl.u32 %v3414_v6, 16  ;;  %s2629_s29 = sshll.u32 %s299_s28, 1 }
  0x19   : > { %v3429_v13 = vld [vmem:[%s3404_s8 + $0x10] sm:$0xff]   ;;  %v414_v17 = vshll.u32 %v3420_v10, 16  ;;  %v418_v18 = vshrl.u32 %v3420_v10, 16  ;;  %v422_v19 = vshll.u32 %v3423_v11, 16  ;;  %v426_v29 = vshrl.u32 %v3423_v11, 16  ;;  %v3452_v32 = vld [vmem:[%s3404_s8 + $0x18] sm:$0xff]   ;;  %s301_s7 = scalar_lea.vmem %s4303_s5, %s2629_s29 }
  0x1a   : > { %v375_v7 = vshrl.u32 %v3411_v5, 16  ;;  %v377_v8 = vshll.u32 %v3411_v5, 16  ;;  %v384_v16 = vrot.slane %v382_v9, 1  ;;  %v390_v24 = vshll.u32 %v3429_v13, 16  ;;  %v3462_v38 = vld [vmem:[%s3404_s8 + $0x40] sm:$0xff]  }
  0x1b   : > { %v3441_v23 = vrot.slane %v414_v17, 1  ;;  %v424_v25 = vrot.slane %v422_v19, 1  ;;  %v430_v30 = vshll.u32 %v3432_v14, 16  ;;  %v398_v39 = vshll.u32 %v3452_v32, 16  ;;  %v3474_v47 = vld [vmem:[%s3404_s8 + $0x20] sm:$0xff]  }
  0x1c   : > { %v379_v15 = vrot.slane %v377_v8, 1  ;;  %v388_v34 = vor.u32 %v386_v21, %v384_v16  ;;  %v392_v35 = vrot.slane %v390_v24, 1  ;;  %v394_v41 = vshrl.u32 %v3429_v13, 16  ;;  %v3250_v42 = vld [vmem:[%s3404_s8 + $0x48] ss:$0 sps:$4 sm:$0x11]  }
  0x1d   : > { %v420_v28 = vor.u32 %v418_v18, %v3441_v23  ;;  %v428_v36 = vor.u32 %v426_v29, %v424_v25  ;;  %v432_v37 = vrot.slane %v430_v30, 1  ;;  %v434_v44 = vshrl.u32 %v3432_v14, 16  ;;  %v713_v8 = vld [vmem:[%s3404_s8] sm:$0xe]  ;;  %v893_v21 = vld [vmem:[%s3404_s8 + $0xc] sm:$0xf] }
  0x1e   : > { %v380_v22 = vor.u32 %v379_v15, %v375_v7  ;;  %v393_v40 = vsel %vm373_vm2, %v388_v34, %v392_v35  ;;  %v438_v45 = vshll.u32 %v3462_v38, 16  ;;  %v400_v46 = vrot.slane %v398_v39, 1  ;;  %v3542_v24 = vld [vmem:[%s3404_s8 + $0x10] sm:$0xff]  }
  0x1f   : > { %v425_v33 = vsel %vm373_vm2, %v420_v28, %v424_v25  ;;  %v433_v43 = vsel %vm373_vm2, %v428_v36, %v432_v37  ;;  %v396_v48 = vor.u32 %v394_v41, %v392_v35  ;;  %v735_v49 = vrot.slane %v3462_v38, 1  ;;  %v3550_v28 = vld [vmem:[%s3404_s8 + $0x18] sm:$0xff]   ;;  %v3569_v35 = vld [vmem:[%s3404_s8 + $0x20] sm:$0xff]  }
  0x20   : > { %v385_v27 = vsel %vm373_vm2, %v380_v22, %v384_v16  ;;  %2870 = vmatmul.mubr.msk.bf16.vlgmr.msra.gmra.mrb[0].mxu1 %vm450_vm3, %v425_v33  ;;  %v737_v50 = vrot.slane %v3250_v42, 1  ;;  %v436_v51 = vor.u32 %v434_v44, %v432_v37  ;;  %v440_v52 = vrot.slane %v438_v45, 1  ;;  %v1382_v22 = vld [vmem:[%s3404_s8 + $0x8] sm:$0xc]  ;;  %v3601_v44 = vld [vmem:[%s3404_s8 + $0x30] sm:$0xff]  }
  0x21   : > { %2850 = vmatmul.mubr.msk.bf16.vlgmr.msra.gmra.mrb[0].mxu0 %vm450_vm3, %v385_v27  ;;  %2886 = vmatpush3.bf16.msra.mxu1 %v606_v31  ;;  %v401_v54 = vsel %vm373_vm2, %v396_v48, %v400_v46  ;;  %v402_v55 = vshrl.u32 %v3452_v32, 16  ;;  %v406_v56 = vshll.u32 %v3474_v47, 16  ;;  %v442_v58 = vshrl.u32 %v3462_v38, 16 }
  0x22   : > { %2924 = vmatpush3.bf16.msra.mxu0 %v767_v26  ;;  %2853 = vmatprep.mubr.msk.bf16.mxu0 %vm3317_vm1, %v3316_v1  ;;  %v3485_v53 = vsel %vm719_vm4, %v735_v49, %v737_v50  ;;  %v441_v57 = vsel %vm373_vm2, %v436_v51, %v440_v52  ;;  %v446_v59 = vshll.u32 %v3250_v42, 16  ;;  %v410_v2 = vshrl.u32 %v3474_v47, 16  ;;  %v892_v50 = vld [vmem:[%s3404_s8 + $0x8] sm:$0xe] }
  0x23   : > { %2999 = vmatprep.subr.bf16.mxu0 %v3316_v1  ;;  %2873 = vmatprep.mubr.msk.bf16.mxu1 %vm3317_vm1, %v3316_v1  ;;  %v404_v60 = vor.u32 %v402_v55, %v400_v46  ;;  %v408_v61 = vrot.slane %v406_v56, 1  ;;  %v444_v62 = vor.u32 %v442_v58, %v440_v52  ;;  %v2660_v15 = vcombine.low %v713_v8, %v3408_v4  ;;  %v2690_v4 = vld [vmem:[%s4299_s1 + $0x8] sm:$0x3] }
  0x24   : > { %2961 = vmatprep.subr.bf16.mxu1 %v3316_v1  ;;  %v448_v63 = vrot.slane %v446_v59, 1  ;;  %v1008_v16 = vsel %vm478_vm0, %v2670_v12, 0  ;;  %v721_v18 = vrot.slane %v3414_v6, 1  ;;  %v1257_v20 = vsel %vm478_vm0, %v2690_v4, 0 }
  0x25   : > { %v409_v0 = vsel %vm373_vm2, %v404_v60, %v408_v61  ;;  %v412_v7 = vor.u32 %v410_v2, %v408_v61  ;;  %v720_v17 = vrot.slane %v2660_v15, 1  ;;  %v2702_v25 = vcombine.low %v1382_v22, %v893_v21 }
  0x26   : > { %v449_v3 = vsel %vm373_vm2, %v444_v62, %v448_v63  ;;  %v1390_v27 = vrot.slane %v3542_v24, 2  ;;  %v1392_v30 = vrot.slane %v3550_v28, 2  ;;  %v727_v34 = vrot.slane %v3474_v47, 1 }
  0x27   : > { %v417_v9 = vsel %vm373_vm2, %v412_v7, %v3441_v23  ;;  %v722_v19 = vsel %vm719_vm4, %v720_v17, %v721_v18  ;;  %v1389_v26 = vrot.slane %v2702_v25, 2  ;;  %v729_v39 = vrot.slane %v3420_v10, 1  ;;  %v2712_v7 = vld [vmem:[%s4299_s1 + $0xc] sm:$0x3] }
  0x28   : > { %2874 = vmatmul.mubr.msk.bf16.gmra.mrb[4].mxu1 %vm450_vm3, %v433_v43  ;;  %v3562_v33 = vsel %vm1388_vm5, %v1390_v27, %v1392_v30  ;;  %v731_v43 = vrot.slane %v3423_v11, 1  ;;  %v1398_v45 = vrot.slane %v3601_v44, 2  ;;  %v733_v48 = vrot.slane %v3432_v14, 1 }
  0x29   : > { %2854 = vmatmul.mubr.msk.bf16.gmra.mrb[4].mxu0 %vm450_vm3, %v393_v40  ;;  %2877 = vmatprep.mubr.msk.bf16.mxu1 %vm3317_vm1, %v3316_v1  ;;  %v3553_v29 = vsel %vm1388_vm5, %v1389_v26, %v1390_v27  ;;  %v3585_v40 = vld [vmem:[%s3404_s8 + $0x28] sm:$0xff]   ;;  %v730_v41 = vsel %vm719_vm4, %v727_v34, %v729_v39  ;;  %v2671_v51 = vcombine.low %v892_v50, %v893_v21  ;;  %v1149_v55 = vshrl.u32 %v3542_v24, 16 }
  0x2a   : > { %2857 = vmatprep.mubr.msk.bf16.mxu0 %vm3317_vm1, %v3316_v1  ;;  %v732_v46 = vsel %vm719_vm4, %v729_v39, %v731_v43  ;;  %v1158_v2 = vshrl.u32 %v3550_v28, 16  ;;  %v1677_v15 = vsel %vm478_vm0, %v2712_v7, 0  ;;  %v1170_v4 = vshll.u32 %v3569_v35, 16  ;;  %v3742_v7 = vld [vmem:[%s3404_s8 + $0x50] ss:$0 sps:$4 sm:$0x33]  }
  0x2b   : > { %v1141_v52 = vshrl.u32 %v2671_v51, 16  ;;  %v961_v56 = vrot.slane %v2671_v51, 1  ;;  %v1151_v60 = vrot.slane %v1149_v55, 1  ;;  %v1179_v25 = vshll.u32 %v3585_v40, 16 }
  0x2c   : > { %v1172_v21 = vrot.slane %v1170_v4, 2  ;;  %v968_v26 = vrot.slane %v3585_v40, 1 }
  0x2d   : > { %v1143_v58 = vrot.slane %v1141_v52, 1 }
  0x30   : > { %2878 = vmatmul.mubr.msk.bf16.gmra.mrb[8].mxu1 %vm450_vm3, %v441_v57  ;;  %v2701_v57 = vld [vmem:[%s4299_s1 + $0xa] sm:$0x3] }
  0x31   : > { %2858 = vmatmul.mubr.msk.bf16.gmra.mrb[8].mxu0 %vm450_vm3, %v401_v54  ;;  %2881 = vmatprep.mubr.msk.bf16.mxu1 %vm3317_vm1, %v3316_v1  ;;  %v1144_v54 = vshll.u32 %v2671_v51, 16 }
  0x32   : > { %2861 = vmatprep.mubr.msk.bf16.mxu0 %vm3317_vm1, %v3316_v1 }
  0x33   : > { %v1146_v59 = vrot.slane %v1144_v54, 2  ;;  %v3715_v54 = vld [vmem:[%s3404_s8 + $0x40] sm:$0xff]  }
  0x35   : > { %v1147_v63 = vor.u32 %v1146_v59, %v1143_v58 }
  0x38   : > { %2882 = vmatmul.mubr.msk.bf16.gmra.mrb[12].mxu1 %vm450_vm3, %v449_v3  ;;  %v1161_v3 = vshll.u32 %v3550_v28, 16 }
  0x39   : > { %2862 = vmatmul.mubr.msk.bf16.gmra.mrb[12].mxu0 %vm450_vm3, %v409_v0  ;;  %2887 = vmatprep.mubr.msk.bf16.mxu1 %vm3317_vm1, %v3316_v1 }
  0x3a   : > { %2865 = vmatprep.mubr.msk.bf16.mxu0 %vm3317_vm1, %v3316_v1  ;;  %v1163_v12 = vrot.slane %v1161_v3, 2 }
  0x40   : > { %2888 = vmatmul.mubr.msk.bf16.vlgmr.msra.gmra.mrb[16].mxu1 %vm450_vm3, %v3411_v5  ;;  %v723_v5 = vrot.slane %v3429_v13, 1 }
  0x41   : > { %2866 = vmatmul.mubr.msk.bf16.gmra.mrb[16].mxu0 %vm450_vm3, %v417_v9  ;;  %2962 = vmatpush3.bf16.msra.mxu1 %v1008_v16  ;;  %v1160_v9 = vrot.slane %v1158_v2, 1 }
  0x42   : > { %2925 = vmatprep.mubr.msk.bf16.mxu0 %vm3317_vm1, %v3316_v1  ;;  %2891 = vmatprep.mubr.msk.bf16.mxu1 %vm3317_vm1, %v3316_v1  ;;  %v724_v23 = vsel %vm719_vm4, %v721_v18, %v723_v5  ;;  %v1167_v18 = vshrl.u32 %v3569_v35, 16 }
  0x43   : > { %3037 = vmatprep.subr.bf16.mxu1 %v3316_v1  ;;  %v1164_v17 = vor.u32 %v1163_v12, %v1160_v9  ;;  %v3261_v9 = vld [vmem:[%s3404_s8 + $0x50] ss:$0 sps:$4 sm:$0x11]  }
  0x48   : > { %2892 = vmatmul.mubr.msk.bf16.gmra.mrb[20].mxu1 %vm450_vm3, %v3414_v6  ;;  %v725_v6 = vrot.slane %v3452_v32, 1 }
  0x49   : > { %2926 = vmatmul.mubr.msk.bf16.vlgmr.msra.gmra.mrb[20].mxu0 %vm450_vm3, %v722_v19  ;;  %2895 = vmatprep.mubr.msk.bf16.mxu1 %vm3317_vm1, %v3316_v1  ;;  %v966_v19 = vrot.slane %v3569_v35, 1 }
  0x4a   : > { %3000 = vmatpush3.bf16.msra.mxu0 %v1257_v20  ;;  %2929 = vmatprep.mubr.msk.bf16.mxu0 %vm3317_vm1, %v3316_v1  ;;  %v726_v31 = vsel %vm719_vm4, %v723_v5, %v725_v6  ;;  %v728_v36 = vsel %vm719_vm4, %v725_v6, %v727_v34  ;;  %v1169_v5 = vrot.slane %v1167_v18, 1  ;;  %v1185_v34 = vshrl.u32 %v3601_v44, 16 }
  0x4b   : > { %3075 = vmatprep.subr.bf16.mxu0 %v3316_v1 }
  0x4c   : > { %v1187_v39 = vrot.slane %v1185_v34, 1  ;;  %v3791_v34 = vld [vmem:[%s3404_s8 + $0x20] sm:$0xff]  }
  0x50   : > { %2896 = vmatmul.mubr.msk.bf16.gmra.mrb[24].mxu1 %vm450_vm3, %v3429_v13  ;;  %v1394_v13 = vrot.slane %v3569_v35, 2  ;;  %v1188_v35 = vshll.u32 %v3601_v44, 16 }
  0x51   : > { %2930 = vmatmul.mubr.msk.bf16.gmra.mrb[24].mxu0 %vm450_vm3, %v724_v23  ;;  %2899 = vmatprep.mubr.msk.bf16.mxu1 %vm3317_vm1, %v3316_v1  ;;  %v1173_v23 = vor.u32 %v1172_v21, %v1169_v5  ;;  %v1561_v21 = vld [vmem:[%s3404_s8 + $0x10] sm:$0xc] }
  0x52   : > { %2933 = vmatprep.mubr.msk.bf16.mxu0 %vm3317_vm1, %v3316_v1  ;;  %v3578_v37 = vsel %vm1388_vm5, %v1392_v30, %v1394_v13  ;;  %v969_v30 = vsel %vm719_vm4, %v966_v19, %v968_v26 }
  0x53   : > { %v1174_v27 = vsel %vm1139_vm6, %v1164_v17, %v1173_v23 }
  0x58   : > { %2900 = vmatmul.mubr.msk.bf16.gmra.mrb[28].mxu1 %vm450_vm3, %v3452_v32  ;;  %v1396_v32 = vrot.slane %v3585_v40, 2 }
  0x59   : > { %2934 = vmatmul.mubr.msk.bf16.gmra.mrb[28].mxu0 %vm450_vm3, %v726_v31  ;;  %2903 = vmatprep.mubr.msk.bf16.mxu1 %vm3317_vm1, %v3316_v1 }
  0x5a   : > { %2937 = vmatprep.mubr.msk.bf16.mxu0 %vm3317_vm1, %v3316_v1  ;;  %v3594_v42 = vsel %vm1388_vm5, %v1394_v13, %v1396_v32  ;;  %v970_v13 = vrot.slane %v3601_v44, 1 }
  0x60   : > { %2904 = vmatmul.mubr.msk.bf16.gmra.mrb[32].mxu1 %vm450_vm3, %v3474_v47  ;;  %v3612_v47 = vsel %vm1388_vm5, %v1396_v32, %v1398_v45  ;;  %v971_v32 = vsel %vm719_vm4, %v968_v26, %v970_v13  ;;  %v3774_v26 = vld [vmem:[%s3404_s8 + $0x18] sm:$0xff]  }
  0x61   : > { %2938 = vmatmul.mubr.msk.bf16.gmra.mrb[32].mxu0 %vm450_vm3, %v728_v36  ;;  %2907 = vmatprep.mubr.msk.bf16.mxu1 %vm3317_vm1, %v3316_v1 }
  0x62   : > { %2941 = vmatprep.mubr.msk.bf16.mxu0 %vm3317_vm1, %v3316_v1 }
  0x68   : > { %2908 = vmatmul.mubr.msk.bf16.gmra.mrb[36].mxu1 %vm450_vm3, %v3420_v10  ;;  %v734_v10 = vsel %vm719_vm4, %v731_v43, %v733_v48 }
  0x69   : > { %2942 = vmatmul.mubr.msk.bf16.gmra.mrb[36].mxu0 %vm450_vm3, %v730_v41  ;;  %2911 = vmatprep.mubr.msk.bf16.mxu1 %vm3317_vm1, %v3316_v1  ;;  %v3701_v41 = vld [vmem:[%s3404_s8 + $0x38] sm:$0xff]  }
  0x6a   : > { %2945 = vmatprep.mubr.msk.bf16.mxu0 %vm3317_vm1, %v3316_v1 }
  0x70   : > { %2912 = vmatmul.mubr.msk.bf16.gmra.mrb[40].mxu1 %vm450_vm3, %v3423_v11  ;;  %v736_v11 = vsel %vm719_vm4, %v733_v48, %v735_v49  ;;  %v962_v49 = vrot.slane %v3542_v24, 1  ;;  %v1197_v48 = vshll.u32 %v3701_v41, 16 }
  0x71   : > { %2946 = vmatmul.mubr.msk.bf16.gmra.mrb[40].mxu0 %vm450_vm3, %v732_v46  ;;  %2915 = vmatprep.mubr.msk.bf16.mxu1 %vm3317_vm1, %v3316_v1  ;;  %v1194_v46 = vshrl.u32 %v3701_v41, 16 }
  0x72   : > { %2949 = vmatprep.mubr.msk.bf16.mxu0 %vm3317_vm1, %v3316_v1  ;;  %v963_v62 = vsel %vm719_vm4, %v961_v56, %v962_v49  ;;  %v1199_v51 = vrot.slane %v1197_v48, 2  ;;  %v1206_v56 = vshll.u32 %v3715_v54, 16 }
  0x74   : > { %v1208_v59 = vrot.slane %v1206_v56, 2 }
  0x78   : > { %2916 = vmatmul.mubr.msk.bf16.gmra.mrb[44].mxu1 %vm450_vm3, %v3432_v14  ;;  %v1152_v14 = vshll.u32 %v3542_v24, 16  ;;  %v1176_v24 = vshrl.u32 %v3585_v40, 16  ;;  %v1190_v40 = vrot.slane %v1188_v35, 2 }
  0x79   : > { %2950 = vmatmul.mubr.msk.bf16.gmra.mrb[44].mxu0 %vm450_vm3, %v734_v10  ;;  %2919 = vmatprep.mubr.msk.bf16.mxu1 %vm3317_vm1, %v3316_v1  ;;  %v972_v10 = vrot.slane %v3701_v41, 1 }
  0x7a   : > { %2953 = vmatprep.mubr.msk.bf16.mxu0 %vm3317_vm1, %v3316_v1  ;;  %v1154_v61 = vrot.slane %v1152_v14, 2  ;;  %v1178_v6 = vrot.slane %v1176_v24, 1  ;;  %v1191_v43 = vor.u32 %v1190_v40, %v1187_v39  ;;  %v1203_v14 = vshrl.u32 %v3715_v54, 16  ;;  %v2732_v24 = vld [vmem:[%s4299_s1 + $0xe] sm:$0x3]  ;;  %v3816_v40 = vld [vmem:[%s3404_s8 + $0x30] sm:$0xff]  }
  0x7b   : > { %v973_v52 = vsel %vm719_vm4, %v970_v13, %v972_v10 }
  0x7c   : > { %v1155_v0 = vor.u32 %v1154_v61, %v1151_v60  ;;  %v1205_v58 = vrot.slane %v1203_v14, 1  ;;  %v3729_v61 = vld [vmem:[%s3404_s8 + $0x48] sm:$0xff]  }
  0x7e   : > { %v1156_v8 = vsel %vm1139_vm6, %v1147_v63, %v1155_v0  ;;  %v1165_v20 = vsel %vm1139_vm6, %v1155_v0, %v1164_v17  ;;  %v1215_v63 = vshll.u32 %v3729_v61, 16  ;;  %v976_v0 = vrot.slane %v3729_v61, 1 }
  0x7f   : > { %v978_v17 = vrot.slane %v3261_v9, 1 }
  0x80   : > { %2920 = vmatmul.mubr.msk.bf16.gmra.mrb[48].mxu1 %vm450_vm3, %v3462_v38  ;;  %v1436_v38 = vsel %vm478_vm0, %v2701_v57, 0 }
  0x81   : > { %2954 = vmatmul.mubr.msk.bf16.gmra.mrb[48].mxu0 %vm450_vm3, %v736_v11  ;;  %2963 = vmatprep.mubr.msk.bf16.mxu1 %vm3317_vm1, %v3316_v1  ;;  %v1196_v11 = vrot.slane %v1194_v46, 1 }
  0x82   : > { %2957 = vmatprep.mubr.msk.bf16.mxu0 %vm3317_vm1, %v3316_v1 }
  0x83   : > { %v1200_v55 = vor.u32 %v1199_v51, %v1196_v11 }
  0x85   : > { %v1201_v57 = vsel %vm1139_vm6, %v1191_v43, %v1200_v55 }
  0x88   : > { %2964 = vmatmul.mubr.msk.bf16.vlgmr.msra.gmra.mrb[52].mxu1 %vm450_vm3, %v963_v62  ;;  %v1209_v62 = vor.u32 %v1208_v59, %v1205_v58  ;;  %v2275_v58 = vld [vmem:[%s3858_s11 + $0x10] sm:$0xff] }
  0x89   : > { %2958 = vmatmul.mubr.msk.bf16.gmra.mrb[52].mxu0 %vm450_vm3, %v3485_v53  ;;  %3038 = vmatpush3.bf16.msra.mxu1 %v1436_v38  ;;  %v964_v53 = vrot.slane %v3550_v28, 1  ;;  %v1181_v28 = vrot.slane %v1179_v25, 2  ;;  %v1212_v38 = vshrl.u32 %v3729_v61, 16 }
  0x8a   : > { %3001 = vmatprep.mubr.msk.bf16.mxu0 %vm3317_vm1, %v3316_v1  ;;  %2967 = vmatprep.mubr.msk.bf16.mxu1 %vm3317_vm1, %v3316_v1  ;;  %v1210_v2 = vsel %vm1139_vm6, %v1200_v55, %v1209_v62 }
  0x8b   : > { %3113 = vmatprep.subr.bf16.mxu1 %v3316_v1  ;;  %v965_v16 = vsel %vm719_vm4, %v962_v49, %v964_v53  ;;  %v967_v22 = vsel %vm719_vm4, %v964_v53, %v966_v19  ;;  %v1182_v31 = vor.u32 %v1181_v28, %v1178_v6  ;;  %v974_v49 = vrot.slane %v3715_v54, 1 }
  0x8c   : > { %v1214_v3 = vrot.slane %v1212_v38, 1  ;;  %v1217_v53 = vrot.slane %v1215_v63, 2  ;;  %v1631_v28 = vrot.slane %v3774_v26, 2 }
  0x8d   : > { %v1183_v36 = vsel %vm1139_vm6, %v1173_v23, %v1182_v31  ;;  %v1192_v50 = vsel %vm1139_vm6, %v1182_v31, %v1191_v43  ;;  %v975_v60 = vsel %vm719_vm4, %v972_v10, %v974_v49  ;;  %v3828_v43 = vld [vmem:[%s3404_s8 + $0x38] sm:$0xff]  }
  0x8e   : > { %v1218_v12 = vor.u32 %v1217_v53, %v1214_v3  ;;  %v1639_v46 = vrot.slane %v3828_v43, 2 }
  0x90   : > { %2968 = vmatmul.mubr.msk.bf16.gmra.mrb[56].mxu1 %vm450_vm3, %v965_v16  ;;  %v1224_v16 = vshll.u32 %v3742_v7, 16  ;;  %v1219_v18 = vsel %vm1139_vm6, %v1209_v62, %v1218_v12 }
  0x91   : > { %3002 = vmatmul.mubr.msk.bf16.vlgmr.msra.gmra.mrb[56].mxu0 %vm450_vm3, %v1156_v8  ;;  %2971 = vmatprep.mubr.msk.bf16.mxu1 %vm3317_vm1, %v3316_v1  ;;  %v977_v8 = vsel %vm719_vm4, %v974_v49, %v976_v0  ;;  %v3318_v49 = vmov 0  }
  0x92   : > { %3076 = vmatpush3.bf16.msra.mxu0 %v1677_v15  ;;  %3005 = vmatprep.mubr.msk.bf16.mxu0 %vm3317_vm1, %v3316_v1  ;;  %v1221_v15 = vshrl.u32 %v3742_v7, 16  ;;  %v1226_v19 = vrot.slane %v1224_v16, 2 }
  0x93   : > { %3151 = vmatprep.subr.bf16.mxu0 %v3316_v1  ;;  %3239 = vset.pattern.permute.xlu0 %v3318_v49 }
  0x94   : > { %v1223_v4 = vrot.slane %v1221_v15, 1  ;;  %3240 = vset.pattern.permute.xlu1 %v3318_v49  ;;  %v2277_v15 = vld [vmem:[%s3858_s11 + $0x20] sm:$0xff] }
  0x95   : > { %2303 = vperm.xlu1 %3240, %v2275_v58  }
  0x96   : > { %v1227_v5 = vor.u32 %v1226_v19, %v1223_v4  ;;  %v1404_v4 = vrot.slane %v3729_v61, 2  ;;  %v2279_v19 = vld [vmem:[%s3858_s11 + $0x30] sm:$0xff] }
  0x98   : > { %2972 = vmatmul.mubr.msk.bf16.gmra.mrb[60].mxu1 %vm450_vm3, %v967_v22  ;;  %v3762_v22 = vld [vmem:[%s3404_s8 + $0x14] sm:$0xf]  ;;  %v1228_v23 = vsel %vm1139_vm6, %v1218_v12, %v1227_v5  ;;  %v2276_v12 = vld [vmem:[%s3858_s11 + $0x18] sm:$0xff] }
  0x99   : > { %3006 = vmatmul.mubr.msk.bf16.gmra.mrb[60].mxu0 %vm450_vm3, %v1165_v20  ;;  %2975 = vmatprep.mubr.msk.bf16.mxu1 %vm3317_vm1, %v3316_v1  ;;  %v979_v20 = vsel %vm719_vm4, %v976_v0, %v978_v17  ;;  %v3771_v25 = vcombine.low %v1561_v21, %v3762_v22  ;;  %v2278_v17 = vld [vmem:[%s3858_s11 + $0x28] sm:$0xff] }
  0x9a   : > { %3009 = vmatprep.mubr.msk.bf16.mxu0 %vm3317_vm1, %v3316_v1  ;;  %2308 = vperm.xlu1 %3240, %v2276_v12  }
  0x9b   : > { %v1630_v6 = vrot.slane %v3771_v25, 2 }
  0x9d   : > { %v1632_v31 = vsel %vm1388_vm5, %v1630_v6, %v1631_v28 }
  0x9e   : > { %2318 = vperm.xlu1 %3240, %v2278_v17   ;;  %v1827_v17 = vshrl.u32 %v3791_v34, 16 }
  0xa0   : > { %2976 = vmatmul.mubr.msk.bf16.gmra.mrb[64].mxu1 %vm450_vm3, %v969_v30  ;;  %v2743_v30 = vld [vmem:[%s4299_s1 + $0x10] sm:$0x3] }
  0xa1   : > { %3010 = vmatmul.mubr.msk.bf16.gmra.mrb[64].mxu0 %vm450_vm3, %v1174_v27  ;;  %2979 = vmatprep.mubr.msk.bf16.mxu1 %vm3317_vm1, %v3316_v1  ;;  %v1926_v27 = vsel %vm478_vm0, %v2732_v24, 0  ;;  %v2105_v35 = vsel %vm478_vm0, %v2743_v30, 0  ;;  %v3904_v24 = vld [vmem:[%s3404_s8 + $0x50] sm:$0xff]  }
  0xa2   : > { %3013 = vmatprep.mubr.msk.bf16.mxu0 %vm3317_vm1, %v3316_v1 }
  0xa8   : > { %2980 = vmatmul.mubr.msk.bf16.gmra.mrb[68].mxu1 %vm450_vm3, %v971_v32  ;;  %v1637_v32 = vrot.slane %v3816_v40, 2 }
  0xa9   : > { %3014 = vmatmul.mubr.msk.bf16.gmra.mrb[68].mxu0 %vm450_vm3, %v1183_v36  ;;  %2983 = vmatprep.mubr.msk.bf16.mxu1 %vm3317_vm1, %v3316_v1  ;;  %v3804_v36 = vld [vmem:[%s3404_s8 + $0x28] sm:$0xff]  }
  0xaa   : > { %3017 = vmatprep.mubr.msk.bf16.mxu0 %vm3317_vm1, %v3316_v1  ;;  %v1635_v39 = vrot.slane %v3804_v36, 2  ;;  %v1640_v51 = vsel %vm1388_vm5, %v1637_v32, %v1639_v46 }
  0xb0   : > { %2984 = vmatmul.mubr.msk.bf16.gmra.mrb[72].mxu1 %vm450_vm3, %v973_v52  ;;  %v3847_v52 = vld [vmem:[%s3404_s8 + $0x40] sm:$0xff]  }
  0xb1   : > { %3018 = vmatmul.mubr.msk.bf16.gmra.mrb[72].mxu0 %vm450_vm3, %v1192_v50  ;;  %2987 = vmatprep.mubr.msk.bf16.mxu1 %vm3317_vm1, %v3316_v1  ;;  %v1641_v44 = vrot.slane %v3847_v52, 2 }
  0xb2   : > { %3021 = vmatprep.mubr.msk.bf16.mxu0 %vm3317_vm1, %v3316_v1 }
  0xb3   : > { %v1642_v0 = vsel %vm1388_vm5, %v1639_v46, %v1641_v44  ;;  %v1818_v46 = vshrl.u32 %v3774_v26, 16 }
  0xb8   : > { %2988 = vmatmul.mubr.msk.bf16.gmra.mrb[76].mxu1 %vm450_vm3, %v975_v60  ;;  %v1402_v60 = vrot.slane %v3715_v54, 2 }
  0xb9   : > { %3022 = vmatmul.mubr.msk.bf16.gmra.mrb[76].mxu0 %vm450_vm3, %v1201_v57  ;;  %2991 = vmatprep.mubr.msk.bf16.mxu1 %vm3317_vm1, %v3316_v1  ;;  %v2273_v57 = vld [vmem:[%s3858_s11] sm:$0xff] }
  0xba   : > { %3025 = vmatprep.mubr.msk.bf16.mxu0 %vm3317_vm1, %v3316_v1  ;;  %2293 = vperm.xlu0 %3239, %v2273_v57   ;;  %v1405_v61 = vsel %vm1388_vm5, %v1402_v60, %v1404_v4 }
  0xc0   : > { %2992 = vmatmul.mubr.msk.bf16.gmra.mrb[80].mxu1 %vm450_vm3, %v977_v8 }
  0xc1   : > { %3026 = vmatmul.mubr.msk.bf16.gmra.mrb[80].mxu0 %vm450_vm3, %v1210_v2  ;;  %2995 = vmatprep.mubr.msk.bf16.mxu1 %vm3317_vm1, %v3316_v1  ;;  %v3879_v2 = vld [vmem:[%s3404_s8 + $0x48] sm:$0xff]  }
  0xc2   : > { %3029 = vmatprep.mubr.msk.bf16.mxu0 %vm3317_vm1, %v3316_v1  ;;  %v1643_v16 = vrot.slane %v3879_v2, 2 }
  0xc8   : > { %2996 = vmatmul.mubr.msk.bf16.gmra.mrb[84].mxu1 %vm450_vm3, %v979_v20 }
  0xc9   : > { %3030 = vmatmul.mubr.msk.bf16.gmra.mrb[84].mxu0 %vm450_vm3, %v1219_v18  ;;  %3039 = vmatprep.mubr.msk.bf16.mxu1 %vm3317_vm1, %v3316_v1 }
  0xca   : > { %3033 = vmatprep.mubr.msk.bf16.mxu0 %vm3317_vm1, %v3316_v1 }
  0xd0   : > { %3040 = vmatmul.mubr.msk.bf16.vlgmr.msra.gmra.mrb[88].mxu1 %vm450_vm3, %v3553_v29  ;;  %v1633_v29 = vrot.slane %v3791_v34, 2 }
  0xd1   : > { %3034 = vmatmul.mubr.msk.bf16.gmra.mrb[88].mxu0 %vm450_vm3, %v1228_v23  ;;  %3114 = vmatpush3.bf16.msra.mxu1 %v1926_v27  ;;  %v1644_v23 = vsel %vm1388_vm5, %v1641_v44, %v1643_v16 }
  0xd2   : > { %3077 = vmatprep.mubr.msk.bf16.mxu0 %vm3317_vm1, %v3316_v1  ;;  %3043 = vmatprep.mubr.msk.bf16.mxu1 %vm3317_vm1, %v3316_v1  ;;  %v1634_v13 = vsel %vm1388_vm5, %v1631_v28, %v1633_v29 }
  0xd8   : > { %3044 = vmatmul.mubr.msk.bf16.gmra.mrb[92].mxu1 %vm450_vm3, %v3562_v33  ;;  %v1636_v33 = vsel %vm1388_vm5, %v1633_v29, %v1635_v39  ;;  %v1645_v29 = vrot.slane %v3904_v24, 2 }
  0xd9   : > { %3078 = vmatmul.mubr.msk.bf16.vlgmr.msra.gmra.mrb[92].mxu0 %vm450_vm3, %v1632_v31  ;;  %3047 = vmatprep.mubr.msk.bf16.mxu1 %vm3317_vm1, %v3316_v1  ;;  %v2280_v31 = vld [vmem:[%s3858_s11 + $0x38] sm:$0xff] }
  0xda   : > { %3152 = vmatpush3.bf16.msra.mxu0 %v2105_v35  ;;  %3081 = vmatprep.mubr.msk.bf16.mxu0 %vm3317_vm1, %v3316_v1  ;;  %v2281_v35 = vld [vmem:[%s3858_s11 + $0x40] sm:$0xff] }
  0xdb   : > { %2328 = vperm.xlu1 %3240, %v2280_v31  }
  0xe0   : > { %3048 = vmatmul.mubr.msk.bf16.gmra.mrb[96].mxu1 %vm450_vm3, %v3578_v37  ;;  %v1638_v37 = vsel %vm1388_vm5, %v1635_v39, %v1637_v32  ;;  %v2282_v39 = vld [vmem:[%s3858_s11 + $0x48] sm:$0xff]  ;;  %v1810_v32 = vshrl.u32 %v3771_v25, 16 }
  0xe1   : > { %3082 = vmatmul.mubr.msk.bf16.gmra.mrb[96].mxu0 %vm450_vm3, %v1634_v13  ;;  %3051 = vmatprep.mubr.msk.bf16.mxu1 %vm3317_vm1, %v3316_v1  ;;  %v1406_v13 = vrot.slane %v3742_v7, 2 }
  0xe2   : > { %3085 = vmatprep.mubr.msk.bf16.mxu0 %vm3317_vm1, %v3316_v1  ;;  %2338 = vperm.xlu1 %3240, %v2282_v39   ;;  %v1812_v58 = vrot.slane %v1810_v32, 2  ;;  %v1829_v32 = vrot.slane %v1827_v17, 2 }
  0xe8   : > { %3052 = vmatmul.mubr.msk.bf16.gmra.mrb[100].mxu1 %vm450_vm3, %v3594_v42  ;;  %v1400_v42 = vrot.slane %v3701_v41, 2 }
  0xe9   : > { %3086 = vmatmul.mubr.msk.bf16.gmra.mrb[100].mxu0 %vm450_vm3, %v1636_v33  ;;  %3055 = vmatprep.mubr.msk.bf16.mxu1 %vm3317_vm1, %v3316_v1 }
  0xea   : > { %3089 = vmatprep.mubr.msk.bf16.mxu0 %vm3317_vm1, %v3316_v1  ;;  %v1401_v56 = vsel %vm1388_vm5, %v1398_v45, %v1400_v42  ;;  %v2274_v45 = vld [vmem:[%s3858_s11 + $0x8] sm:$0xff]  ;;  %v1403_v9 = vsel %vm1388_vm5, %v1400_v42, %v1402_v60  ;;  %v1821_v42 = vshll.u32 %v3774_v26, 16 }
  0xeb   : > { %2298 = vperm.xlu0 %3239, %v2274_v45   ;;  %v1820_v45 = vrot.slane %v1818_v46, 2 }
  0xec   : > { %v1823_v60 = vrot.slane %v1821_v42, 3 }
  0xef   : > { %2313 = vperm.xlu0 %3239, %v2277_v15  }
  0xf0   : > { %3056 = vmatmul.mubr.msk.bf16.gmra.mrb[104].mxu1 %vm450_vm3, %v3612_v47 }
  0xf1   : > { %3090 = vmatmul.mubr.msk.bf16.gmra.mrb[104].mxu0 %vm450_vm3, %v1638_v37  ;;  %3059 = vmatprep.mubr.msk.bf16.mxu1 %vm3317_vm1, %v3316_v1  ;;  %v1813_v37 = vshll.u32 %v3771_v25, 16  ;;  %v1407_v25 = vsel %vm1388_vm5, %v1404_v4, %v1406_v13  ;;  %v1830_v4 = vshll.u32 %v3791_v34, 16 }
  0xf2   : > { %3093 = vmatprep.mubr.msk.bf16.mxu0 %vm3317_vm1, %v3316_v1 }
  0xf3   : > { %v3843_v11 = vpop.f32.mrb[0].mxu1  ;;  %2323 = vperm.xlu0 %3239, %v2279_v19   ;;  %v1815_v44 = vrot.slane %v1813_v37, 3  ;;  %v2287_v19 = vld [vmem:[%s3858_s11 + $0x70] sm:$0xff]  ;;  %v1832_v37 = vrot.slane %v1830_v4, 3  ;;  %v2061_v4 = vrot.slane %v3791_v34, 3 }
  0xf4   : > { %v3836_v48 = vpop.f32.mrb[0].mxu0  ;;  %v2871_v14 = vpop.f32.mrb[1].mxu1 }
  0xf5   : > { %v2851_v10 = vpop.f32.mrb[1].mxu0  ;;  %v3850_v47 = vpop.f32.mrb[2].mxu1  ;;  %v1646_v14 = vsel %vm1388_vm5, %v1643_v16, %v1645_v29  ;;  %v1816_v15 = vor.u32 %v1815_v44, %v1812_v58  ;;  %v1824_v16 = vor.u32 %v1823_v60, %v1820_v45 }
  0xf6   : > { %v3841_v50 = vpop.f32.mrb[2].mxu0  ;;  %v2872_v41 = vpop.f32.mrb[3].mxu1  ;;  %v2283_v10 = vld [vmem:[%s3858_s11 + $0x50] sm:$0xff] }
  0xf7   : > { %v2852_v55 = vpop.f32.mrb[3].mxu0  ;;  %2333 = vperm.xlu0 %3239, %v2281_v35   ;;  %v1825_v39 = vsel %vm1808_vm7, %v1816_v15, %v1824_v16 }
  0xf8   : > { %3060 = vmatmul.mubr.msk.bf16.gmra.mrb[108].mxu1 %vm450_vm3, %v1401_v56  ;;  %v3273_v56 = vld [vmem:[%s3404_s8 + $0x58] ss:$0 sps:$4 sm:$0x33]  }
  0xf9   : > { %3094 = vmatmul.mubr.msk.bf16.gmra.mrb[108].mxu0 %vm450_vm3, %v1640_v51  ;;  %3063 = vmatprep.mubr.msk.bf16.mxu1 %vm3317_vm1, %v3316_v1 }
  0xfa   : > { %3097 = vmatprep.mubr.msk.bf16.mxu0 %vm3317_vm1, %v3316_v1 }
  0xfb   : > { %v3875_v63 = vpop.f32.mrb[4].mxu1  ;;  %2343 = vperm.xlu0 %3239, %v2283_v10   ;;  %v2289_v10 = vld [vmem:[%s3858_s11 + $0x80] sm:$0xff] }
  0xfc   : > { %v3868_v59 = vpop.f32.mrb[4].mxu0  ;;  %v2875_v53 = vpop.f32.mrb[5].mxu1 }
  0xfd   : > { %v2855_v62 = vpop.f32.mrb[5].mxu0  ;;  %v3881_v8 = vpop.f32.mrb[6].mxu1  ;;  %v1647_v53 = vrot.slane %v3273_v56, 2  ;;  %v1836_v56 = vshrl.u32 %v3804_v36, 16 }
  0xfe   : > { %v3873_v38 = vpop.f32.mrb[6].mxu0  ;;  %v2876_v54 = vpop.f32.mrb[7].mxu1 }
  0xff   : > { %v2856_v3 = vpop.f32.mrb[7].mxu0  ;;  %v2286_v54 = vld [vmem:[%s3858_s11 + $0x68] sm:$0xff] }
 0x100   : > { %3064 = vmatmul.mubr.msk.bf16.gmra.mrb[112].mxu1 %vm450_vm3, %v1403_v9  ;;  %v2285_v3 = vld [vmem:[%s3858_s11 + $0x60] sm:$0xff]  ;;  %v2051_v9 = vld [vmem:[%s3404_s8 + $0x10] sm:$0x8] }
 0x101   : > { %3098 = vmatmul.mubr.msk.bf16.gmra.mrb[112].mxu0 %vm450_vm3, %v1642_v0  ;;  %3067 = vmatprep.mubr.msk.bf16.mxu1 %vm3317_vm1, %v3316_v1  ;;  %v2284_v0 = vld [vmem:[%s3858_s11 + $0x58] sm:$0xff] }
 0x102   : > { %3101 = vmatprep.mubr.msk.bf16.mxu0 %vm3317_vm1, %v3316_v1  ;;  %2348 = vperm.xlu1 %3240, %v2284_v0  }
 0x103   : > { %v3900_v21 = vpop.f32.mrb[8].mxu1  ;;  %2353 = vperm.xlu0 %3239, %v2285_v3  }
 0x104   : > { %v3892_v18 = vpop.f32.mrb[8].mxu0  ;;  %v2879_v6 = vpop.f32.mrb[9].mxu1 }
 0x105   : > { %v2859_v20 = vpop.f32.mrb[9].mxu0  ;;  %v3906_v28 = vpop.f32.mrb[10].mxu1  ;;  %v1648_v6 = vsel %vm1388_vm5, %v1645_v29, %v1647_v53  ;;  %v2288_v29 = vld [vmem:[%s3858_s11 + $0x78] sm:$0xff] }
 0x106   : > { %v3898_v5 = vpop.f32.mrb[10].mxu0  ;;  %v2880_v30 = vpop.f32.mrb[11].mxu1  ;;  %2358 = vperm.xlu1 %3240, %v2286_v54  }
 0x107   : > { %v2860_v27 = vpop.f32.mrb[11].mxu0  ;;  %2363 = vperm.xlu0 %3239, %v2287_v19  }
 0x108   : > { %3068 = vmatmul.mubr.msk.bf16.gmra.mrb[116].mxu1 %vm450_vm3, %v1405_v61  ;;  %v2744_v61 = vcombine.low %v2051_v9, %v3762_v22  ;;  %v1838_v9 = vrot.slane %v1836_v56, 2 }
 0x109   : > { %3102 = vmatmul.mubr.msk.bf16.gmra.mrb[116].mxu0 %vm450_vm3, %v1644_v23  ;;  %3071 = vmatprep.mubr.msk.bf16.mxu1 %vm3317_vm1, %v3316_v1 }
 0x10a   : > { %3105 = vmatprep.mubr.msk.bf16.mxu0 %vm3317_vm1, %v3316_v1  ;;  %v2058_v22 = vrot.slane %v2744_v61, 3  ;;  %2368 = vperm.xlu1 %3240, %v2288_v29  }
 0x10b   : > { %v3929_v7 = vpop.f32.mrb[12].mxu1  ;;  %2373 = vperm.xlu0 %3239, %v2289_v10   ;;  %v2063_v10 = vrot.slane %v3804_v36, 3 }
 0x10c   : > { %v3918_v33 = vpop.f32.mrb[12].mxu0  ;;  %v2883_v41 = vpop.f32.mrb[13].mxu1 }
 0x10d   : > { %v2863_v51 = vpop.f32.mrb[13].mxu0  ;;  %v3934_v57 = vpop.f32.mrb[14].mxu1 }
 0x10e   : > { %v3927_v55 = vpop.f32.mrb[14].mxu0  ;;  %v2884_v62 = vpop.f32.mrb[15].mxu1  ;;  %v2290_v51 = vld [vmem:[%s3858_s11 + $0x88] sm:$0xff] }
 0x10f   : > { %v2864_v49 = vpop.f32.mrb[15].mxu0  ;;  %2378 = vperm.xlu1 %3240, %v2290_v51   ;;  %v1857_v51 = vshll.u32 %v3828_v43, 16 }
 0x110   : > { %3072 = vmatmul.mubr.msk.bf16.gmra.mrb[120].mxu1 %vm450_vm3, %v1407_v25  ;;  %v1839_v49 = vshll.u32 %v3804_v36, 16 }
 0x111   : > { %3106 = vmatmul.mubr.msk.bf16.gmra.mrb[120].mxu0 %vm450_vm3, %v1646_v14  ;;  %3115 = vmatprep.mubr.msk.bf16.mxu1 %vm3317_vm1, %v3316_v1 }
 0x112   : > { %3109 = vmatprep.mubr.msk.bf16.mxu0 %vm3317_vm1, %v3316_v1  ;;  %v1841_v54 = vrot.slane %v1839_v49, 3  ;;  %v2064_v49 = vsel %vm2057_vm8, %v2061_v4, %v2063_v10 }
 0x113   : > { %v642_v23 = vpop.f32.mrb[16].mxu1 }
 0x114   : > { %v3944_v12 = vpop.f32.mrb[16].mxu0  ;;  %v643_v30 = vadd.f32 %v642_v23, %v3836_v48  ;;  %v2889_v31 = vpop.f32.mrb[17].mxu1  ;;  %v2059_v48 = vrot.slane %v3774_v26, 3  ;;  %v1842_v19 = vor.u32 %v1841_v54, %v1838_v9  ;;  %v2065_v9 = vrot.slane %v3816_v40, 3 }
 0x115   : > { %v2867_v20 = vpop.f32.mrb[17].mxu0  ;;  %v645_v13 = vpop.f32.mrb[18].mxu1 }
 0x116   : > { %v3951_v27 = vpop.f32.mrb[18].mxu0  ;;  %v646_v46 = vadd.f32 %v645_v13, %v3841_v50  ;;  %v2890_v42 = vpop.f32.mrb[19].mxu1  ;;  %v1833_v50 = vor.u32 %v1832_v37, %v1829_v32  ;;  %v2060_v44 = vsel %vm2057_vm8, %v2058_v22, %v2059_v48  ;;  %v1848_v20 = vshll.u32 %v3816_v40, 16 }
 0x117   : > { %v2868_v35 = vpop.f32.mrb[19].mxu0 }
 0x118   : > { %3116 = vmatmul.mubr.msk.bf16.vlgmr.msra.gmra.mrb[124].mxu1 %vm450_vm3, %v1825_v39  ;;  %v1834_v53 = vsel %vm1808_vm7, %v1824_v16, %v1833_v50  ;;  %v1845_v16 = vshrl.u32 %v3816_v40, 16  ;;  %v1843_v32 = vsel %vm1808_vm7, %v1833_v50, %v1842_v19 }
 0x119   : > { %3110 = vmatmul.mubr.msk.bf16.gmra.mrb[124].mxu0 %vm450_vm3, %v1648_v6  ;;  %3119 = vmatprep.mubr.msk.bf16.mxu1 %vm3317_vm1, %v3316_v1 }
 0x11a   : > { %3153 = vmatprep.mubr.msk.bf16.mxu0 %vm3317_vm1, %v3316_v1  ;;  %v1847_v37 = vrot.slane %v1845_v16, 2  ;;  %v2066_v16 = vsel %vm2057_vm8, %v2063_v10, %v2065_v9 }
 0x11b   : > { %v650_v58 = vpop.f32.mrb[20].mxu1 }
 0x11c   : > { %v803_v14 = vpop.f32.mrb[20].mxu0  ;;  %v651_v45 = vadd.f32 %v650_v58, %v3868_v59  ;;  %v2893_v60 = vpop.f32.mrb[21].mxu1 }
 0x11d   : > { %v3970_v41 = vadd.f32 %v803_v14, %v643_v30  ;;  %v2927_v25 = vpop.f32.mrb[21].mxu0  ;;  %v653_v3 = vpop.f32.mrb[22].mxu1  ;;  %v2062_v30 = vsel %vm2057_vm8, %v2059_v48, %v2061_v4  ;;  %v1854_v48 = vshrl.u32 %v3828_v43, 16 }
 0x11e   : > { %v806_v26 = vpop.f32.mrb[22].mxu0  ;;  %v654_v15 = vadd.f32 %v653_v3, %v3873_v38  ;;  %v2894_v17 = vpop.f32.mrb[23].mxu1 }
 0x11f   : > { %v3974_v62 = vadd.f32 %v806_v26, %v646_v46  ;;  %v2928_v0 = vpop.f32.mrb[23].mxu0  ;;  %v1850_v46 = vrot.slane %v1848_v20, 3  ;;  %v1856_v60 = vrot.slane %v1854_v48, 2  ;;  %v1866_v17 = vshll.u32 %v3847_v52, 16 }
 0x120   : > { %3120 = vmatmul.mubr.msk.bf16.gmra.mrb[128].mxu1 %vm450_vm3, %v1834_v53  ;;  %v1859_v0 = vrot.slane %v1857_v51, 3 }
 0x121   : > { %3154 = vmatmul.mubr.msk.bf16.vlgmr.msra.gmra.mrb[128].mxu0 %vm450_vm3, %v2060_v44  ;;  %3123 = vmatprep.mubr.msk.bf16.mxu1 %vm3317_vm1, %v3316_v1  ;;  %v1851_v22 = vor.u32 %v1850_v46, %v1847_v37  ;;  %v1872_v46 = vshrl.u32 %v3879_v2, 16 }
 0x122   : > { %3157 = vmatprep.mubr.msk.bf16.mxu0 %vm3317_vm1, %v3316_v1  ;;  %v1860_v54 = vor.u32 %v1859_v0, %v1856_v60  ;;  %v1881_v60 = vshrl.u32 %v3904_v24, 16 }
 0x123   : > { %v658_v6 = vpop.f32.mrb[24].mxu1 }
 0x124   : > { %v811_v59 = vpop.f32.mrb[24].mxu0  ;;  %v659_v34 = vadd.f32 %v658_v6, %v3892_v18  ;;  %v2897_v31 = vpop.f32.mrb[25].mxu1 }
 0x125   : > { %v3987_v38 = vadd.f32 %v811_v59, %v651_v45  ;;  %v2931_v23 = vpop.f32.mrb[25].mxu0  ;;  %v661_v39 = vpop.f32.mrb[26].mxu1  ;;  %v1852_v45 = vsel %vm1808_vm7, %v1842_v19, %v1851_v22  ;;  %v1868_v31 = vrot.slane %v1866_v17, 3 }
 0x126   : > { %v814_v61 = vpop.f32.mrb[26].mxu0  ;;  %v662_v42 = vadd.f32 %v661_v39, %v3898_v5  ;;  %v2898_v29 = vpop.f32.mrb[27].mxu1 }
 0x127   : > { %v3991_v35 = vadd.f32 %v814_v61, %v654_v15  ;;  %v2932_v13 = vpop.f32.mrb[27].mxu0  ;;  %v1863_v15 = vshrl.u32 %v3847_v52, 16 }
 0x128   : > { %3124 = vmatmul.mubr.msk.bf16.gmra.mrb[132].mxu1 %vm450_vm3, %v1843_v32  ;;  %v2067_v32 = vrot.slane %v3828_v43, 3 }
 0x129   : > { %3158 = vmatmul.mubr.msk.bf16.gmra.mrb[132].mxu0 %vm450_vm3, %v2062_v30  ;;  %3127 = vmatprep.mubr.msk.bf16.mxu1 %vm3317_vm1, %v3316_v1  ;;  %v1861_v30 = vsel %vm1808_vm7, %v1851_v22, %v1860_v54 }
 0x12a   : > { %3161 = vmatprep.mubr.msk.bf16.mxu0 %vm3317_vm1, %v3316_v1  ;;  %v2068_v22 = vsel %vm2057_vm8, %v2065_v9, %v2067_v32 }
 0x12b   : > { %v666_v50 = vpop.f32.mrb[28].mxu1 }
 0x12c   : > { %v819_v18 = vpop.f32.mrb[28].mxu0  ;;  %v667_v36 = vadd.f32 %v666_v50, %v3918_v33  ;;  %v2901_v25 = vpop.f32.mrb[29].mxu1 }
 0x12d   : > { %v4004_v5 = vadd.f32 %v819_v18, %v659_v34  ;;  %v2935_v14 = vpop.f32.mrb[29].mxu0  ;;  %v669_v44 = vpop.f32.mrb[30].mxu1  ;;  %v1865_v34 = vrot.slane %v1863_v15, 2 }
 0x12e   : > { %v822_v56 = vpop.f32.mrb[30].mxu0  ;;  %v670_v3 = vadd.f32 %v669_v44, %v3927_v55  ;;  %v2902_v53 = vpop.f32.mrb[31].mxu1  ;;  %v2069_v44 = vrot.slane %v3847_v52, 3 }
 0x12f   : > { %v4008_v58 = vadd.f32 %v822_v56, %v662_v42  ;;  %v2936_v26 = vpop.f32.mrb[31].mxu0  ;;  %v1869_v37 = vor.u32 %v1868_v31, %v1865_v34  ;;  %v1875_v42 = vshll.u32 %v3879_v2, 16 }
 0x130   : > { %3128 = vmatmul.mubr.msk.bf16.gmra.mrb[136].mxu1 %vm450_vm3, %v1852_v45 }
 0x131   : > { %3162 = vmatmul.mubr.msk.bf16.gmra.mrb[136].mxu0 %vm450_vm3, %v2064_v49  ;;  %3131 = vmatprep.mubr.msk.bf16.mxu1 %vm3317_vm1, %v3316_v1  ;;  %v1870_v56 = vsel %vm1808_vm7, %v1860_v54, %v1869_v37  ;;  %v1874_v49 = vrot.slane %v1872_v46, 2 }
 0x132   : > { %3165 = vmatprep.mubr.msk.bf16.mxu0 %vm3317_vm1, %v3316_v1 }
 0x133   : > { %v674_v59 = vpop.f32.mrb[32].mxu1 }
 0x134   : > { %v827_v33 = vpop.f32.mrb[32].mxu0  ;;  %v675_v40 = vadd.f32 %v674_v59, %v3944_v12  ;;  %v2905_v20 = vpop.f32.mrb[33].mxu1 }
 0x135   : > { %v4021_v55 = vadd.f32 %v827_v33, %v667_v36  ;;  %v2939_v4 = vpop.f32.mrb[33].mxu0  ;;  %v677_v61 = vpop.f32.mrb[34].mxu1  ;;  %v1877_v36 = vrot.slane %v1875_v42, 3  ;;  %v2070_v33 = vsel %vm2057_vm8, %v2067_v32, %v2069_v44 }
 0x136   : > { %v830_v19 = vpop.f32.mrb[34].mxu0  ;;  %v678_v13 = vadd.f32 %v677_v61, %v3951_v27  ;;  %v2906_v39 = vpop.f32.mrb[35].mxu1 }
 0x137   : > { %v4025_v23 = vadd.f32 %v830_v19, %v670_v3  ;;  %v2940_v6 = vpop.f32.mrb[35].mxu0  ;;  %v1878_v45 = vor.u32 %v1877_v36, %v1874_v49  ;;  %v1883_v19 = vrot.slane %v1881_v60, 2 }
 0x138   : > { %3132 = vmatmul.mubr.msk.bf16.gmra.mrb[140].mxu1 %vm450_vm3, %v1861_v30 }
 0x139   : > { %3166 = vmatmul.mubr.msk.bf16.gmra.mrb[140].mxu0 %vm450_vm3, %v2066_v16  ;;  %3135 = vmatprep.mubr.msk.bf16.mxu1 %vm3317_vm1, %v3316_v1  ;;  %v1879_v59 = vsel %vm1808_vm7, %v1869_v37, %v1878_v45 }
 0x13a   : > { %3169 = vmatprep.mubr.msk.bf16.mxu0 %vm3317_vm1, %v3316_v1 }
 0x13b   : > { %v682_v10 = vpop.f32.mrb[36].mxu1 }
 0x13c   : > { %v835_v12 = vpop.f32.mrb[36].mxu0  ;;  %v683_v43 = vadd.f32 %v682_v10, %v3843_v11  ;;  %v2909_v48 = vpop.f32.mrb[37].mxu1 }
 0x13d   : > { %v4038_v27 = vadd.f32 %v835_v12, %v675_v40  ;;  %v2943_v29 = vpop.f32.mrb[37].mxu0  ;;  %v685_v50 = vpop.f32.mrb[38].mxu1  ;;  %v3275_v40 = vld [vmem:[%s3404_s8 + $0x58] ss:$0 sps:$4 sm:$0x77]   ;;  %s3194_s8 = smul.u32 18, %s4317_s18 }
 0x13e   : > { %v838_v18 = vpop.f32.mrb[38].mxu0  ;;  %v686_v25 = vadd.f32 %v685_v50, %v3850_v47  ;;  %v2910_v26 = vpop.f32.mrb[39].mxu1  ;;  %v1884_v47 = vshll.u32 %v3904_v24, 16  ;;  %v1890_v34 = vshrl.u32 %v3275_v40, 16  ;;  %v1893_v31 = vshll.u32 %v3275_v40, 16 }
 0x13f   : > { %v4042_v51 = vadd.f32 %v838_v18, %v678_v13  ;;  %v2944_v14 = vpop.f32.mrb[39].mxu0  ;;  %s291_s13 = sadd.s32 %s3195_s12, %s3194_s8 }
 0x140   : > { %3136 = vmatmul.mubr.msk.bf16.gmra.mrb[144].mxu1 %vm450_vm3, %v1870_v56  ;;  %v1886_v16 = vrot.slane %v1884_v47, 3  ;;  %v1892_v18 = vrot.slane %v1890_v34, 2  ;;  %v2073_v14 = vrot.slane %v3904_v24, 3  ;;  %s2627_s14 = sshll.u32 %s291_s13, 3 }
 0x141   : > { %3170 = vmatmul.mubr.msk.bf16.gmra.mrb[144].mxu0 %vm450_vm3, %v2068_v22  ;;  %3139 = vmatprep.mubr.msk.bf16.mxu1 %vm3317_vm1, %v3316_v1  ;;  %v1895_v22 = vrot.slane %v1893_v31, 3  ;;  %s4224_s26 = scalar_lea.vmem %s4302_s4, %s2627_s14 }
 0x142   : > { %3173 = vmatprep.mubr.msk.bf16.mxu0 %vm3317_vm1, %v3316_v1  ;;  %v1887_v30 = vor.u32 %v1886_v16, %v1883_v19 }
 0x143   : > { %v690_v53 = vpop.f32.mrb[40].mxu1  ;;  %v1896_v50 = vor.u32 %v1895_v22, %v1892_v18 }
 0x144   : > { %v843_v11 = vpop.f32.mrb[40].mxu0  ;;  %v691_v52 = vadd.f32 %v690_v53, %v3875_v63  ;;  %v2913_v54 = vpop.f32.mrb[41].mxu1  ;;  %v2071_v63 = vrot.slane %v3879_v2, 3  ;;  %v1888_v10 = vsel %vm1808_vm7, %v1878_v45, %v1887_v30  ;;  %v2075_v53 = vrot.slane %v3275_v40, 3 }
 0x145   : > { %v4055_v0 = vadd.f32 %v843_v11, %v683_v43  ;;  %v2947_v3 = vpop.f32.mrb[41].mxu0  ;;  %v693_v4 = vpop.f32.mrb[42].mxu1  ;;  %v1897_v60 = vsel %vm1808_vm7, %v1887_v30, %v1896_v50 }
 0x146   : > { %v846_v9 = vpop.f32.mrb[42].mxu0  ;;  %v694_v20 = vadd.f32 %v693_v4, %v3881_v8  ;;  %v2914_v6 = vpop.f32.mrb[43].mxu1  ;;  %v2072_v12 = vsel %vm2057_vm8, %v2069_v44, %v2071_v63 }
 0x147   : > { %v4059_v15 = vadd.f32 %v846_v9, %v686_v25  ;;  %v2948_v17 = vpop.f32.mrb[43].mxu0  ;;  %v2074_v25 = vsel %vm2057_vm8, %v2071_v63, %v2073_v14 }
 0x148   : > { %3140 = vmatmul.mubr.msk.bf16.gmra.mrb[148].mxu1 %vm450_vm3, %v1879_v59  ;;  %v2076_v17 = vsel %vm2057_vm8, %v2073_v14, %v2075_v53 }
 0x149   : > { %3174 = vmatmul.mubr.msk.bf16.gmra.mrb[148].mxu0 %vm450_vm3, %v2070_v33  ;;  %3143 = vmatprep.mubr.msk.bf16.mxu1 %vm3317_vm1, %v3316_v1 }
 0x14a   : > { %3177 = vmatprep.mubr.msk.bf16.mxu0 %vm3317_vm1, %v3316_v1 }
 0x14b   : > { %v698_v39 = vpop.f32.mrb[44].mxu1 }
 0x14c   : > { %v851_v61 = vpop.f32.mrb[44].mxu0  ;;  %v699_v37 = vadd.f32 %v698_v39, %v3900_v21  ;;  %v2917_v46 = vpop.f32.mrb[45].mxu1 }
 0x14d   : > { %v4071_v13 = vadd.f32 %v851_v61, %v691_v52  ;;  %v2951_v8 = vpop.f32.mrb[45].mxu0  ;;  %v701_v29 = vpop.f32.mrb[46].mxu1 }
 0x14e   : > { %v854_v32 = vpop.f32.mrb[46].mxu0  ;;  %v702_v43 = vadd.f32 %v701_v29, %v3906_v28  ;;  %v2918_v48 = vpop.f32.mrb[47].mxu1 }
 0x14f   : > { %v4075_v2 = vadd.f32 %v854_v32, %v694_v20  ;;  %v2952_v42 = vpop.f32.mrb[47].mxu0 }
 0x150   : > { %3144 = vmatmul.mubr.msk.bf16.gmra.mrb[152].mxu1 %vm450_vm3, %v1888_v10 }
 0x151   : > { %3178 = vmatmul.mubr.msk.bf16.gmra.mrb[152].mxu0 %vm450_vm3, %v2072_v12  ;;  %3147 = vmatprep.mubr.msk.bf16.mxu1 %vm3317_vm1, %v3316_v1 }
 0x152   : > { %3181 = vmatprep.mubr.msk.bf16.mxu0 %vm3317_vm1, %v3316_v1 }
 0x153   : > { %v706_v36 = vpop.f32.mrb[48].mxu1 }
 0x154   : > { %v859_v21 = vpop.f32.mrb[48].mxu0  ;;  %v707_v26 = vadd.f32 %v706_v36, %v3929_v7  ;;  %v2921_v44 = vpop.f32.mrb[49].mxu1 }
 0x155   : > { %v4086_v56 = vadd.f32 %v859_v21, %v699_v37  ;;  %v2955_v49 = vpop.f32.mrb[49].mxu0  ;;  %v709_v45 = vpop.f32.mrb[50].mxu1 }
 0x156   : > { %v862_v28 = vpop.f32.mrb[50].mxu0  ;;  %v710_v47 = vadd.f32 %v709_v45, %v3934_v57  ;;  %v2922_v3 = vpop.f32.mrb[51].mxu1 }
 0x157   : > { %v4090_v11 = vadd.f32 %v862_v28, %v702_v43  ;;  %v2956_v24 = vpop.f32.mrb[51].mxu0 }
 0x158   : > { %3148 = vmatmul.mubr.msk.bf16.gmra.mrb[156].mxu1 %vm450_vm3, %v1897_v60 }
 0x159   : > { %3182 = vmatmul.mubr.msk.bf16.gmra.mrb[156].mxu0 %vm450_vm3, %v2074_v25 }
 0x15a   : > { %3185 = vmatprep.mubr.msk.bf16.mxu0 %vm3317_vm1, %v3316_v1 }
 0x15b   : > { %v1044_v52 = vpop.f32.mrb[52].mxu1 }
 0x15c   : > { %v867_v9 = vpop.f32.mrb[52].mxu0  ;;  %v1115_v4 = vadd.f32 %v1044_v52, %v3970_v41  ;;  %v2965_v57 = vpop.f32.mrb[53].mxu1 }
 0x15d   : > { %v4098_v7 = vadd.f32 %v867_v9, %v707_v26  ;;  %v2959_v33 = vpop.f32.mrb[53].mxu0  ;;  %v1047_v16 = vpop.f32.mrb[54].mxu1 }
 0x15e   : > { %v870_v54 = vpop.f32.mrb[54].mxu0  ;;  %v1116_v1 = vadd.f32 %v1047_v16, %v3974_v62  ;;  %v2966_v40 = vpop.f32.mrb[55].mxu1 }
 0x15f   : > { %v4102_v59 = vadd.f32 %v870_v54, %v710_v47  ;;  %v2960_v19 = vpop.f32.mrb[55].mxu0 }
 0x161   : > { %3186 = vmatmul.mubr.msk.bf16.gmra.mrb[160].mxu0 %vm450_vm3, %v2076_v17 }
 0x163   : > { %v1052_v61 = vpop.f32.mrb[56].mxu1 }
 0x164   : > { %v1293_v20 = vpop.f32.mrb[56].mxu0  ;;  %v1117_v34 = vadd.f32 %v1052_v61, %v3987_v38  ;;  %v2969_v31 = vpop.f32.mrb[57].mxu1 }
 0x165   : > { %v4106_v6 = vadd.f32 %v1293_v20, %v1115_v4  ;;  %v3003_v63 = vpop.f32.mrb[57].mxu0  ;;  %v1055_v39 = vpop.f32.mrb[58].mxu1 }
 0x166   : > { %v1296_v30 = vpop.f32.mrb[58].mxu0  ;;  %v1118_v32 = vadd.f32 %v1055_v39, %v3991_v35  ;;  %v2970_v12 = vpop.f32.mrb[59].mxu1 }
 0x167   : > { %v4109_v41 = vadd.f32 %v1296_v30, %v1116_v1  ;;  %v3004_v8 = vpop.f32.mrb[59].mxu0 }
 0x16b   : > { %v1060_v42 = vpop.f32.mrb[60].mxu1 }
 0x16c   : > { %v1301_v62 = vpop.f32.mrb[60].mxu0  ;;  %v1119_v10 = vadd.f32 %v1060_v42, %v4004_v5  ;;  %v2973_v18 = vpop.f32.mrb[61].mxu1 }
 0x16d   : > { %v4112_v37 = vadd.f32 %v1301_v62, %v1117_v34  ;;  %v3007_v46 = vpop.f32.mrb[61].mxu0  ;;  %v1063_v43 = vpop.f32.mrb[62].mxu1 }
 0x16e   : > { %v1304_v29 = vpop.f32.mrb[62].mxu0  ;;  %v1120_v48 = vadd.f32 %v1063_v43, %v4008_v58  ;;  %v2974_v14 = vpop.f32.mrb[63].mxu1 }
 0x16f   : > { %v4115_v22 = vadd.f32 %v1304_v29, %v1118_v32  ;;  %v3008_v38 = vpop.f32.mrb[63].mxu0 }
 0x173   : > { %v1068_v49 = vpop.f32.mrb[64].mxu1 }
 0x174   : > { %v1309_v21 = vpop.f32.mrb[64].mxu0  ;;  %v1121_v28 = vadd.f32 %v1068_v49, %v4021_v55  ;;  %v2977_v25 = vpop.f32.mrb[65].mxu1 }
 0x175   : > { %v4118_v50 = vadd.f32 %v1309_v21, %v1119_v10  ;;  %v3011_v35 = vpop.f32.mrb[65].mxu0  ;;  %v1071_v44 = vpop.f32.mrb[66].mxu1 }
 0x176   : > { %v1312_v36 = vpop.f32.mrb[66].mxu0  ;;  %v1122_v24 = vadd.f32 %v1071_v44, %v4025_v23  ;;  %v2978_v45 = vpop.f32.mrb[67].mxu1 }
 0x177   : > { %v4121_v26 = vadd.f32 %v1312_v36, %v1120_v48  ;;  %v3012_v5 = vpop.f32.mrb[67].mxu0 }
 0x17b   : > { %v1076_v3 = vpop.f32.mrb[68].mxu1 }
 0x17c   : > { %v1317_v60 = vpop.f32.mrb[68].mxu0  ;;  %v1123_v9 = vadd.f32 %v1076_v3, %v4038_v27  ;;  %v2981_v33 = vpop.f32.mrb[69].mxu1 }
 0x17d   : > { %v4124_v47 = vadd.f32 %v1317_v60, %v1121_v28  ;;  %v3015_v58 = vpop.f32.mrb[69].mxu0  ;;  %v1079_v54 = vpop.f32.mrb[70].mxu1 }
 0x17e   : > { %v1320_v53 = vpop.f32.mrb[70].mxu0  ;;  %v1124_v17 = vadd.f32 %v1079_v54, %v4042_v51  ;;  %v2982_v4 = vpop.f32.mrb[71].mxu1 }
 0x17f   : > { %v4127_v52 = vadd.f32 %v1320_v53, %v1122_v24  ;;  %v3016_v55 = vpop.f32.mrb[71].mxu0 }
 0x183   : > { %v1084_v16 = vpop.f32.mrb[72].mxu1 }
 0x184   : > { %v1325_v57 = vpop.f32.mrb[72].mxu0  ;;  %v1125_v40 = vadd.f32 %v1084_v16, %v4055_v0  ;;  %v2985_v20 = vpop.f32.mrb[73].mxu1 }
 0x185   : > { %v4130_v19 = vadd.f32 %v1325_v57, %v1123_v9  ;;  %v3019_v23 = vpop.f32.mrb[73].mxu0  ;;  %v1087_v61 = vpop.f32.mrb[74].mxu1 }
 0x186   : > { %v1328_v1 = vpop.f32.mrb[74].mxu0  ;;  %v1126_v30 = vadd.f32 %v1087_v61, %v4059_v15  ;;  %v2986_v34 = vpop.f32.mrb[75].mxu1 }
 0x187   : > { %v4133_v63 = vadd.f32 %v1328_v1, %v1124_v17  ;;  %v3020_v27 = vpop.f32.mrb[75].mxu0 }
 0x18b   : > { %v1092_v39 = vpop.f32.mrb[76].mxu1 }
 0x18c   : > { %v1333_v31 = vpop.f32.mrb[76].mxu0  ;;  %v1127_v12 = vadd.f32 %v1092_v39, %v4071_v13  ;;  %v2989_v62 = vpop.f32.mrb[77].mxu1 }
 0x18d   : > { %v4136_v8 = vadd.f32 %v1333_v31, %v1125_v40  ;;  %v3023_v51 = vpop.f32.mrb[77].mxu0  ;;  %v1095_v42 = vpop.f32.mrb[78].mxu1 }
 0x18e   : > { %v1336_v32 = vpop.f32.mrb[78].mxu0  ;;  %v1128_v29 = vadd.f32 %v1095_v42, %v4075_v2  ;;  %v2990_v10 = vpop.f32.mrb[79].mxu1 }
 0x18f   : > { %v4139_v46 = vadd.f32 %v1336_v32, %v1126_v30  ;;  %v3024_v0 = vpop.f32.mrb[79].mxu0 }
 0x193   : > { %v1100_v43 = vpop.f32.mrb[80].mxu1 }
 0x194   : > { %v1341_v18 = vpop.f32.mrb[80].mxu0  ;;  %v1129_v14 = vadd.f32 %v1100_v43, %v4086_v56  ;;  %v2993_v21 = vpop.f32.mrb[81].mxu1 }
 0x195   : > { %v4142_v38 = vadd.f32 %v1341_v18, %v1127_v12  ;;  %v3027_v15 = vpop.f32.mrb[81].mxu0  ;;  %v1103_v49 = vpop.f32.mrb[82].mxu1 }
 0x196   : > { %v1344_v48 = vpop.f32.mrb[82].mxu0  ;;  %v1130_v36 = vadd.f32 %v1103_v49, %v4090_v11  ;;  %v2994_v28 = vpop.f32.mrb[83].mxu1 }
 0x197   : > { %v4145_v35 = vadd.f32 %v1344_v48, %v1128_v29  ;;  %v3028_v13 = vpop.f32.mrb[83].mxu0 }
 0x19b   : > { %v1108_v44 = vpop.f32.mrb[84].mxu1 }
 0x19c   : > { %v1349_v25 = vpop.f32.mrb[84].mxu0  ;;  %v1131_v45 = vadd.f32 %v1108_v44, %v4098_v7  ;;  %v2997_v60 = vpop.f32.mrb[85].mxu1 }
 0x19d   : > { %v4148_v5 = vadd.f32 %v1349_v25, %v1129_v14  ;;  %v3031_v2 = vpop.f32.mrb[85].mxu0  ;;  %v1111_v3 = vpop.f32.mrb[86].mxu1 }
 0x19e   : > { %v1352_v24 = vpop.f32.mrb[86].mxu0  ;;  %v1132_v53 = vadd.f32 %v1111_v3, %v4102_v59  ;;  %v2998_v9 = vpop.f32.mrb[87].mxu1 }
 0x19f   : > { %v4151_v58 = vadd.f32 %v1352_v24, %v1130_v36  ;;  %v3032_v56 = vpop.f32.mrb[87].mxu0 }
 0x1a3   : > { %v1472_v54 = vpop.f32.mrb[88].mxu1 }
 0x1a4   : > { %v1357_v33 = vpop.f32.mrb[88].mxu0  ;;  %v1543_v4 = vadd.f32 %v1472_v54, %v4106_v6  ;;  %v3041_v57 = vpop.f32.mrb[89].mxu1 }
 0x1a5   : > { %v4154_v55 = vadd.f32 %v1357_v33, %v1131_v45  ;;  %v3035_v11 = vpop.f32.mrb[89].mxu0  ;;  %v1475_v16 = vpop.f32.mrb[90].mxu1 }
 0x1a6   : > { %v1360_v17 = vpop.f32.mrb[90].mxu0  ;;  %v1544_v1 = vadd.f32 %v1475_v16, %v4109_v41  ;;  %v3042_v40 = vpop.f32.mrb[91].mxu1 }
 0x1a7   : > { %v4157_v23 = vadd.f32 %v1360_v17, %v1132_v53  ;;  %v3036_v7 = vpop.f32.mrb[91].mxu0 }
 0x1ab   : > { %v1480_v61 = vpop.f32.mrb[92].mxu1 }
 0x1ac   : > { %v1713_v20 = vpop.f32.mrb[92].mxu0  ;;  %v1545_v34 = vadd.f32 %v1480_v61, %v4112_v37  ;;  %v3045_v31 = vpop.f32.mrb[93].mxu1 }
 0x1ad   : > { %v4160_v27 = vadd.f32 %v1713_v20, %v1543_v4  ;;  %v3079_v59 = vpop.f32.mrb[93].mxu0  ;;  %v1483_v39 = vpop.f32.mrb[94].mxu1 }
 0x1ae   : > { %v1716_v30 = vpop.f32.mrb[94].mxu0  ;;  %v1546_v32 = vadd.f32 %v1483_v39, %v4115_v22  ;;  %v3046_v12 = vpop.f32.mrb[95].mxu1 }
 0x1af   : > { %v4163_v51 = vadd.f32 %v1716_v30, %v1544_v1  ;;  %v3080_v6 = vpop.f32.mrb[95].mxu0 }
 0x1b3   : > { %v1488_v42 = vpop.f32.mrb[96].mxu1 }
 0x1b4   : > { %v1721_v62 = vpop.f32.mrb[96].mxu0  ;;  %v1547_v10 = vadd.f32 %v1488_v42, %v4118_v50  ;;  %v3049_v18 = vpop.f32.mrb[97].mxu1 }
 0x1b5   : > { %v4166_v0 = vadd.f32 %v1721_v62, %v1545_v34  ;;  %v3083_v41 = vpop.f32.mrb[97].mxu0  ;;  %v1491_v43 = vpop.f32.mrb[98].mxu1 }
 0x1b6   : > { %v1724_v29 = vpop.f32.mrb[98].mxu0  ;;  %v1548_v48 = vadd.f32 %v1491_v43, %v4121_v26  ;;  %v3050_v14 = vpop.f32.mrb[99].mxu1 }
 0x1b7   : > { %v4169_v15 = vadd.f32 %v1724_v29, %v1546_v32  ;;  %v3084_v37 = vpop.f32.mrb[99].mxu0 }
 0x1bb   : > { %v1496_v49 = vpop.f32.mrb[100].mxu1 }
 0x1bc   : > { %v1729_v21 = vpop.f32.mrb[100].mxu0  ;;  %v1549_v28 = vadd.f32 %v1496_v49, %v4124_v47  ;;  %v3053_v25 = vpop.f32.mrb[101].mxu1 }
 0x1bd   : > { %v4172_v13 = vadd.f32 %v1729_v21, %v1547_v10  ;;  %v3087_v22 = vpop.f32.mrb[101].mxu0  ;;  %v1499_v44 = vpop.f32.mrb[102].mxu1 }
 0x1be   : > { %v1732_v36 = vpop.f32.mrb[102].mxu0  ;;  %v1550_v24 = vadd.f32 %v1499_v44, %v4127_v52  ;;  %v3054_v45 = vpop.f32.mrb[103].mxu1 }
 0x1bf   : > { %v4175_v2 = vadd.f32 %v1732_v36, %v1548_v48  ;;  %v3088_v50 = vpop.f32.mrb[103].mxu0 }
 0x1c3   : > { %v1504_v3 = vpop.f32.mrb[104].mxu1 }
 0x1c4   : > { %v1737_v60 = vpop.f32.mrb[104].mxu0  ;;  %v1551_v9 = vadd.f32 %v1504_v3, %v4130_v19  ;;  %v3057_v33 = vpop.f32.mrb[105].mxu1 }
 0x1c5   : > { %v4178_v56 = vadd.f32 %v1737_v60, %v1549_v28  ;;  %v3091_v26 = vpop.f32.mrb[105].mxu0  ;;  %v1507_v54 = vpop.f32.mrb[106].mxu1 }
 0x1c6   : > { %v1740_v53 = vpop.f32.mrb[106].mxu0  ;;  %v1552_v17 = vadd.f32 %v1507_v54, %v4133_v63  ;;  %v3058_v4 = vpop.f32.mrb[107].mxu1 }
 0x1c7   : > { %v4181_v11 = vadd.f32 %v1740_v53, %v1550_v24  ;;  %v3092_v47 = vpop.f32.mrb[107].mxu0 }
 0x1cb   : > { %v1512_v16 = vpop.f32.mrb[108].mxu1 }
 0x1cc   : > { %v1745_v57 = vpop.f32.mrb[108].mxu0  ;;  %v1553_v40 = vadd.f32 %v1512_v16, %v4136_v8  ;;  %v3061_v20 = vpop.f32.mrb[109].mxu1 }
 0x1cd   : > { %v4184_v7 = vadd.f32 %v1745_v57, %v1551_v9  ;;  %v3095_v52 = vpop.f32.mrb[109].mxu0  ;;  %v1515_v61 = vpop.f32.mrb[110].mxu1 }
 0x1ce   : > { %v1748_v1 = vpop.f32.mrb[110].mxu0  ;;  %v1554_v30 = vadd.f32 %v1515_v61, %v4139_v46  ;;  %v3062_v34 = vpop.f32.mrb[111].mxu1 }
 0x1cf   : > { %v4187_v59 = vadd.f32 %v1748_v1, %v1552_v17  ;;  %v3096_v19 = vpop.f32.mrb[111].mxu0 }
 0x1d0   : > { %v4219_v19 = vld [vmem:[%s4300_s2] ss:$0 sm:$0xff] }
 0x1d3   : > { %v1520_v39 = vpop.f32.mrb[112].mxu1 }
 0x1d4   : > { %v1753_v31 = vpop.f32.mrb[112].mxu0  ;;  %v1555_v12 = vadd.f32 %v1520_v39, %v4142_v38  ;;  %v3065_v62 = vpop.f32.mrb[113].mxu1 }
 0x1d5   : > { %v4190_v6 = vadd.f32 %v1753_v31, %v1553_v40  ;;  %v3099_v63 = vpop.f32.mrb[113].mxu0  ;;  %v1523_v42 = vpop.f32.mrb[114].mxu1 }
 0x1d6   : > { %v1756_v32 = vpop.f32.mrb[114].mxu0  ;;  %v1556_v29 = vadd.f32 %v1523_v42, %v4145_v35  ;;  %v3066_v10 = vpop.f32.mrb[115].mxu1 }
 0x1d7   : > { %v4193_v41 = vadd.f32 %v1756_v32, %v1554_v30  ;;  %v3100_v8 = vpop.f32.mrb[115].mxu0  ;;  %v2294_v40 = vpop.permute.xlu0 %2293 }
 0x1db   : > { %v1528_v43 = vpop.f32.mrb[116].mxu1  ;;  %v2299_v62 = vpop.permute.xlu0 %2298 }
 0x1dc   : > { %v1761_v18 = vpop.f32.mrb[116].mxu0  ;;  %v1557_v14 = vadd.f32 %v1528_v43, %v4148_v5  ;;  %v3069_v21 = vpop.f32.mrb[117].mxu1 }
 0x1dd   : > { %v4196_v37 = vadd.f32 %v1761_v18, %v1555_v12  ;;  %v3103_v46 = vpop.f32.mrb[117].mxu0  ;;  %v1531_v49 = vpop.f32.mrb[118].mxu1 }
 0x1de   : > { %v1764_v48 = vpop.f32.mrb[118].mxu0  ;;  %v1558_v36 = vadd.f32 %v1531_v49, %v4151_v58  ;;  %v3070_v28 = vpop.f32.mrb[119].mxu1 }
 0x1df   : > { %v4199_v22 = vadd.f32 %v1764_v48, %v1556_v29  ;;  %v3104_v38 = vpop.f32.mrb[119].mxu0  ;;  %v2304_v46 = vpop.permute.xlu1 %2303 }
 0x1e3   : > { %v1536_v44 = vpop.f32.mrb[120].mxu1 }
 0x1e4   : > { %v1769_v35 = vpop.f32.mrb[120].mxu0  ;;  %v1559_v45 = vadd.f32 %v1536_v44, %v4154_v55  ;;  %v3073_v60 = vpop.f32.mrb[121].mxu1 }
 0x1e5   : > { %v4202_v25 = vadd.f32 %v1769_v35, %v1557_v14  ;;  %v3107_v50 = vpop.f32.mrb[121].mxu0  ;;  %v1539_v3 = vpop.f32.mrb[122].mxu1 }
 0x1e6   : > { %v1772_v24 = vpop.f32.mrb[122].mxu0  ;;  %v1560_v53 = vadd.f32 %v1539_v3, %v4157_v23  ;;  %v3074_v9 = vpop.f32.mrb[123].mxu1 }
 0x1e7   : > { %v4205_v5 = vadd.f32 %v1772_v24, %v1558_v36  ;;  %v3108_v26 = vpop.f32.mrb[123].mxu0  ;;  %v2309_v9 = vpop.permute.xlu1 %2308 }
 0x1eb   : > { %v1962_v54 = vpop.f32.mrb[124].mxu1 }
 0x1ec   : > { %v1777_v58 = vpop.f32.mrb[124].mxu0  ;;  %v2033_v4 = vadd.f32 %v1962_v54, %v4160_v27  ;;  %v3117_v57 = vpop.f32.mrb[125].mxu1 }
 0x1ed   : > { %v4210_v33 = vadd.f32 %v1777_v58, %v1559_v45  ;;  %v3111_v47 = vpop.f32.mrb[125].mxu0  ;;  %v1965_v16 = vpop.f32.mrb[126].mxu1 }
 0x1ee   : > { %v1780_v17 = vpop.f32.mrb[126].mxu0  ;;  %v2034_v1 = vadd.f32 %v1965_v16, %v4163_v51  ;;  %v3118_v23 = vpop.f32.mrb[127].mxu1 }
 0x1ef   : > { %v4213_v55 = vadd.f32 %v1780_v17, %v1560_v53  ;;  %v3112_v52 = vpop.f32.mrb[127].mxu0 }
 0x1f3   : > { %v1970_v27 = vpop.f32.mrb[128].mxu1 }
 0x1f4   : > { %v2141_v20 = vpop.f32.mrb[128].mxu0  ;;  %v2035_v34 = vadd.f32 %v1970_v27, %v4166_v0  ;;  %v3121_v63 = vpop.f32.mrb[129].mxu1 }
 0x1f5   : > { %v2212_v61 = vadd.f32 %v2141_v20, %v2033_v4  ;;  %v3155_v30 = vpop.f32.mrb[129].mxu0  ;;  %v1973_v12 = vpop.f32.mrb[130].mxu1 }
 0x1f6   : > { %v2144_v51 = vpop.f32.mrb[130].mxu0  ;;  %v2036_v42 = vadd.f32 %v1973_v12, %v4169_v15  ;;  %v3122_v10 = vpop.f32.mrb[131].mxu1 }
 0x1f7   : > { %v2237_v31 = vadd.f32 %v4219_v19, %v2212_v61  ;;  %v2213_v39 = vadd.f32 %v2144_v51, %v2034_v1  ;;  %v3156_v32 = vpop.f32.mrb[131].mxu0  ;;  %v2314_v51 = vpop.permute.xlu0 %2313 }
 0x1f8   : > { %v2319_v12 = vpop.permute.xlu1 %2318 }
 0x1f9   : > { %2255 = vst [vmem:[%s4224_s26] sm:$0xff] %v2237_v31  ;;  %v2381_v8 = vmul.f32 %v2294_v40, %v2237_v31  ;;  %v2238_v29 = vadd.f32 %v4219_v19, %v2213_v39 }
 0x1fb   : > { %2256 = vst [vmem:[%s4224_s26 + $0x8] sm:$0xff] %v2238_v29  ;;  %v2382_v18 = vmul.f32 %v2299_v62, %v2238_v29  ;;  %v2422_v0 = vmul.f32 %v2381_v8, %v2237_v31  ;;  %v1978_v49 = vpop.f32.mrb[132].mxu1 }
 0x1fc   : > { %v2149_v43 = vpop.f32.mrb[132].mxu0  ;;  %v2037_v35 = vadd.f32 %v1978_v49, %v4172_v13  ;;  %v3125_v50 = vpop.f32.mrb[133].mxu1 }
 0x1fd   : > { %v2399_v48 = vadd.f32 %v2382_v18, %v2381_v8  ;;  %v2423_v14 = vmul.f32 %v2382_v18, %v2238_v29  ;;  %v2214_v21 = vadd.f32 %v2149_v43, %v2035_v34  ;;  %v3159_v38 = vpop.f32.mrb[133].mxu0  ;;  %v1981_v45 = vpop.f32.mrb[134].mxu1 }
 0x1fe   : > { %v2152_v36 = vpop.f32.mrb[134].mxu0  ;;  %v2038_v26 = vadd.f32 %v1981_v45, %v4175_v2  ;;  %v3126_v53 = vpop.f32.mrb[135].mxu1 }
 0x1ff   : > { %v2440_v28 = vadd.f32 %v2423_v14, %v2422_v0  ;;  %v2239_v15 = vadd.f32 %v4219_v19, %v2214_v21  ;;  %v2215_v44 = vadd.f32 %v2152_v36, %v2036_v42  ;;  %v3160_v24 = vpop.f32.mrb[135].mxu0  ;;  %v2329_v45 = vpop.permute.xlu1 %2328 }
 0x201   : > { %2257 = vst [vmem:[%s4224_s26 + $0x10] sm:$0xff] %v2239_v15  ;;  %v2383_v60 = vmul.f32 %v2304_v46, %v2239_v15  ;;  %v2240_v3 = vadd.f32 %v4219_v19, %v2215_v44 }
 0x203   : > { %v2400_v58 = vadd.f32 %v2399_v48, %v2383_v60  ;;  %v2424_v47 = vmul.f32 %v2383_v60, %v2239_v15  ;;  %2258 = vst [vmem:[%s4224_s26 + $0x18] sm:$0xff] %v2240_v3  ;;  %v2384_v54 = vmul.f32 %v2309_v9, %v2240_v3  ;;  %v1986_v1 = vpop.f32.mrb[136].mxu1 }
 0x204   : > { %v2157_v17 = vpop.f32.mrb[136].mxu0  ;;  %v2039_v2 = vadd.f32 %v1986_v1, %v4178_v56  ;;  %v3129_v61 = vpop.f32.mrb[137].mxu1 }
 0x205   : > { %v2441_v13 = vadd.f32 %v2440_v28, %v2424_v47  ;;  %v2401_v4 = vadd.f32 %v2400_v58, %v2384_v54  ;;  %v2425_v57 = vmul.f32 %v2384_v54, %v2240_v3  ;;  %v2216_v52 = vadd.f32 %v2157_v17, %v2037_v35  ;;  %v3163_v16 = vpop.f32.mrb[137].mxu0  ;;  %v1989_v34 = vpop.f32.mrb[138].mxu1 }
 0x206   : > { %v2160_v23 = vpop.f32.mrb[138].mxu0  ;;  %v2040_v63 = vadd.f32 %v1989_v34, %v4181_v11  ;;  %v3130_v32 = vpop.f32.mrb[139].mxu1 }
 0x207   : > { %v2442_v40 = vadd.f32 %v2441_v13, %v2425_v57  ;;  %v2241_v20 = vadd.f32 %v4219_v19, %v2216_v52  ;;  %v2217_v30 = vadd.f32 %v2160_v23, %v2038_v26  ;;  %v3164_v27 = vpop.f32.mrb[139].mxu0  ;;  %v2324_v28 = vpop.permute.xlu0 %2323 }
 0x208   : > { %v2339_v27 = vpop.permute.xlu1 %2338 }
 0x209   : > { %2259 = vst [vmem:[%s4224_s26 + $0x20] sm:$0xff] %v2241_v20  ;;  %v2385_v31 = vmul.f32 %v2314_v51, %v2241_v20  ;;  %v2242_v39 = vadd.f32 %v4219_v19, %v2217_v30 }
 0x20b   : > { %v2402_v62 = vadd.f32 %v2401_v4, %v2385_v31  ;;  %v2426_v8 = vmul.f32 %v2385_v31, %v2241_v20  ;;  %2260 = vst [vmem:[%s4224_s26 + $0x28] sm:$0xff] %v2242_v39  ;;  %v2386_v42 = vmul.f32 %v2319_v12, %v2242_v39  ;;  %v1994_v0 = vpop.f32.mrb[140].mxu1  ;;  %v2334_v23 = vpop.permute.xlu0 %2333 }
 0x20c   : > { %v2165_v56 = vpop.f32.mrb[140].mxu0  ;;  %v2041_v11 = vadd.f32 %v1994_v0, %v4184_v7  ;;  %v3133_v38 = vpop.f32.mrb[141].mxu1 }
 0x20d   : > { %v2443_v29 = vadd.f32 %v2442_v40, %v2426_v8  ;;  %v2403_v10 = vadd.f32 %v2402_v62, %v2386_v42  ;;  %v2427_v18 = vmul.f32 %v2386_v42, %v2242_v39  ;;  %v2218_v46 = vadd.f32 %v2165_v56, %v2039_v2  ;;  %v3167_v43 = vpop.f32.mrb[141].mxu0  ;;  %v1997_v35 = vpop.f32.mrb[142].mxu1 }
 0x20e   : > { %v2168_v48 = vpop.f32.mrb[142].mxu0  ;;  %v2042_v50 = vadd.f32 %v1997_v35, %v4187_v59  ;;  %v3134_v24 = vpop.f32.mrb[143].mxu1 }
 0x20f   : > { %v2444_v14 = vadd.f32 %v2443_v29, %v2427_v18  ;;  %v2243_v21 = vadd.f32 %v4219_v19, %v2218_v46  ;;  %v2219_v49 = vadd.f32 %v2168_v48, %v2040_v63  ;;  %v3168_v36 = vpop.f32.mrb[143].mxu0  ;;  %v2344_v43 = vpop.permute.xlu0 %2343 }
 0x210   : > { %v2349_v38 = vpop.permute.xlu1 %2348 }
 0x211   : > { %2261 = vst [vmem:[%s4224_s26 + $0x30] sm:$0xff] %v2243_v21  ;;  %v2387_v15 = vmul.f32 %v2324_v28, %v2243_v21  ;;  %v2244_v44 = vadd.f32 %v4219_v19, %v2219_v49 }
 0x213   : > { %v2404_v60 = vadd.f32 %v2403_v10, %v2387_v15  ;;  %v2428_v26 = vmul.f32 %v2387_v15, %v2243_v21  ;;  %2262 = vst [vmem:[%s4224_s26 + $0x38] sm:$0xff] %v2244_v44  ;;  %v2388_v3 = vmul.f32 %v2329_v45, %v2244_v44  ;;  %v2002_v17 = vpop.f32.mrb[144].mxu1 }
 0x214   : > { %v2173_v7 = vpop.f32.mrb[144].mxu0  ;;  %v2043_v59 = vadd.f32 %v2002_v17, %v4190_v6  ;;  %v3137_v52 = vpop.f32.mrb[145].mxu1 }
 0x215   : > { %v2445_v53 = vadd.f32 %v2444_v14, %v2428_v26  ;;  %v2405_v9 = vadd.f32 %v2404_v60, %v2388_v3  ;;  %v2429_v58 = vmul.f32 %v2388_v3, %v2244_v44  ;;  %v2220_v47 = vadd.f32 %v2173_v7, %v2041_v11  ;;  %v3171_v54 = vpop.f32.mrb[145].mxu0  ;;  %v2005_v40 = vpop.f32.mrb[146].mxu1 }
 0x216   : > { %v2176_v13 = vpop.f32.mrb[146].mxu0  ;;  %v2044_v20 = vadd.f32 %v2005_v40, %v4193_v41  ;;  %v3138_v30 = vpop.f32.mrb[147].mxu1 }
 0x217   : > { %v2446_v4 = vadd.f32 %v2445_v53, %v2429_v58  ;;  %v2245_v57 = vadd.f32 %v4219_v19, %v2220_v47  ;;  %v2221_v16 = vadd.f32 %v2176_v13, %v2042_v50  ;;  %v3172_v1 = vpop.f32.mrb[147].mxu0  ;;  %v2354_v58 = vpop.permute.xlu0 %2353 }
 0x219   : > { %2263 = vst [vmem:[%s4224_s26 + $0x40] sm:$0xff] %v2245_v57  ;;  %v2389_v2 = vmul.f32 %v2334_v23, %v2245_v57  ;;  %v2246_v61 = vadd.f32 %v4219_v19, %v2221_v16 }
 0x21b   : > { %v2406_v51 = vadd.f32 %v2405_v9, %v2389_v2  ;;  %v2430_v34 = vmul.f32 %v2389_v2, %v2245_v57  ;;  %2264 = vst [vmem:[%s4224_s26 + $0x48] sm:$0xff] %v2246_v61  ;;  %v2390_v31 = vmul.f32 %v2339_v27, %v2246_v61  ;;  %v2010_v8 = vpop.f32.mrb[148].mxu1 }
 0x21c   : > { %v2181_v6 = vpop.f32.mrb[148].mxu0  ;;  %v2045_v41 = vadd.f32 %v2010_v8, %v4196_v37  ;;  %v3141_v10 = vpop.f32.mrb[149].mxu1 }
 0x21d   : > { %v2447_v63 = vadd.f32 %v2446_v4, %v2430_v34  ;;  %v2407_v39 = vadd.f32 %v2406_v51, %v2390_v31  ;;  %v2431_v32 = vmul.f32 %v2390_v31, %v2246_v61  ;;  %v2222_v12 = vadd.f32 %v2181_v6, %v2043_v59  ;;  %v3175_v62 = vpop.f32.mrb[149].mxu0  ;;  %v2013_v0 = vpop.f32.mrb[150].mxu1 }
 0x21e   : > { %v2184_v42 = vpop.f32.mrb[150].mxu0  ;;  %v2046_v14 = vadd.f32 %v2013_v0, %v4199_v22  ;;  %v3142_v21 = vpop.f32.mrb[151].mxu1 }
 0x21f   : > { %v2448_v56 = vadd.f32 %v2447_v63, %v2431_v32  ;;  %v2247_v29 = vadd.f32 %v4219_v19, %v2222_v12  ;;  %v2223_v18 = vadd.f32 %v2184_v42, %v2044_v20  ;;  %v3176_v46 = vpop.f32.mrb[151].mxu0  ;;  %v2359_v59 = vpop.permute.xlu1 %2358 }
 0x220   : > { %v2364_v63 = vpop.permute.xlu0 %2363 }
 0x221   : > { %2265 = vst [vmem:[%s4224_s26 + $0x50] sm:$0xff] %v2247_v29  ;;  %v2391_v48 = vmul.f32 %v2344_v43, %v2247_v29  ;;  %v2248_v11 = vadd.f32 %v4219_v19, %v2223_v18 }
 0x223   : > { %v2408_v49 = vadd.f32 %v2407_v39, %v2391_v48  ;;  %v2432_v36 = vmul.f32 %v2391_v48, %v2247_v29  ;;  %2266 = vst [vmem:[%s4224_s26 + $0x58] sm:$0xff] %v2248_v11  ;;  %v2392_v28 = vmul.f32 %v2349_v38, %v2248_v11  ;;  %v2018_v45 = vpop.f32.mrb[152].mxu1  ;;  %v2369_v42 = vpop.permute.xlu1 %2368 }
 0x224   : > { %v2189_v37 = vpop.f32.mrb[152].mxu0  ;;  %v2047_v22 = vadd.f32 %v2018_v45, %v4202_v25  ;;  %v3145_v7 = vpop.f32.mrb[153].mxu1 }
 0x225   : > { %v2449_v35 = vadd.f32 %v2448_v56, %v2432_v36  ;;  %v2409_v15 = vadd.f32 %v2408_v49, %v2392_v28  ;;  %v2433_v50 = vmul.f32 %v2392_v28, %v2248_v11  ;;  %v2224_v44 = vadd.f32 %v2189_v37, %v2045_v41  ;;  %v3179_v24 = vpop.f32.mrb[153].mxu0  ;;  %v2021_v47 = vpop.f32.mrb[154].mxu1 }
 0x226   : > { %v2192_v60 = vpop.f32.mrb[154].mxu0  ;;  %v2048_v17 = vadd.f32 %v2021_v47, %v4205_v5  ;;  %v3146_v4 = vpop.f32.mrb[155].mxu1 }
 0x227   : > { %v2450_v26 = vadd.f32 %v2449_v35, %v2433_v50  ;;  %v2249_v3 = vadd.f32 %v4219_v19, %v2224_v44  ;;  %v2225_v53 = vadd.f32 %v2192_v60, %v2046_v14  ;;  %v3180_v9 = vpop.f32.mrb[155].mxu0  ;;  %v2374_v38 = vpop.permute.xlu0 %2373 }
 0x228   : > { %v2379_v28 = vpop.permute.xlu1 %2378 }
 0x229   : > { %2267 = vst [vmem:[%s4224_s26 + $0x60] sm:$0xff] %v2249_v3  ;;  %v2393_v54 = vmul.f32 %v2354_v58, %v2249_v3  ;;  %v2250_v13 = vadd.f32 %v4219_v19, %v2225_v53 }
 0x22b   : > { %v2410_v57 = vadd.f32 %v2409_v15, %v2393_v54  ;;  %v2434_v52 = vmul.f32 %v2393_v54, %v2249_v3  ;;  %2268 = vst [vmem:[%s4224_s26 + $0x68] sm:$0xff] %v2250_v13  ;;  %v2394_v16 = vmul.f32 %v2359_v59, %v2250_v13  ;;  %v2026_v61 = vpop.f32.mrb[156].mxu1 }
 0x22c   : > { %v2197_v25 = vpop.f32.mrb[156].mxu0  ;;  %v2049_v5 = vadd.f32 %v2026_v61, %v4210_v33  ;;  %v3149_v34 = vpop.f32.mrb[157].mxu1 }
 0x22d   : > { %v2451_v1 = vadd.f32 %v2450_v26, %v2434_v52  ;;  %v2411_v23 = vadd.f32 %v2410_v57, %v2394_v16  ;;  %v2435_v40 = vmul.f32 %v2394_v16, %v2250_v13  ;;  %v2226_v2 = vadd.f32 %v2197_v25, %v2047_v22  ;;  %v3183_v20 = vpop.f32.mrb[157].mxu0  ;;  %v2029_v39 = vpop.f32.mrb[158].mxu1 }
 0x22e   : > { %v2200_v30 = vpop.f32.mrb[158].mxu0  ;;  %v2050_v12 = vadd.f32 %v2029_v39, %v4213_v55  ;;  %v3150_v8 = vpop.f32.mrb[159].mxu1 }
 0x22f   : > { %v2452_v27 = vadd.f32 %v2451_v1, %v2435_v40  ;;  %v2251_v51 = vadd.f32 %v4219_v19, %v2226_v2  ;;  %v2227_v31 = vadd.f32 %v2200_v30, %v2048_v17  ;;  %v3184_v6 = vpop.f32.mrb[159].mxu0 }
 0x231   : > { %2269 = vst [vmem:[%s4224_s26 + $0x70] sm:$0xff] %v2251_v51  ;;  %v2395_v32 = vmul.f32 %v2364_v63, %v2251_v51  ;;  %v2252_v62 = vadd.f32 %v4219_v19, %v2227_v31 }
 0x233   : > { %v2412_v56 = vadd.f32 %v2411_v23, %v2395_v32  ;;  %v2436_v41 = vmul.f32 %v2395_v32, %v2251_v51  ;;  %2270 = vst [vmem:[%s4224_s26 + $0x78] sm:$0xff] %v2252_v62  ;;  %v2396_v33 = vmul.f32 %v2369_v42, %v2252_v62 }
 0x234   : > { %v2205_v29 = vpop.f32.mrb[160].mxu0 }
 0x235   : > { %v2453_v10 = vadd.f32 %v2452_v27, %v2436_v41  ;;  %v2413_v18 = vadd.f32 %v2412_v56, %v2396_v33  ;;  %v2437_v46 = vmul.f32 %v2396_v33, %v2252_v62  ;;  %v2228_v43 = vadd.f32 %v2205_v29, %v2049_v5  ;;  %v3187_v0 = vpop.f32.mrb[161].mxu0 }
 0x236   : > { %v2208_v48 = vpop.f32.mrb[162].mxu0 }
 0x237   : > { %v2454_v14 = vadd.f32 %v2453_v10, %v2437_v46  ;;  %v2253_v55 = vadd.f32 %v4219_v19, %v2228_v43  ;;  %v2229_v11 = vadd.f32 %v2208_v48, %v2050_v12  ;;  %v3188_v21 = vpop.f32.mrb[163].mxu0 }
 0x239   : > { %2271 = vst [vmem:[%s4224_s26 + $0x80] sm:$0xff] %v2253_v55  ;;  %v2397_v49 = vmul.f32 %v2374_v38, %v2253_v55  ;;  %v2254_v36 = vadd.f32 %v4219_v19, %v2229_v11 }
 0x23b   : > { %v2414_v37 = vadd.f32 %v2413_v18, %v2397_v49  ;;  %v2438_v35 = vmul.f32 %v2397_v49, %v2253_v55  ;;  %2272 = vst [vmem:[%s4224_s26 + $0x88] sm:$0xff] %v2254_v36  ;;  %v2398_v15 = vmul.f32 %v2379_v28, %v2254_v36 }
 0x23d   : > { %v2455_v50 = vadd.f32 %v2454_v14, %v2438_v35  ;;  %v2415_v44 = vadd.f32 %v2414_v37, %v2398_v15  ;;  %v2439_v24 = vmul.f32 %v2398_v15, %v2254_v36 }
 0x23f   : > { %v2416_v45 = vrot.slane %v2415_v44, 4  ;;  %v2456_v60 = vadd.f32 %v2455_v50, %v2439_v24 }
 0x241   : > { %v2417_v26 = vadd.f32 %v2416_v45, %v2415_v44  ;;  %v2457_v22 = vrot.slane %v2456_v60, 4 }
 0x243   : > { %v2418_v3 = vrot.slane %v2417_v26, 2  ;;  %v2458_v7 = vadd.f32 %v2457_v22, %v2456_v60 }
 0x245   : > { %v2419_v53 = vadd.f32 %v2418_v3, %v2417_v26  ;;  %v2459_v9 = vrot.slane %v2458_v7, 2 }
 0x247   : > { %v2420_v19 = vrot.slane %v2419_v53, 1  ;;  %v2460_v58 = vadd.f32 %v2459_v9, %v2458_v7 }
 0x249   : > { %v2461_v47 = vrot.slane %v2460_v58, 1  ;;  %v2421_v54 = vadd.f32 %v2420_v19, %v2419_v53 }
 0x24b   : > { %v2462_v17 = vadd.f32 %v2461_v47, %v2460_v58 }
 0x24d   : > { %v2464_v13 = vsel %vm2463_vm9, %v2421_v54, %v2462_v17 }
 0x24e   : > { %2465 = vst [vmem:[%s301_s7] sm:$0x3] %v2464_v13 }
 0x24f PF: > { %s16_s22 = sadd.s32 1, %s3314_s22   ;;  %s4304_s18 = smov %s3306_s20 }
 0x250   : > { %p13_p7 = scmp.ge.s32.totalorder %s16_s22, 6   ;;  %s4305_s19 = smov %s3310_s21 }
 0x251   : > { %s4306_s20 = smov %s4309_s23  ;;  %s4307_s21 = smov %s4313_s24 }
 0x252   :  { %15 = sbr.rel (!%p13_p7) target bundleno = 3 (0x3), region = 89 }

// kernel: stacked_conv_layers.6
= control target key start
LH: loop header
LB: loop body
LE: loop exit
PB: predicated region body
PF: predicated region fallthrough
CT: control target
= control target key end

     0   :  { %s3349_s18 = smov 0   ;;  %s3351_s19 = smov 0   ;;  %s4298_s0 = inlined_call_operand.vmem [shape: bf16[2,2,198,8], index: 0, kind: input, shape index: {}]   ;;  %s4299_s1 = inlined_call_operand.vmem [shape: bf16[9,8,128], index: 1, kind: input, shape index: {}]   ;;  %s4300_s2 = inlined_call_operand.vmem [shape: f32[1,128], index: 2, kind: input, shape index: {}]   ;;  %s4301_s3 = inlined_call_operand.vmem [shape: f32[2,144,1], index: 3, kind: input, shape index: {}]   ;;  %s4302_s4 = inlined_call_operand.vmem [shape: f32[2,2,144,128], index: 4, kind: output, shape index: {0}]   ;;  %s4303_s5 = inlined_call_operand.vmem [shape: f32[2,2,2,128], index: 5, kind: output, shape index: {1}]  }
   0x1   :  { %s3353_s20 = smov 0   ;;  %s3355_s21 = smov 0  }
   0x2   :  { %s3357_s22 = smov 0  }
   0x3 LB: > { %s25_s23 = sadd.s32 1, %s3306_s20  ;;  %s28_s24 = sadd.s32 1, %s3310_s21  ;;  %s3314_s22 = sphi %s3357_s22, %s16_s22   ;;  %s3310_s21 = sphi %s3355_s21, %s4307_s21   ;;  %s3306_s20 = sphi %s3353_s20, %s4306_s20   ;;  %s3302_s19 = sphi %s3351_s19, %s4305_s19   ;;  %s3298_s18 = sphi %s3349_s18, %s4304_s18  }
   0x4   : > { %p26_p0 = scmp.ge.s32.totalorder %s25_s23, 2  ;;  %p2624_p1 = scmp.ge.s32.totalorder %s3314_s22, 1 }
   0x5   : > { %p222_p2 = scmp.lt.s32.totalorder %s3314_s22, 5 }
   0x6   : > { %s4309_s23 = smov (%p26_p0, %s25_s23), 0  ;;  %s4311_s24 = smov (!%p26_p0, %s28_s24), %s3310_s21 }
   0x7   : > { %p223_p3 = pnand %p2624_p1, %p222_p2  ;;  %p30_p4 = scmp.ge.s32.totalorder %s4311_s24, 2 }
   0x8   : > { %v2630_v0 = vld [vmem:[%s4299_s1 + $0x4] sm:$0xf] (!%p223_p3)  ;;  %vm478_vm0 = vcmask (!%p223_p3), 1043456   ;;  %p271_p5 = scmp.lt.s32.totalorder (!%p223_p3), %s3302_s19, 1  ;;  %v3316_v1 = vmov (!%p223_p3), 0.0   ;;  %p273_p6 = scmp.lt.s32.totalorder (!%p223_p3), %s3298_s18, 1 }
   0x9   : > { %s4313_s24 = smov (%p30_p4, %s4311_s24), 0  ;;  %226 = sbr.rel (%p223_p3) target bundleno = 591 (0x24f), region = 36 }
   0xa   : > { %2847 = vmatprep.subr.bf16.mxu0 (!%p223_p3), %v3316_v1  ;;  %3189 = vmatprep.subr.bf16.mxu1 (!%p223_p3), %v3316_v1  ;;  %v480_v2 = vsel (!%p223_p3), %vm478_vm0, %v2630_v0, 0  ;;  %vm3317_vm1 = vmmov (!%p223_p3), 0   ;;  %vm373_vm2 = vsmask.f32 (!%p223_p3), 7424  ;;  %v2659_v12 = vld [vmem:[%s4299_s1 + $0x8] sm:$0xf] (!%p223_p3) }
   0xb   : > { %2848 = vmatpush3.bf16.msra.mxu0 (!%p223_p3), %v480_v2  ;;  %3190 = vmatpush3.bf16.msra.mxu1 (!%p223_p3), %v480_v2  ;;  %vm450_vm3 = vcmask (!%p223_p3), 64512   ;;  %v321_v20 = vld [vmem:[%s4299_s1] sm:$0xf] (!%p223_p3)  ;;  %v767_v26 = vsel (!%p223_p3), %vm478_vm0, %v2659_v12, 0  ;;  %vm719_vm4 = vcmask (!%p223_p3), 1046528   ;;  %vm1388_vm5 = vcmask (!%p223_p3), 1045504  }
   0xc   : > { %2849 = vmatprep.mubr.msk.bf16.mxu0 (!%p223_p3), %vm3317_vm1, %v3316_v1  ;;  %2869 = vmatprep.mubr.msk.bf16.mxu1 (!%p223_p3), %vm3317_vm1, %v3316_v1  ;;  %v606_v31 = vsel (!%p223_p3), %vm478_vm0, %v321_v20, 0  ;;  %v2670_v12 = vld [vmem:[%s4299_s1 + $0xc] sm:$0xf] (!%p223_p3)  ;;  %vm1139_vm6 = vsmask.f32 (!%p223_p3), 6400  ;;  %vm2057_vm8 = vcmask (!%p223_p3), 1044480  }
   0xd   : > { %2923 = vmatprep.subr.bf16.mxu0 (!%p223_p3), %v3316_v1  ;;  %2885 = vmatprep.subr.bf16.mxu1 (!%p223_p3), %v3316_v1  ;;  %vm1808_vm7 = vsmask.f32 (!%p223_p3), 5376  ;;  %vm2463_vm9 = vcmask (!%p223_p3), 1040384  }
  0x10   : > { %s4315_s19 = smov (!%p271_p5, %s3302_s19), 1  ;;  %s4317_s18 = smov (!%p273_p6, %s3298_s18), 1 }
  0x11   : > { %s3192_s27 = smul.u32 50, %s4315_s19 }
  0x12   : > { %s3191_s28 = smul.u32 25, %s4317_s18 }
  0x13   : > { %s3193_s7 = smul.u32 144, %s4317_s18 }
  0x14   : > { %s277_s29 = sadd.s32 %s3192_s27, %s3191_s28  ;;  %s3195_s12 = smul.u32 36, %s4315_s19 }
  0x15   : > { %s2625_s30 = sshll.u32 %s277_s29, 2  ;;  %s3858_s11 = scalar_lea.vmem %s4301_s3, %s3193_s7 }
  0x16   : > { %s3404_s8 = scalar_lea.vmem %s4298_s0, %s2625_s30  ;;  %s2628_s27 = sshll.u32 %s4315_s19, 1 }
  0x17   : > { %v303_v3 = vld [vmem:[%s3404_s8] sm:$0xf]  ;;  %v3408_v4 = vld [vmem:[%s3404_s8 + $0x4] sm:$0xf]  ;;  %v3414_v6 = vld [vmem:[%s3404_s8 + $0x8] sm:$0xff]   ;;  %s299_s28 = sadd.s32 %s2628_s27, %s4317_s18 }
  0x18   : > { %v3411_v5 = vcombine.low %v303_v3, %v3408_v4  ;;  %v382_v9 = vshll.u32 %v3414_v6, 16  ;;  %v3420_v10 = vld [vmem:[%s3404_s8 + $0x28] sm:$0xff]   ;;  %v3423_v11 = vld [vmem:[%s3404_s8 + $0x30] sm:$0xff]   ;;  %v3432_v14 = vld [vmem:[%s3404_s8 + $0x38] sm:$0xff]   ;;  %v386_v21 = vshrl.u32 %v3414_v6, 16  ;;  %s2629_s29 = sshll.u32 %s299_s28, 1 }
  0x19   : > { %v3429_v13 = vld [vmem:[%s3404_s8 + $0x10] sm:$0xff]   ;;  %v414_v17 = vshll.u32 %v3420_v10, 16  ;;  %v418_v18 = vshrl.u32 %v3420_v10, 16  ;;  %v422_v19 = vshll.u32 %v3423_v11, 16  ;;  %v426_v29 = vshrl.u32 %v3423_v11, 16  ;;  %v3452_v32 = vld [vmem:[%s3404_s8 + $0x18] sm:$0xff]   ;;  %s301_s7 = scalar_lea.vmem %s4303_s5, %s2629_s29 }
  0x1a   : > { %v375_v7 = vshrl.u32 %v3411_v5, 16  ;;  %v377_v8 = vshll.u32 %v3411_v5, 16  ;;  %v384_v16 = vrot.slane %v382_v9, 1  ;;  %v390_v24 = vshll.u32 %v3429_v13, 16  ;;  %v3462_v38 = vld [vmem:[%s3404_s8 + $0x40] sm:$0xff]  }
  0x1b   : > { %v3441_v23 = vrot.slane %v414_v17, 1  ;;  %v424_v25 = vrot.slane %v422_v19, 1  ;;  %v430_v30 = vshll.u32 %v3432_v14, 16  ;;  %v398_v39 = vshll.u32 %v3452_v32, 16  ;;  %v3474_v47 = vld [vmem:[%s3404_s8 + $0x20] sm:$0xff]  }
  0x1c   : > { %v379_v15 = vrot.slane %v377_v8, 1  ;;  %v388_v34 = vor.u32 %v386_v21, %v384_v16  ;;  %v392_v35 = vrot.slane %v390_v24, 1  ;;  %v394_v41 = vshrl.u32 %v3429_v13, 16  ;;  %v3250_v42 = vld [vmem:[%s3404_s8 + $0x48] ss:$0 sps:$4 sm:$0x11]  }
  0x1d   : > { %v420_v28 = vor.u32 %v418_v18, %v3441_v23  ;;  %v428_v36 = vor.u32 %v426_v29, %v424_v25  ;;  %v432_v37 = vrot.slane %v430_v30, 1  ;;  %v434_v44 = vshrl.u32 %v3432_v14, 16  ;;  %v713_v8 = vld [vmem:[%s3404_s8] sm:$0xe]  ;;  %v893_v21 = vld [vmem:[%s3404_s8 + $0xc] sm:$0xf] }
  0x1e   : > { %v380_v22 = vor.u32 %v379_v15, %v375_v7  ;;  %v393_v40 = vsel %vm373_vm2, %v388_v34, %v392_v35  ;;  %v438_v45 = vshll.u32 %v3462_v38, 16  ;;  %v400_v46 = vrot.slane %v398_v39, 1  ;;  %v3542_v24 = vld [vmem:[%s3404_s8 + $0x10] sm:$0xff]  }
  0x1f   : > { %v425_v33 = vsel %vm373_vm2, %v420_v28, %v424_v25  ;;  %v433_v43 = vsel %vm373_vm2, %v428_v36, %v432_v37  ;;  %v396_v48 = vor.u32 %v394_v41, %v392_v35  ;;  %v735_v49 = vrot.slane %v3462_v38, 1  ;;  %v3550_v28 = vld [vmem:[%s3404_s8 + $0x18] sm:$0xff]   ;;  %v3569_v35 = vld [vmem:[%s3404_s8 + $0x20] sm:$0xff]  }
  0x20   : > { %v385_v27 = vsel %vm373_vm2, %v380_v22, %v384_v16  ;;  %2870 = vmatmul.mubr.msk.bf16.vlgmr.msra.gmra.mrb[0].mxu1 %vm450_vm3, %v425_v33  ;;  %v737_v50 = vrot.slane %v3250_v42, 1  ;;  %v436_v51 = vor.u32 %v434_v44, %v432_v37  ;;  %v440_v52 = vrot.slane %v438_v45, 1  ;;  %v1382_v22 = vld [vmem:[%s3404_s8 + $0x8] sm:$0xc]  ;;  %v3601_v44 = vld [vmem:[%s3404_s8 + $0x30] sm:$0xff]  }
  0x21   : > { %2850 = vmatmul.mubr.msk.bf16.vlgmr.msra.gmra.mrb[0].mxu0 %vm450_vm3, %v385_v27  ;;  %2886 = vmatpush3.bf16.msra.mxu1 %v606_v31  ;;  %v401_v54 = vsel %vm373_vm2, %v396_v48, %v400_v46  ;;  %v402_v55 = vshrl.u32 %v3452_v32, 16  ;;  %v406_v56 = vshll.u32 %v3474_v47, 16  ;;  %v442_v58 = vshrl.u32 %v3462_v38, 16 }
  0x22   : > { %2924 = vmatpush3.bf16.msra.mxu0 %v767_v26  ;;  %2853 = vmatprep.mubr.msk.bf16.mxu0 %vm3317_vm1, %v3316_v1  ;;  %v3485_v53 = vsel %vm719_vm4, %v735_v49, %v737_v50  ;;  %v441_v57 = vsel %vm373_vm2, %v436_v51, %v440_v52  ;;  %v446_v59 = vshll.u32 %v3250_v42, 16  ;;  %v410_v2 = vshrl.u32 %v3474_v47, 16  ;;  %v892_v50 = vld [vmem:[%s3404_s8 + $0x8] sm:$0xe] }
  0x23   : > { %2999 = vmatprep.subr.bf16.mxu0 %v3316_v1  ;;  %2873 = vmatprep.mubr.msk.bf16.mxu1 %vm3317_vm1, %v3316_v1  ;;  %v404_v60 = vor.u32 %v402_v55, %v400_v46  ;;  %v408_v61 = vrot.slane %v406_v56, 1  ;;  %v444_v62 = vor.u32 %v442_v58, %v440_v52  ;;  %v2660_v15 = vcombine.low %v713_v8, %v3408_v4  ;;  %v2690_v4 = vld [vmem:[%s4299_s1 + $0x10] sm:$0xf] }
  0x24   : > { %2961 = vmatprep.subr.bf16.mxu1 %v3316_v1  ;;  %v448_v63 = vrot.slane %v446_v59, 1  ;;  %v1008_v16 = vsel %vm478_vm0, %v2670_v12, 0  ;;  %v721_v18 = vrot.slane %v3414_v6, 1  ;;  %v1257_v20 = vsel %vm478_vm0, %v2690_v4, 0 }
  0x25   : > { %v409_v0 = vsel %vm373_vm2, %v404_v60, %v408_v61  ;;  %v412_v7 = vor.u32 %v410_v2, %v408_v61  ;;  %v720_v17 = vrot.slane %v2660_v15, 1  ;;  %v2702_v25 = vcombine.low %v1382_v22, %v893_v21 }
  0x26   : > { %v449_v3 = vsel %vm373_vm2, %v444_v62, %v448_v63  ;;  %v1390_v27 = vrot.slane %v3542_v24, 2  ;;  %v1392_v30 = vrot.slane %v3550_v28, 2  ;;  %v727_v34 = vrot.slane %v3474_v47, 1 }
  0x27   : > { %v417_v9 = vsel %vm373_vm2, %v412_v7, %v3441_v23  ;;  %v722_v19 = vsel %vm719_vm4, %v720_v17, %v721_v18  ;;  %v1389_v26 = vrot.slane %v2702_v25, 2  ;;  %v729_v39 = vrot.slane %v3420_v10, 1  ;;  %v2712_v7 = vld [vmem:[%s4299_s1 + $0x18] sm:$0xf] }
  0x28   : > { %2874 = vmatmul.mubr.msk.bf16.gmra.mrb[4].mxu1 %vm450_vm3, %v433_v43  ;;  %v3562_v33 = vsel %vm1388_vm5, %v1390_v27, %v1392_v30  ;;  %v731_v43 = vrot.slane %v3423_v11, 1  ;;  %v1398_v45 = vrot.slane %v3601_v44, 2  ;;  %v733_v48 = vrot.slane %v3432_v14, 1 }
  0x29   : > { %2854 = vmatmul.mubr.msk.bf16.gmra.mrb[4].mxu0 %vm450_vm3, %v393_v40  ;;  %2877 = vmatprep.mubr.msk.bf16.mxu1 %vm3317_vm1, %v3316_v1  ;;  %v3553_v29 = vsel %vm1388_vm5, %v1389_v26, %v1390_v27  ;;  %v3585_v40 = vld [vmem:[%s3404_s8 + $0x28] sm:$0xff]   ;;  %v730_v41 = vsel %vm719_vm4, %v727_v34, %v729_v39  ;;  %v2671_v51 = vcombine.low %v892_v50, %v893_v21  ;;  %v1149_v55 = vshrl.u32 %v3542_v24, 16 }
  0x2a   : > { %2857 = vmatprep.mubr.msk.bf16.mxu0 %vm3317_vm1, %v3316_v1  ;;  %v732_v46 = vsel %vm719_vm4, %v729_v39, %v731_v43  ;;  %v1158_v2 = vshrl.u32 %v3550_v28, 16  ;;  %v1677_v15 = vsel %vm478_vm0, %v2712_v7, 0  ;;  %v1170_v4 = vshll.u32 %v3569_v35, 16  ;;  %v3742_v7 = vld [vmem:[%s3404_s8 + $0x50] ss:$0 sps:$4 sm:$0x33]  }
  0x2b   : > { %v1141_v52 = vshrl.u32 %v2671_v51, 16  ;;  %v961_v56 = vrot.slane %v2671_v51, 1  ;;  %v1151_v60 = vrot.slane %v1149_v55, 1  ;;  %v1179_v25 = vshll.u32 %v3585_v40, 16 }
  0x2c   : > { %v1172_v21 = vrot.slane %v1170_v4, 2  ;;  %v968_v26 = vrot.slane %v3585_v40, 1 }
  0x2d   : > { %v1143_v58 = vrot.slane %v1141_v52, 1 }
  0x30   : > { %2878 = vmatmul.mubr.msk.bf16.gmra.mrb[8].mxu1 %vm450_vm3, %v441_v57  ;;  %v2701_v57 = vld [vmem:[%s4299_s1 + $0x14] sm:$0xf] }
  0x31   : > { %2858 = vmatmul.mubr.msk.bf16.gmra.mrb[8].mxu0 %vm450_vm3, %v401_v54  ;;  %2881 = vmatprep.mubr.msk.bf16.mxu1 %vm3317_vm1, %v3316_v1  ;;  %v1144_v54 = vshll.u32 %v2671_v51, 16 }
  0x32   : > { %2861 = vmatprep.mubr.msk.bf16.mxu0 %vm3317_vm1, %v3316_v1 }
  0x33   : > { %v1146_v59 = vrot.slane %v1144_v54, 2  ;;  %v3715_v54 = vld [vmem:[%s3404_s8 + $0x40] sm:$0xff]  }
  0x35   : > { %v1147_v63 = vor.u32 %v1146_v59, %v1143_v58 }
  0x38   : > { %2882 = vmatmul.mubr.msk.bf16.gmra.mrb[12].mxu1 %vm450_vm3, %v449_v3  ;;  %v1161_v3 = vshll.u32 %v3550_v28, 16 }
  0x39   : > { %2862 = vmatmul.mubr.msk.bf16.gmra.mrb[12].mxu0 %vm450_vm3, %v409_v0  ;;  %2887 = vmatprep.mubr.msk.bf16.mxu1 %vm3317_vm1, %v3316_v1 }
  0x3a   : > { %2865 = vmatprep.mubr.msk.bf16.mxu0 %vm3317_vm1, %v3316_v1  ;;  %v1163_v12 = vrot.slane %v1161_v3, 2 }
  0x40   : > { %2888 = vmatmul.mubr.msk.bf16.vlgmr.msra.gmra.mrb[16].mxu1 %vm450_vm3, %v3411_v5  ;;  %v723_v5 = vrot.slane %v3429_v13, 1 }
  0x41   : > { %2866 = vmatmul.mubr.msk.bf16.gmra.mrb[16].mxu0 %vm450_vm3, %v417_v9  ;;  %2962 = vmatpush3.bf16.msra.mxu1 %v1008_v16  ;;  %v1160_v9 = vrot.slane %v1158_v2, 1 }
  0x42   : > { %2925 = vmatprep.mubr.msk.bf16.mxu0 %vm3317_vm1, %v3316_v1  ;;  %2891 = vmatprep.mubr.msk.bf16.mxu1 %vm3317_vm1, %v3316_v1  ;;  %v724_v23 = vsel %vm719_vm4, %v721_v18, %v723_v5  ;;  %v1167_v18 = vshrl.u32 %v3569_v35, 16 }
  0x43   : > { %3037 = vmatprep.subr.bf16.mxu1 %v3316_v1  ;;  %v1164_v17 = vor.u32 %v1163_v12, %v1160_v9  ;;  %v3261_v9 = vld [vmem:[%s3404_s8 + $0x50] ss:$0 sps:$4 sm:$0x11]  }
  0x48   : > { %2892 = vmatmul.mubr.msk.bf16.gmra.mrb[20].mxu1 %vm450_vm3, %v3414_v6  ;;  %v725_v6 = vrot.slane %v3452_v32, 1 }
  0x49   : > { %2926 = vmatmul.mubr.msk.bf16.vlgmr.msra.gmra.mrb[20].mxu0 %vm450_vm3, %v722_v19  ;;  %2895 = vmatprep.mubr.msk.bf16.mxu1 %vm3317_vm1, %v3316_v1  ;;  %v966_v19 = vrot.slane %v3569_v35, 1 }
  0x4a   : > { %3000 = vmatpush3.bf16.msra.mxu0 %v1257_v20  ;;  %2929 = vmatprep.mubr.msk.bf16.mxu0 %vm3317_vm1, %v3316_v1  ;;  %v726_v31 = vsel %vm719_vm4, %v723_v5, %v725_v6  ;;  %v728_v36 = vsel %vm719_vm4, %v725_v6, %v727_v34  ;;  %v1169_v5 = vrot.slane %v1167_v18, 1  ;;  %v1185_v34 = vshrl.u32 %v3601_v44, 16 }
  0x4b   : > { %3075 = vmatprep.subr.bf16.mxu0 %v3316_v1 }
  0x4c   : > { %v1187_v39 = vrot.slane %v1185_v34, 1  ;;  %v3791_v34 = vld [vmem:[%s3404_s8 + $0x20] sm:$0xff]  }
  0x50   : > { %2896 = vmatmul.mubr.msk.bf16.gmra.mrb[24].mxu1 %vm450_vm3, %v3429_v13  ;;  %v1394_v13 = vrot.slane %v3569_v35, 2  ;;  %v1188_v35 = vshll.u32 %v3601_v44, 16 }
  0x51   : > { %2930 = vmatmul.mubr.msk.bf16.gmra.mrb[24].mxu0 %vm450_vm3, %v724_v23  ;;  %2899 = vmatprep.mubr.msk.bf16.mxu1 %vm3317_vm1, %v3316_v1  ;;  %v1173_v23 = vor.u32 %v1172_v21, %v1169_v5  ;;  %v1561_v21 = vld [vmem:[%s3404_s8 + $0x10] sm:$0xc] }
  0x52   : > { %2933 = vmatprep.mubr.msk.bf16.mxu0 %vm3317_vm1, %v3316_v1  ;;  %v3578_v37 = vsel %vm1388_vm5, %v1392_v30, %v1394_v13  ;;  %v969_v30 = vsel %vm719_vm4, %v966_v19, %v968_v26 }
  0x53   : > { %v1174_v27 = vsel %vm1139_vm6, %v1164_v17, %v1173_v23 }
  0x58   : > { %2900 = vmatmul.mubr.msk.bf16.gmra.mrb[28].mxu1 %vm450_vm3, %v3452_v32  ;;  %v1396_v32 = vrot.slane %v3585_v40, 2 }
  0x59   : > { %2934 = vmatmul.mubr.msk.bf16.gmra.mrb[28].mxu0 %vm450_vm3, %v726_v31  ;;  %2903 = vmatprep.mubr.msk.bf16.mxu1 %vm3317_vm1, %v3316_v1 }
  0x5a   : > { %2937 = vmatprep.mubr.msk.bf16.mxu0 %vm3317_vm1, %v3316_v1  ;;  %v3594_v42 = vsel %vm1388_vm5, %v1394_v13, %v1396_v32  ;;  %v970_v13 = vrot.slane %v3601_v44, 1 }
  0x60   : > { %2904 = vmatmul.mubr.msk.bf16.gmra.mrb[32].mxu1 %vm450_vm3, %v3474_v47  ;;  %v3612_v47 = vsel %vm1388_vm5, %v1396_v32, %v1398_v45  ;;  %v971_v32 = vsel %vm719_vm4, %v968_v26, %v970_v13  ;;  %v3774_v26 = vld [vmem:[%s3404_s8 + $0x18] sm:$0xff]  }
  0x61   : > { %2938 = vmatmul.mubr.msk.bf16.gmra.mrb[32].mxu0 %vm450_vm3, %v728_v36  ;;  %2907 = vmatprep.mubr.msk.bf16.mxu1 %vm3317_vm1, %v3316_v1 }
  0x62   : > { %2941 = vmatprep.mubr.msk.bf16.mxu0 %vm3317_vm1, %v3316_v1 }
  0x68   : > { %2908 = vmatmul.mubr.msk.bf16.gmra.mrb[36].mxu1 %vm450_vm3, %v3420_v10  ;;  %v734_v10 = vsel %vm719_vm4, %v731_v43, %v733_v48 }
  0x69   : > { %2942 = vmatmul.mubr.msk.bf16.gmra.mrb[36].mxu0 %vm450_vm3, %v730_v41  ;;  %2911 = vmatprep.mubr.msk.bf16.mxu1 %vm3317_vm1, %v3316_v1  ;;  %v3701_v41 = vld [vmem:[%s3404_s8 + $0x38] sm:$0xff]  }
  0x6a   : > { %2945 = vmatprep.mubr.msk.bf16.mxu0 %vm3317_vm1, %v3316_v1 }
  0x70   : > { %2912 = vmatmul.mubr.msk.bf16.gmra.mrb[40].mxu1 %vm450_vm3, %v3423_v11  ;;  %v736_v11 = vsel %vm719_vm4, %v733_v48, %v735_v49  ;;  %v962_v49 = vrot.slane %v3542_v24, 1  ;;  %v1197_v48 = vshll.u32 %v3701_v41, 16 }
  0x71   : > { %2946 = vmatmul.mubr.msk.bf16.gmra.mrb[40].mxu0 %vm450_vm3, %v732_v46  ;;  %2915 = vmatprep.mubr.msk.bf16.mxu1 %vm3317_vm1, %v3316_v1  ;;  %v1194_v46 = vshrl.u32 %v3701_v41, 16 }
  0x72   : > { %2949 = vmatprep.mubr.msk.bf16.mxu0 %vm3317_vm1, %v3316_v1  ;;  %v963_v62 = vsel %vm719_vm4, %v961_v56, %v962_v49  ;;  %v1199_v51 = vrot.slane %v1197_v48, 2  ;;  %v1206_v56 = vshll.u32 %v3715_v54, 16 }
  0x74   : > { %v1208_v59 = vrot.slane %v1206_v56, 2 }
  0x78   : > { %2916 = vmatmul.mubr.msk.bf16.gmra.mrb[44].mxu1 %vm450_vm3, %v3432_v14  ;;  %v1152_v14 = vshll.u32 %v3542_v24, 16  ;;  %v1176_v24 = vshrl.u32 %v3585_v40, 16  ;;  %v1190_v40 = vrot.slane %v1188_v35, 2 }
  0x79   : > { %2950 = vmatmul.mubr.msk.bf16.gmra.mrb[44].mxu0 %vm450_vm3, %v734_v10  ;;  %2919 = vmatprep.mubr.msk.bf16.mxu1 %vm3317_vm1, %v3316_v1  ;;  %v972_v10 = vrot.slane %v3701_v41, 1 }
  0x7a   : > { %2953 = vmatprep.mubr.msk.bf16.mxu0 %vm3317_vm1, %v3316_v1  ;;  %v1154_v61 = vrot.slane %v1152_v14, 2  ;;  %v1178_v6 = vrot.slane %v1176_v24, 1  ;;  %v1191_v43 = vor.u32 %v1190_v40, %v1187_v39  ;;  %v1203_v14 = vshrl.u32 %v3715_v54, 16  ;;  %v2732_v24 = vld [vmem:[%s4299_s1 + $0x1c] sm:$0xf]  ;;  %v3816_v40 = vld [vmem:[%s3404_s8 + $0x30] sm:$0xff]  }
  0x7b   : > { %v973_v52 = vsel %vm719_vm4, %v970_v13, %v972_v10 }
  0x7c   : > { %v1155_v0 = vor.u32 %v1154_v61, %v1151_v60  ;;  %v1205_v58 = vrot.slane %v1203_v14, 1  ;;  %v3729_v61 = vld [vmem:[%s3404_s8 + $0x48] sm:$0xff]  }
  0x7e   : > { %v1156_v8 = vsel %vm1139_vm6, %v1147_v63, %v1155_v0  ;;  %v1165_v20 = vsel %vm1139_vm6, %v1155_v0, %v1164_v17  ;;  %v1215_v63 = vshll.u32 %v3729_v61, 16  ;;  %v976_v0 = vrot.slane %v3729_v61, 1 }
  0x7f   : > { %v978_v17 = vrot.slane %v3261_v9, 1 }
  0x80   : > { %2920 = vmatmul.mubr.msk.bf16.gmra.mrb[48].mxu1 %vm450_vm3, %v3462_v38  ;;  %v1436_v38 = vsel %vm478_vm0, %v2701_v57, 0 }
  0x81   : > { %2954 = vmatmul.mubr.msk.bf16.gmra.mrb[48].mxu0 %vm450_vm3, %v736_v11  ;;  %2963 = vmatprep.mubr.msk.bf16.mxu1 %vm3317_vm1, %v3316_v1  ;;  %v1196_v11 = vrot.slane %v1194_v46, 1 }
  0x82   : > { %2957 = vmatprep.mubr.msk.bf16.mxu0 %vm3317_vm1, %v3316_v1 }
  0x83   : > { %v1200_v55 = vor.u32 %v1199_v51, %v1196_v11 }
  0x85   : > { %v1201_v57 = vsel %vm1139_vm6, %v1191_v43, %v1200_v55 }
  0x88   : > { %2964 = vmatmul.mubr.msk.bf16.vlgmr.msra.gmra.mrb[52].mxu1 %vm450_vm3, %v963_v62  ;;  %v1209_v62 = vor.u32 %v1208_v59, %v1205_v58  ;;  %v2275_v58 = vld [vmem:[%s3858_s11 + $0x10] sm:$0xff] }
  0x89   : > { %2958 = vmatmul.mubr.msk.bf16.gmra.mrb[52].mxu0 %vm450_vm3, %v3485_v53  ;;  %3038 = vmatpush3.bf16.msra.mxu1 %v1436_v38  ;;  %v964_v53 = vrot.slane %v3550_v28, 1  ;;  %v1181_v28 = vrot.slane %v1179_v25, 2  ;;  %v1212_v38 = vshrl.u32 %v3729_v61, 16 }
  0x8a   : > { %3001 = vmatprep.mubr.msk.bf16.mxu0 %vm3317_vm1, %v3316_v1  ;;  %2967 = vmatprep.mubr.msk.bf16.mxu1 %vm3317_vm1, %v3316_v1  ;;  %v1210_v2 = vsel %vm1139_vm6, %v1200_v55, %v1209_v62 }
  0x8b   : > { %3113 = vmatprep.subr.bf16.mxu1 %v3316_v1  ;;  %v965_v16 = vsel %vm719_vm4, %v962_v49, %v964_v53  ;;  %v967_v22 = vsel %vm719_vm4, %v964_v53, %v966_v19  ;;  %v1182_v31 = vor.u32 %v1181_v28, %v1178_v6  ;;  %v974_v49 = vrot.slane %v3715_v54, 1 }
  0x8c   : > { %v1214_v3 = vrot.slane %v1212_v38, 1  ;;  %v1217_v53 = vrot.slane %v1215_v63, 2  ;;  %v1631_v28 = vrot.slane %v3774_v26, 2 }
  0x8d   : > { %v1183_v36 = vsel %vm1139_vm6, %v1173_v23, %v1182_v31  ;;  %v1192_v50 = vsel %vm1139_vm6, %v1182_v31, %v1191_v43  ;;  %v975_v60 = vsel %vm719_vm4, %v972_v10, %v974_v49  ;;  %v3828_v43 = vld [vmem:[%s3404_s8 + $0x38] sm:$0xff]  }
  0x8e   : > { %v1218_v12 = vor.u32 %v1217_v53, %v1214_v3  ;;  %v1639_v46 = vrot.slane %v3828_v43, 2 }
  0x90   : > { %2968 = vmatmul.mubr.msk.bf16.gmra.mrb[56].mxu1 %vm450_vm3, %v965_v16  ;;  %v1224_v16 = vshll.u32 %v3742_v7, 16  ;;  %v1219_v18 = vsel %vm1139_vm6, %v1209_v62, %v1218_v12 }
  0x91   : > { %3002 = vmatmul.mubr.msk.bf16.vlgmr.msra.gmra.mrb[56].mxu0 %vm450_vm3, %v1156_v8  ;;  %2971 = vmatprep.mubr.msk.bf16.mxu1 %vm3317_vm1, %v3316_v1  ;;  %v977_v8 = vsel %vm719_vm4, %v974_v49, %v976_v0  ;;  %v3318_v49 = vmov 0  }
  0x92   : > { %3076 = vmatpush3.bf16.msra.mxu0 %v1677_v15  ;;  %3005 = vmatprep.mubr.msk.bf16.mxu0 %vm3317_vm1, %v3316_v1  ;;  %v1221_v15 = vshrl.u32 %v3742_v7, 16  ;;  %v1226_v19 = vrot.slane %v1224_v16, 2 }
  0x93   : > { %3151 = vmatprep.subr.bf16.mxu0 %v3316_v1  ;;  %3239 = vset.pattern.permute.xlu0 %v3318_v49 }
  0x94   : > { %v1223_v4 = vrot.slane %v1221_v15, 1  ;;  %3240 = vset.pattern.permute.xlu1 %v3318_v49  ;;  %v2277_v15 = vld [vmem:[%s3858_s11 + $0x20] sm:$0xff] }
  0x95   : > { %2303 = vperm.xlu1 %3240, %v2275_v58  }
  0x96   : > { %v1227_v5 = vor.u32 %v1226_v19, %v1223_v4  ;;  %v1404_v4 = vrot.slane %v3729_v61, 2  ;;  %v2279_v19 = vld [vmem:[%s3858_s11 + $0x30] sm:$0xff] }
  0x98   : > { %2972 = vmatmul.mubr.msk.bf16.gmra.mrb[60].mxu1 %vm450_vm3, %v967_v22  ;;  %v3762_v22 = vld [vmem:[%s3404_s8 + $0x14] sm:$0xf]  ;;  %v1228_v23 = vsel %vm1139_vm6, %v1218_v12, %v1227_v5  ;;  %v2276_v12 = vld [vmem:[%s3858_s11 + $0x18] sm:$0xff] }
  0x99   : > { %3006 = vmatmul.mubr.msk.bf16.gmra.mrb[60].mxu0 %vm450_vm3, %v1165_v20  ;;  %2975 = vmatprep.mubr.msk.bf16.mxu1 %vm3317_vm1, %v3316_v1  ;;  %v979_v20 = vsel %vm719_vm4, %v976_v0, %v978_v17  ;;  %v3771_v25 = vcombine.low %v1561_v21, %v3762_v22  ;;  %v2278_v17 = vld [vmem:[%s3858_s11 + $0x28] sm:$0xff] }
  0x9a   : > { %3009 = vmatprep.mubr.msk.bf16.mxu0 %vm3317_vm1, %v3316_v1  ;;  %2308 = vperm.xlu1 %3240, %v2276_v12  }
  0x9b   : > { %v1630_v6 = vrot.slane %v3771_v25, 2 }
  0x9d   : > { %v1632_v31 = vsel %vm1388_vm5, %v1630_v6, %v1631_v28 }
  0x9e   : > { %2318 = vperm.xlu1 %3240, %v2278_v17   ;;  %v1827_v17 = vshrl.u32 %v3791_v34, 16 }
  0xa0   : > { %2976 = vmatmul.mubr.msk.bf16.gmra.mrb[64].mxu1 %vm450_vm3, %v969_v30  ;;  %v2743_v30 = vld [vmem:[%s4299_s1 + $0x20] sm:$0xf] }
  0xa1   : > { %3010 = vmatmul.mubr.msk.bf16.gmra.mrb[64].mxu0 %vm450_vm3, %v1174_v27  ;;  %2979 = vmatprep.mubr.msk.bf16.mxu1 %vm3317_vm1, %v3316_v1  ;;  %v1926_v27 = vsel %vm478_vm0, %v2732_v24, 0  ;;  %v2105_v35 = vsel %vm478_vm0, %v2743_v30, 0  ;;  %v3904_v24 = vld [vmem:[%s3404_s8 + $0x50] sm:$0xff]  }
  0xa2   : > { %3013 = vmatprep.mubr.msk.bf16.mxu0 %vm3317_vm1, %v3316_v1 }
  0xa8   : > { %2980 = vmatmul.mubr.msk.bf16.gmra.mrb[68].mxu1 %vm450_vm3, %v971_v32  ;;  %v1637_v32 = vrot.slane %v3816_v40, 2 }
  0xa9   : > { %3014 = vmatmul.mubr.msk.bf16.gmra.mrb[68].mxu0 %vm450_vm3, %v1183_v36  ;;  %2983 = vmatprep.mubr.msk.bf16.mxu1 %vm3317_vm1, %v3316_v1  ;;  %v3804_v36 = vld [vmem:[%s3404_s8 + $0x28] sm:$0xff]  }
  0xaa   : > { %3017 = vmatprep.mubr.msk.bf16.mxu0 %vm3317_vm1, %v3316_v1  ;;  %v1635_v39 = vrot.slane %v3804_v36, 2  ;;  %v1640_v51 = vsel %vm1388_vm5, %v1637_v32, %v1639_v46 }
  0xb0   : > { %2984 = vmatmul.mubr.msk.bf16.gmra.mrb[72].mxu1 %vm450_vm3, %v973_v52  ;;  %v3847_v52 = vld [vmem:[%s3404_s8 + $0x40] sm:$0xff]  }
  0xb1   : > { %3018 = vmatmul.mubr.msk.bf16.gmra.mrb[72].mxu0 %vm450_vm3, %v1192_v50  ;;  %2987 = vmatprep.mubr.msk.bf16.mxu1 %vm3317_vm1, %v3316_v1  ;;  %v1641_v44 = vrot.slane %v3847_v52, 2 }
  0xb2   : > { %3021 = vmatprep.mubr.msk.bf16.mxu0 %vm3317_vm1, %v3316_v1 }
  0xb3   : > { %v1642_v0 = vsel %vm1388_vm5, %v1639_v46, %v1641_v44  ;;  %v1818_v46 = vshrl.u32 %v3774_v26, 16 }
  0xb8   : > { %2988 = vmatmul.mubr.msk.bf16.gmra.mrb[76].mxu1 %vm450_vm3, %v975_v60  ;;  %v1402_v60 = vrot.slane %v3715_v54, 2 }
  0xb9   : > { %3022 = vmatmul.mubr.msk.bf16.gmra.mrb[76].mxu0 %vm450_vm3, %v1201_v57  ;;  %2991 = vmatprep.mubr.msk.bf16.mxu1 %vm3317_vm1, %v3316_v1  ;;  %v2273_v57 = vld [vmem:[%s3858_s11] sm:$0xff] }
  0xba   : > { %3025 = vmatprep.mubr.msk.bf16.mxu0 %vm3317_vm1, %v3316_v1  ;;  %2293 = vperm.xlu0 %3239, %v2273_v57   ;;  %v1405_v61 = vsel %vm1388_vm5, %v1402_v60, %v1404_v4 }
  0xc0   : > { %2992 = vmatmul.mubr.msk.bf16.gmra.mrb[80].mxu1 %vm450_vm3, %v977_v8 }
  0xc1   : > { %3026 = vmatmul.mubr.msk.bf16.gmra.mrb[80].mxu0 %vm450_vm3, %v1210_v2  ;;  %2995 = vmatprep.mubr.msk.bf16.mxu1 %vm3317_vm1, %v3316_v1  ;;  %v3879_v2 = vld [vmem:[%s3404_s8 + $0x48] sm:$0xff]  }
  0xc2   : > { %3029 = vmatprep.mubr.msk.bf16.mxu0 %vm3317_vm1, %v3316_v1  ;;  %v1643_v16 = vrot.slane %v3879_v2, 2 }
  0xc8   : > { %2996 = vmatmul.mubr.msk.bf16.gmra.mrb[84].mxu1 %vm450_vm3, %v979_v20 }
  0xc9   : > { %3030 = vmatmul.mubr.msk.bf16.gmra.mrb[84].mxu0 %vm450_vm3, %v1219_v18  ;;  %3039 = vmatprep.mubr.msk.bf16.mxu1 %vm3317_vm1, %v3316_v1 }
  0xca   : > { %3033 = vmatprep.mubr.msk.bf16.mxu0 %vm3317_vm1, %v3316_v1 }
  0xd0   : > { %3040 = vmatmul.mubr.msk.bf16.vlgmr.msra.gmra.mrb[88].mxu1 %vm450_vm3, %v3553_v29  ;;  %v1633_v29 = vrot.slane %v3791_v34, 2 }
  0xd1   : > { %3034 = vmatmul.mubr.msk.bf16.gmra.mrb[88].mxu0 %vm450_vm3, %v1228_v23  ;;  %3114 = vmatpush3.bf16.msra.mxu1 %v1926_v27  ;;  %v1644_v23 = vsel %vm1388_vm5, %v1641_v44, %v1643_v16 }
  0xd2   : > { %3077 = vmatprep.mubr.msk.bf16.mxu0 %vm3317_vm1, %v3316_v1  ;;  %3043 = vmatprep.mubr.msk.bf16.mxu1 %vm3317_vm1, %v3316_v1  ;;  %v1634_v13 = vsel %vm1388_vm5, %v1631_v28, %v1633_v29 }
  0xd8   : > { %3044 = vmatmul.mubr.msk.bf16.gmra.mrb[92].mxu1 %vm450_vm3, %v3562_v33  ;;  %v1636_v33 = vsel %vm1388_vm5, %v1633_v29, %v1635_v39  ;;  %v1645_v29 = vrot.slane %v3904_v24, 2 }
  0xd9   : > { %3078 = vmatmul.mubr.msk.bf16.vlgmr.msra.gmra.mrb[92].mxu0 %vm450_vm3, %v1632_v31  ;;  %3047 = vmatprep.mubr.msk.bf16.mxu1 %vm3317_vm1, %v3316_v1  ;;  %v2280_v31 = vld [vmem:[%s3858_s11 + $0x38] sm:$0xff] }
  0xda   : > { %3152 = vmatpush3.bf16.msra.mxu0 %v2105_v35  ;;  %3081 = vmatprep.mubr.msk.bf16.mxu0 %vm3317_vm1, %v3316_v1  ;;  %v2281_v35 = vld [vmem:[%s3858_s11 + $0x40] sm:$0xff] }
  0xdb   : > { %2328 = vperm.xlu1 %3240, %v2280_v31  }
  0xe0   : > { %3048 = vmatmul.mubr.msk.bf16.gmra.mrb[96].mxu1 %vm450_vm3, %v3578_v37  ;;  %v1638_v37 = vsel %vm1388_vm5, %v1635_v39, %v1637_v32  ;;  %v2282_v39 = vld [vmem:[%s3858_s11 + $0x48] sm:$0xff]  ;;  %v1810_v32 = vshrl.u32 %v3771_v25, 16 }
  0xe1   : > { %3082 = vmatmul.mubr.msk.bf16.gmra.mrb[96].mxu0 %vm450_vm3, %v1634_v13  ;;  %3051 = vmatprep.mubr.msk.bf16.mxu1 %vm3317_vm1, %v3316_v1  ;;  %v1406_v13 = vrot.slane %v3742_v7, 2 }
  0xe2   : > { %3085 = vmatprep.mubr.msk.bf16.mxu0 %vm3317_vm1, %v3316_v1  ;;  %2338 = vperm.xlu1 %3240, %v2282_v39   ;;  %v1812_v58 = vrot.slane %v1810_v32, 2  ;;  %v1829_v32 = vrot.slane %v1827_v17, 2 }
  0xe8   : > { %3052 = vmatmul.mubr.msk.bf16.gmra.mrb[100].mxu1 %vm450_vm3, %v3594_v42  ;;  %v1400_v42 = vrot.slane %v3701_v41, 2 }
  0xe9   : > { %3086 = vmatmul.mubr.msk.bf16.gmra.mrb[100].mxu0 %vm450_vm3, %v1636_v33  ;;  %3055 = vmatprep.mubr.msk.bf16.mxu1 %vm3317_vm1, %v3316_v1 }
  0xea   : > { %3089 = vmatprep.mubr.msk.bf16.mxu0 %vm3317_vm1, %v3316_v1  ;;  %v1401_v56 = vsel %vm1388_vm5, %v1398_v45, %v1400_v42  ;;  %v2274_v45 = vld [vmem:[%s3858_s11 + $0x8] sm:$0xff]  ;;  %v1403_v9 = vsel %vm1388_vm5, %v1400_v42, %v1402_v60  ;;  %v1821_v42 = vshll.u32 %v3774_v26, 16 }
  0xeb   : > { %2298 = vperm.xlu0 %3239, %v2274_v45   ;;  %v1820_v45 = vrot.slane %v1818_v46, 2 }
  0xec   : > { %v1823_v60 = vrot.slane %v1821_v42, 3 }
  0xef   : > { %2313 = vperm.xlu0 %3239, %v2277_v15  }
  0xf0   : > { %3056 = vmatmul.mubr.msk.bf16.gmra.mrb[104].mxu1 %vm450_vm3, %v3612_v47 }
  0xf1   : > { %3090 = vmatmul.mubr.msk.bf16.gmra.mrb[104].mxu0 %vm450_vm3, %v1638_v37  ;;  %3059 = vmatprep.mubr.msk.bf16.mxu1 %vm3317_vm1, %v3316_v1  ;;  %v1813_v37 = vshll.u32 %v3771_v25, 16  ;;  %v1407_v25 = vsel %vm1388_vm5, %v1404_v4, %v1406_v13  ;;  %v1830_v4 = vshll.u32 %v3791_v34, 16 }
  0xf2   : > { %3093 = vmatprep.mubr.msk.bf16.mxu0 %vm3317_vm1, %v3316_v1 }
  0xf3   : > { %v3843_v11 = vpop.f32.mrb[0].mxu1  ;;  %2323 = vperm.xlu0 %3239, %v2279_v19   ;;  %v1815_v44 = vrot.slane %v1813_v37, 3  ;;  %v2287_v19 = vld [vmem:[%s3858_s11 + $0x70] sm:$0xff]  ;;  %v1832_v37 = vrot.slane %v1830_v4, 3  ;;  %v2061_v4 = vrot.slane %v3791_v34, 3 }
  0xf4   : > { %v3836_v48 = vpop.f32.mrb[0].mxu0  ;;  %v2871_v14 = vpop.f32.mrb[1].mxu1 }
  0xf5   : > { %v2851_v10 = vpop.f32.mrb[1].mxu0  ;;  %v3850_v47 = vpop.f32.mrb[2].mxu1  ;;  %v1646_v14 = vsel %vm1388_vm5, %v1643_v16, %v1645_v29  ;;  %v1816_v15 = vor.u32 %v1815_v44, %v1812_v58  ;;  %v1824_v16 = vor.u32 %v1823_v60, %v1820_v45 }
  0xf6   : > { %v3841_v50 = vpop.f32.mrb[2].mxu0  ;;  %v2872_v41 = vpop.f32.mrb[3].mxu1  ;;  %v2283_v10 = vld [vmem:[%s3858_s11 + $0x50] sm:$0xff] }
  0xf7   : > { %v2852_v55 = vpop.f32.mrb[3].mxu0  ;;  %2333 = vperm.xlu0 %3239, %v2281_v35   ;;  %v1825_v39 = vsel %vm1808_vm7, %v1816_v15, %v1824_v16 }
  0xf8   : > { %3060 = vmatmul.mubr.msk.bf16.gmra.mrb[108].mxu1 %vm450_vm3, %v1401_v56  ;;  %v3273_v56 = vld [vmem:[%s3404_s8 + $0x58] ss:$0 sps:$4 sm:$0x33]  }
  0xf9   : > { %3094 = vmatmul.mubr.msk.bf16.gmra.mrb[108].mxu0 %vm450_vm3, %v1640_v51  ;;  %3063 = vmatprep.mubr.msk.bf16.mxu1 %vm3317_vm1, %v3316_v1 }
  0xfa   : > { %3097 = vmatprep.mubr.msk.bf16.mxu0 %vm3317_vm1, %v3316_v1 }
  0xfb   : > { %v3875_v63 = vpop.f32.mrb[4].mxu1  ;;  %2343 = vperm.xlu0 %3239, %v2283_v10   ;;  %v2289_v10 = vld [vmem:[%s3858_s11 + $0x80] sm:$0xff] }
  0xfc   : > { %v3868_v59 = vpop.f32.mrb[4].mxu0  ;;  %v2875_v53 = vpop.f32.mrb[5].mxu1 }
  0xfd   : > { %v2855_v62 = vpop.f32.mrb[5].mxu0  ;;  %v3881_v8 = vpop.f32.mrb[6].mxu1  ;;  %v1647_v53 = vrot.slane %v3273_v56, 2  ;;  %v1836_v56 = vshrl.u32 %v3804_v36, 16 }
  0xfe   : > { %v3873_v38 = vpop.f32.mrb[6].mxu0  ;;  %v2876_v54 = vpop.f32.mrb[7].mxu1 }
  0xff   : > { %v2856_v3 = vpop.f32.mrb[7].mxu0  ;;  %v2286_v54 = vld [vmem:[%s3858_s11 + $0x68] sm:$0xff] }
 0x100   : > { %3064 = vmatmul.mubr.msk.bf16.gmra.mrb[112].mxu1 %vm450_vm3, %v1403_v9  ;;  %v2285_v3 = vld [vmem:[%s3858_s11 + $0x60] sm:$0xff]  ;;  %v2051_v9 = vld [vmem:[%s3404_s8 + $0x10] sm:$0x8] }
 0x101   : > { %3098 = vmatmul.mubr.msk.bf16.gmra.mrb[112].mxu0 %vm450_vm3, %v1642_v0  ;;  %3067 = vmatprep.mubr.msk.bf16.mxu1 %vm3317_vm1, %v3316_v1  ;;  %v2284_v0 = vld [vmem:[%s3858_s11 + $0x58] sm:$0xff] }
 0x102   : > { %3101 = vmatprep.mubr.msk.bf16.mxu0 %vm3317_vm1, %v3316_v1  ;;  %2348 = vperm.xlu1 %3240, %v2284_v0  }
 0x103   : > { %v3900_v21 = vpop.f32.mrb[8].mxu1  ;;  %2353 = vperm.xlu0 %3239, %v2285_v3  }
 0x104   : > { %v3892_v18 = vpop.f32.mrb[8].mxu0  ;;  %v2879_v6 = vpop.f32.mrb[9].mxu1 }
 0x105   : > { %v2859_v20 = vpop.f32.mrb[9].mxu0  ;;  %v3906_v28 = vpop.f32.mrb[10].mxu1  ;;  %v1648_v6 = vsel %vm1388_vm5, %v1645_v29, %v1647_v53  ;;  %v2288_v29 = vld [vmem:[%s3858_s11 + $0x78] sm:$0xff] }
 0x106   : > { %v3898_v5 = vpop.f32.mrb[10].mxu0  ;;  %v2880_v30 = vpop.f32.mrb[11].mxu1  ;;  %2358 = vperm.xlu1 %3240, %v2286_v54  }
 0x107   : > { %v2860_v27 = vpop.f32.mrb[11].mxu0  ;;  %2363 = vperm.xlu0 %3239, %v2287_v19  }
 0x108   : > { %3068 = vmatmul.mubr.msk.bf16.gmra.mrb[116].mxu1 %vm450_vm3, %v1405_v61  ;;  %v2744_v61 = vcombine.low %v2051_v9, %v3762_v22  ;;  %v1838_v9 = vrot.slane %v1836_v56, 2 }
 0x109   : > { %3102 = vmatmul.mubr.msk.bf16.gmra.mrb[116].mxu0 %vm450_vm3, %v1644_v23  ;;  %3071 = vmatprep.mubr.msk.bf16.mxu1 %vm3317_vm1, %v3316_v1 }
 0x10a   : > { %3105 = vmatprep.mubr.msk.bf16.mxu0 %vm3317_vm1, %v3316_v1  ;;  %v2058_v22 = vrot.slane %v2744_v61, 3  ;;  %2368 = vperm.xlu1 %3240, %v2288_v29  }
 0x10b   : > { %v3929_v7 = vpop.f32.mrb[12].mxu1  ;;  %2373 = vperm.xlu0 %3239, %v2289_v10   ;;  %v2063_v10 = vrot.slane %v3804_v36, 3 }
 0x10c   : > { %v3918_v33 = vpop.f32.mrb[12].mxu0  ;;  %v2883_v41 = vpop.f32.mrb[13].mxu1 }
 0x10d   : > { %v2863_v51 = vpop.f32.mrb[13].mxu0  ;;  %v3934_v57 = vpop.f32.mrb[14].mxu1 }
 0x10e   : > { %v3927_v55 = vpop.f32.mrb[14].mxu0  ;;  %v2884_v62 = vpop.f32.mrb[15].mxu1  ;;  %v2290_v51 = vld [vmem:[%s3858_s11 + $0x88] sm:$0xff] }
 0x10f   : > { %v2864_v49 = vpop.f32.mrb[15].mxu0  ;;  %2378 = vperm.xlu1 %3240, %v2290_v51   ;;  %v1857_v51 = vshll.u32 %v3828_v43, 16 }
 0x110   : > { %3072 = vmatmul.mubr.msk.bf16.gmra.mrb[120].mxu1 %vm450_vm3, %v1407_v25  ;;  %v1839_v49 = vshll.u32 %v3804_v36, 16 }
 0x111   : > { %3106 = vmatmul.mubr.msk.bf16.gmra.mrb[120].mxu0 %vm450_vm3, %v1646_v14  ;;  %3115 = vmatprep.mubr.msk.bf16.mxu1 %vm3317_vm1, %v3316_v1 }
 0x112   : > { %3109 = vmatprep.mubr.msk.bf16.mxu0 %vm3317_vm1, %v3316_v1  ;;  %v1841_v54 = vrot.slane %v1839_v49, 3  ;;  %v2064_v49 = vsel %vm2057_vm8, %v2061_v4, %v2063_v10 }
 0x113   : > { %v642_v23 = vpop.f32.mrb[16].mxu1 }
 0x114   : > { %v3944_v12 = vpop.f32.mrb[16].mxu0  ;;  %v643_v30 = vadd.f32 %v642_v23, %v3836_v48  ;;  %v2889_v31 = vpop.f32.mrb[17].mxu1  ;;  %v2059_v48 = vrot.slane %v3774_v26, 3  ;;  %v1842_v19 = vor.u32 %v1841_v54, %v1838_v9  ;;  %v2065_v9 = vrot.slane %v3816_v40, 3 }
 0x115   : > { %v2867_v20 = vpop.f32.mrb[17].mxu0  ;;  %v645_v13 = vpop.f32.mrb[18].mxu1 }
 0x116   : > { %v3951_v27 = vpop.f32.mrb[18].mxu0  ;;  %v646_v46 = vadd.f32 %v645_v13, %v3841_v50  ;;  %v2890_v42 = vpop.f32.mrb[19].mxu1  ;;  %v1833_v50 = vor.u32 %v1832_v37, %v1829_v32  ;;  %v2060_v44 = vsel %vm2057_vm8, %v2058_v22, %v2059_v48  ;;  %v1848_v20 = vshll.u32 %v3816_v40, 16 }
 0x117   : > { %v2868_v35 = vpop.f32.mrb[19].mxu0 }
 0x118   : > { %3116 = vmatmul.mubr.msk.bf16.vlgmr.msra.gmra.mrb[124].mxu1 %vm450_vm3, %v1825_v39  ;;  %v1834_v53 = vsel %vm1808_vm7, %v1824_v16, %v1833_v50  ;;  %v1845_v16 = vshrl.u32 %v3816_v40, 16  ;;  %v1843_v32 = vsel %vm1808_vm7, %v1833_v50, %v1842_v19 }
 0x119   : > { %3110 = vmatmul.mubr.msk.bf16.gmra.mrb[124].mxu0 %vm450_vm3, %v1648_v6  ;;  %3119 = vmatprep.mubr.msk.bf16.mxu1 %vm3317_vm1, %v3316_v1 }
 0x11a   : > { %3153 = vmatprep.mubr.msk.bf16.mxu0 %vm3317_vm1, %v3316_v1  ;;  %v1847_v37 = vrot.slane %v1845_v16, 2  ;;  %v2066_v16 = vsel %vm2057_vm8, %v2063_v10, %v2065_v9 }
 0x11b   : > { %v650_v58 = vpop.f32.mrb[20].mxu1 }
 0x11c   : > { %v803_v14 = vpop.f32.mrb[20].mxu0  ;;  %v651_v45 = vadd.f32 %v650_v58, %v3868_v59  ;;  %v2893_v60 = vpop.f32.mrb[21].mxu1 }
 0x11d   : > { %v3970_v41 = vadd.f32 %v803_v14, %v643_v30  ;;  %v2927_v25 = vpop.f32.mrb[21].mxu0  ;;  %v653_v3 = vpop.f32.mrb[22].mxu1  ;;  %v2062_v30 = vsel %vm2057_vm8, %v2059_v48, %v2061_v4  ;;  %v1854_v48 = vshrl.u32 %v3828_v43, 16 }
 0x11e   : > { %v806_v26 = vpop.f32.mrb[22].mxu0  ;;  %v654_v15 = vadd.f32 %v653_v3, %v3873_v38  ;;  %v2894_v17 = vpop.f32.mrb[23].mxu1 }
 0x11f   : > { %v3974_v62 = vadd.f32 %v806_v26, %v646_v46  ;;  %v2928_v0 = vpop.f32.mrb[23].mxu0  ;;  %v1850_v46 = vrot.slane %v1848_v20, 3  ;;  %v1856_v60 = vrot.slane %v1854_v48, 2  ;;  %v1866_v17 = vshll.u32 %v3847_v52, 16 }
 0x120   : > { %3120 = vmatmul.mubr.msk.bf16.gmra.mrb[128].mxu1 %vm450_vm3, %v1834_v53  ;;  %v1859_v0 = vrot.slane %v1857_v51, 3 }
 0x121   : > { %3154 = vmatmul.mubr.msk.bf16.vlgmr.msra.gmra.mrb[128].mxu0 %vm450_vm3, %v2060_v44  ;;  %3123 = vmatprep.mubr.msk.bf16.mxu1 %vm3317_vm1, %v3316_v1  ;;  %v1851_v22 = vor.u32 %v1850_v46, %v1847_v37  ;;  %v1872_v46 = vshrl.u32 %v3879_v2, 16 }
 0x122   : > { %3157 = vmatprep.mubr.msk.bf16.mxu0 %vm3317_vm1, %v3316_v1  ;;  %v1860_v54 = vor.u32 %v1859_v0, %v1856_v60  ;;  %v1881_v60 = vshrl.u32 %v3904_v24, 16 }
 0x123   : > { %v658_v6 = vpop.f32.mrb[24].mxu1 }
 0x124   : > { %v811_v59 = vpop.f32.mrb[24].mxu0  ;;  %v659_v34 = vadd.f32 %v658_v6, %v3892_v18  ;;  %v2897_v31 = vpop.f32.mrb[25].mxu1 }
 0x125   : > { %v3987_v38 = vadd.f32 %v811_v59, %v651_v45  ;;  %v2931_v23 = vpop.f32.mrb[25].mxu0  ;;  %v661_v39 = vpop.f32.mrb[26].mxu1  ;;  %v1852_v45 = vsel %vm1808_vm7, %v1842_v19, %v1851_v22  ;;  %v1868_v31 = vrot.slane %v1866_v17, 3 }
 0x126   : > { %v814_v61 = vpop.f32.mrb[26].mxu0  ;;  %v662_v42 = vadd.f32 %v661_v39, %v3898_v5  ;;  %v2898_v29 = vpop.f32.mrb[27].mxu1 }
 0x127   : > { %v3991_v35 = vadd.f32 %v814_v61, %v654_v15  ;;  %v2932_v13 = vpop.f32.mrb[27].mxu0  ;;  %v1863_v15 = vshrl.u32 %v3847_v52, 16 }
 0x128   : > { %3124 = vmatmul.mubr.msk.bf16.gmra.mrb[132].mxu1 %vm450_vm3, %v1843_v32  ;;  %v2067_v32 = vrot.slane %v3828_v43, 3 }
 0x129   : > { %3158 = vmatmul.mubr.msk.bf16.gmra.mrb[132].mxu0 %vm450_vm3, %v2062_v30  ;;  %3127 = vmatprep.mubr.msk.bf16.mxu1 %vm3317_vm1, %v3316_v1  ;;  %v1861_v30 = vsel %vm1808_vm7, %v1851_v22, %v1860_v54 }
 0x12a   : > { %3161 = vmatprep.mubr.msk.bf16.mxu0 %vm3317_vm1, %v3316_v1  ;;  %v2068_v22 = vsel %vm2057_vm8, %v2065_v9, %v2067_v32 }
 0x12b   : > { %v666_v50 = vpop.f32.mrb[28].mxu1 }
 0x12c   : > { %v819_v18 = vpop.f32.mrb[28].mxu0  ;;  %v667_v36 = vadd.f32 %v666_v50, %v3918_v33  ;;  %v2901_v25 = vpop.f32.mrb[29].mxu1 }
 0x12d   : > { %v4004_v5 = vadd.f32 %v819_v18, %v659_v34  ;;  %v2935_v14 = vpop.f32.mrb[29].mxu0  ;;  %v669_v44 = vpop.f32.mrb[30].mxu1  ;;  %v1865_v34 = vrot.slane %v1863_v15, 2 }
 0x12e   : > { %v822_v56 = vpop.f32.mrb[30].mxu0  ;;  %v670_v3 = vadd.f32 %v669_v44, %v3927_v55  ;;  %v2902_v53 = vpop.f32.mrb[31].mxu1  ;;  %v2069_v44 = vrot.slane %v3847_v52, 3 }
 0x12f   : > { %v4008_v58 = vadd.f32 %v822_v56, %v662_v42  ;;  %v2936_v26 = vpop.f32.mrb[31].mxu0  ;;  %v1869_v37 = vor.u32 %v1868_v31, %v1865_v34  ;;  %v1875_v42 = vshll.u32 %v3879_v2, 16 }
 0x130   : > { %3128 = vmatmul.mubr.msk.bf16.gmra.mrb[136].mxu1 %vm450_vm3, %v1852_v45 }
 0x131   : > { %3162 = vmatmul.mubr.msk.bf16.gmra.mrb[136].mxu0 %vm450_vm3, %v2064_v49  ;;  %3131 = vmatprep.mubr.msk.bf16.mxu1 %vm3317_vm1, %v3316_v1  ;;  %v1870_v56 = vsel %vm1808_vm7, %v1860_v54, %v1869_v37  ;;  %v1874_v49 = vrot.slane %v1872_v46, 2 }
 0x132   : > { %3165 = vmatprep.mubr.msk.bf16.mxu0 %vm3317_vm1, %v3316_v1 }
 0x133   : > { %v674_v59 = vpop.f32.mrb[32].mxu1 }
 0x134   : > { %v827_v33 = vpop.f32.mrb[32].mxu0  ;;  %v675_v40 = vadd.f32 %v674_v59, %v3944_v12  ;;  %v2905_v20 = vpop.f32.mrb[33].mxu1 }
 0x135   : > { %v4021_v55 = vadd.f32 %v827_v33, %v667_v36  ;;  %v2939_v4 = vpop.f32.mrb[33].mxu0  ;;  %v677_v61 = vpop.f32.mrb[34].mxu1  ;;  %v1877_v36 = vrot.slane %v1875_v42, 3  ;;  %v2070_v33 = vsel %vm2057_vm8, %v2067_v32, %v2069_v44 }
 0x136   : > { %v830_v19 = vpop.f32.mrb[34].mxu0  ;;  %v678_v13 = vadd.f32 %v677_v61, %v3951_v27  ;;  %v2906_v39 = vpop.f32.mrb[35].mxu1 }
 0x137   : > { %v4025_v23 = vadd.f32 %v830_v19, %v670_v3  ;;  %v2940_v6 = vpop.f32.mrb[35].mxu0  ;;  %v1878_v45 = vor.u32 %v1877_v36, %v1874_v49  ;;  %v1883_v19 = vrot.slane %v1881_v60, 2 }
 0x138   : > { %3132 = vmatmul.mubr.msk.bf16.gmra.mrb[140].mxu1 %vm450_vm3, %v1861_v30 }
 0x139   : > { %3166 = vmatmul.mubr.msk.bf16.gmra.mrb[140].mxu0 %vm450_vm3, %v2066_v16  ;;  %3135 = vmatprep.mubr.msk.bf16.mxu1 %vm3317_vm1, %v3316_v1  ;;  %v1879_v59 = vsel %vm1808_vm7, %v1869_v37, %v1878_v45 }
 0x13a   : > { %3169 = vmatprep.mubr.msk.bf16.mxu0 %vm3317_vm1, %v3316_v1 }
 0x13b   : > { %v682_v10 = vpop.f32.mrb[36].mxu1 }
 0x13c   : > { %v835_v12 = vpop.f32.mrb[36].mxu0  ;;  %v683_v43 = vadd.f32 %v682_v10, %v3843_v11  ;;  %v2909_v48 = vpop.f32.mrb[37].mxu1 }
 0x13d   : > { %v4038_v27 = vadd.f32 %v835_v12, %v675_v40  ;;  %v2943_v29 = vpop.f32.mrb[37].mxu0  ;;  %v685_v50 = vpop.f32.mrb[38].mxu1  ;;  %v3275_v40 = vld [vmem:[%s3404_s8 + $0x58] ss:$0 sps:$4 sm:$0x77]   ;;  %s3194_s8 = smul.u32 18, %s4317_s18 }
 0x13e   : > { %v838_v18 = vpop.f32.mrb[38].mxu0  ;;  %v686_v25 = vadd.f32 %v685_v50, %v3850_v47  ;;  %v2910_v26 = vpop.f32.mrb[39].mxu1  ;;  %v1884_v47 = vshll.u32 %v3904_v24, 16  ;;  %v1890_v34 = vshrl.u32 %v3275_v40, 16  ;;  %v1893_v31 = vshll.u32 %v3275_v40, 16 }
 0x13f   : > { %v4042_v51 = vadd.f32 %v838_v18, %v678_v13  ;;  %v2944_v14 = vpop.f32.mrb[39].mxu0  ;;  %s291_s13 = sadd.s32 %s3195_s12, %s3194_s8 }
 0x140   : > { %3136 = vmatmul.mubr.msk.bf16.gmra.mrb[144].mxu1 %vm450_vm3, %v1870_v56  ;;  %v1886_v16 = vrot.slane %v1884_v47, 3  ;;  %v1892_v18 = vrot.slane %v1890_v34, 2  ;;  %v2073_v14 = vrot.slane %v3904_v24, 3  ;;  %s2627_s14 = sshll.u32 %s291_s13, 3 }
 0x141   : > { %3170 = vmatmul.mubr.msk.bf16.gmra.mrb[144].mxu0 %vm450_vm3, %v2068_v22  ;;  %3139 = vmatprep.mubr.msk.bf16.mxu1 %vm3317_vm1, %v3316_v1  ;;  %v1895_v22 = vrot.slane %v1893_v31, 3  ;;  %s4224_s26 = scalar_lea.vmem %s4302_s4, %s2627_s14 }
 0x142   : > { %3173 = vmatprep.mubr.msk.bf16.mxu0 %vm3317_vm1, %v3316_v1  ;;  %v1887_v30 = vor.u32 %v1886_v16, %v1883_v19 }
 0x143   : > { %v690_v53 = vpop.f32.mrb[40].mxu1  ;;  %v1896_v50 = vor.u32 %v1895_v22, %v1892_v18 }
 0x144   : > { %v843_v11 = vpop.f32.mrb[40].mxu0  ;;  %v691_v52 = vadd.f32 %v690_v53, %v3875_v63  ;;  %v2913_v54 = vpop.f32.mrb[41].mxu1  ;;  %v2071_v63 = vrot.slane %v3879_v2, 3  ;;  %v1888_v10 = vsel %vm1808_vm7, %v1878_v45, %v1887_v30  ;;  %v2075_v53 = vrot.slane %v3275_v40, 3 }
 0x145   : > { %v4055_v0 = vadd.f32 %v843_v11, %v683_v43  ;;  %v2947_v3 = vpop.f32.mrb[41].mxu0  ;;  %v693_v4 = vpop.f32.mrb[42].mxu1  ;;  %v1897_v60 = vsel %vm1808_vm7, %v1887_v30, %v1896_v50 }
 0x146   : > { %v846_v9 = vpop.f32.mrb[42].mxu0  ;;  %v694_v20 = vadd.f32 %v693_v4, %v3881_v8  ;;  %v2914_v6 = vpop.f32.mrb[43].mxu1  ;;  %v2072_v12 = vsel %vm2057_vm8, %v2069_v44, %v2071_v63 }
 0x147   : > { %v4059_v15 = vadd.f32 %v846_v9, %v686_v25  ;;  %v2948_v17 = vpop.f32.mrb[43].mxu0  ;;  %v2074_v25 = vsel %vm2057_vm8, %v2071_v63, %v2073_v14 }
 0x148   : > { %3140 = vmatmul.mubr.msk.bf16.gmra.mrb[148].mxu1 %vm450_vm3, %v1879_v59  ;;  %v2076_v17 = vsel %vm2057_vm8, %v2073_v14, %v2075_v53 }
 0x149   : > { %3174 = vmatmul.mubr.msk.bf16.gmra.mrb[148].mxu0 %vm450_vm3, %v2070_v33  ;;  %3143 = vmatprep.mubr.msk.bf16.mxu1 %vm3317_vm1, %v3316_v1 }
 0x14a   : > { %3177 = vmatprep.mubr.msk.bf16.mxu0 %vm3317_vm1, %v3316_v1 }
 0x14b   : > { %v698_v39 = vpop.f32.mrb[44].mxu1 }
 0x14c   : > { %v851_v61 = vpop.f32.mrb[44].mxu0  ;;  %v699_v37 = vadd.f32 %v698_v39, %v3900_v21  ;;  %v2917_v46 = vpop.f32.mrb[45].mxu1 }
 0x14d   : > { %v4071_v13 = vadd.f32 %v851_v61, %v691_v52  ;;  %v2951_v8 = vpop.f32.mrb[45].mxu0  ;;  %v701_v29 = vpop.f32.mrb[46].mxu1 }
 0x14e   : > { %v854_v32 = vpop.f32.mrb[46].mxu0  ;;  %v702_v43 = vadd.f32 %v701_v29, %v3906_v28  ;;  %v2918_v48 = vpop.f32.mrb[47].mxu1 }
 0x14f   : > { %v4075_v2 = vadd.f32 %v854_v32, %v694_v20  ;;  %v2952_v42 = vpop.f32.mrb[47].mxu0 }
 0x150   : > { %3144 = vmatmul.mubr.msk.bf16.gmra.mrb[152].mxu1 %vm450_vm3, %v1888_v10 }
 0x151   : > { %3178 = vmatmul.mubr.msk.bf16.gmra.mrb[152].mxu0 %vm450_vm3, %v2072_v12  ;;  %3147 = vmatprep.mubr.msk.bf16.mxu1 %vm3317_vm1, %v3316_v1 }
 0x152   : > { %3181 = vmatprep.mubr.msk.bf16.mxu0 %vm3317_vm1, %v3316_v1 }
 0x153   : > { %v706_v36 = vpop.f32.mrb[48].mxu1 }
 0x154   : > { %v859_v21 = vpop.f32.mrb[48].mxu0  ;;  %v707_v26 = vadd.f32 %v706_v36, %v3929_v7  ;;  %v2921_v44 = vpop.f32.mrb[49].mxu1 }
 0x155   : > { %v4086_v56 = vadd.f32 %v859_v21, %v699_v37  ;;  %v2955_v49 = vpop.f32.mrb[49].mxu0  ;;  %v709_v45 = vpop.f32.mrb[50].mxu1 }
 0x156   : > { %v862_v28 = vpop.f32.mrb[50].mxu0  ;;  %v710_v47 = vadd.f32 %v709_v45, %v3934_v57  ;;  %v2922_v3 = vpop.f32.mrb[51].mxu1 }
 0x157   : > { %v4090_v11 = vadd.f32 %v862_v28, %v702_v43  ;;  %v2956_v24 = vpop.f32.mrb[51].mxu0 }
 0x158   : > { %3148 = vmatmul.mubr.msk.bf16.gmra.mrb[156].mxu1 %vm450_vm3, %v1897_v60 }
 0x159   : > { %3182 = vmatmul.mubr.msk.bf16.gmra.mrb[156].mxu0 %vm450_vm3, %v2074_v25 }
 0x15a   : > { %3185 = vmatprep.mubr.msk.bf16.mxu0 %vm3317_vm1, %v3316_v1 }
 0x15b   : > { %v1044_v52 = vpop.f32.mrb[52].mxu1 }
 0x15c   : > { %v867_v9 = vpop.f32.mrb[52].mxu0  ;;  %v1115_v4 = vadd.f32 %v1044_v52, %v3970_v41  ;;  %v2965_v57 = vpop.f32.mrb[53].mxu1 }
 0x15d   : > { %v4098_v7 = vadd.f32 %v867_v9, %v707_v26  ;;  %v2959_v33 = vpop.f32.mrb[53].mxu0  ;;  %v1047_v16 = vpop.f32.mrb[54].mxu1 }
 0x15e   : > { %v870_v54 = vpop.f32.mrb[54].mxu0  ;;  %v1116_v1 = vadd.f32 %v1047_v16, %v3974_v62  ;;  %v2966_v40 = vpop.f32.mrb[55].mxu1 }
 0x15f   : > { %v4102_v59 = vadd.f32 %v870_v54, %v710_v47  ;;  %v2960_v19 = vpop.f32.mrb[55].mxu0 }
 0x161   : > { %3186 = vmatmul.mubr.msk.bf16.gmra.mrb[160].mxu0 %vm450_vm3, %v2076_v17 }
 0x163   : > { %v1052_v61 = vpop.f32.mrb[56].mxu1 }
 0x164   : > { %v1293_v20 = vpop.f32.mrb[56].mxu0  ;;  %v1117_v34 = vadd.f32 %v1052_v61, %v3987_v38  ;;  %v2969_v31 = vpop.f32.mrb[57].mxu1 }
 0x165   : > { %v4106_v6 = vadd.f32 %v1293_v20, %v1115_v4  ;;  %v3003_v63 = vpop.f32.mrb[57].mxu0  ;;  %v1055_v39 = vpop.f32.mrb[58].mxu1 }
 0x166   : > { %v1296_v30 = vpop.f32.mrb[58].mxu0  ;;  %v1118_v32 = vadd.f32 %v1055_v39, %v3991_v35  ;;  %v2970_v12 = vpop.f32.mrb[59].mxu1 }
 0x167   : > { %v4109_v41 = vadd.f32 %v1296_v30, %v1116_v1  ;;  %v3004_v8 = vpop.f32.mrb[59].mxu0 }
 0x16b   : > { %v1060_v42 = vpop.f32.mrb[60].mxu1 }
 0x16c   : > { %v1301_v62 = vpop.f32.mrb[60].mxu0  ;;  %v1119_v10 = vadd.f32 %v1060_v42, %v4004_v5  ;;  %v2973_v18 = vpop.f32.mrb[61].mxu1 }
 0x16d   : > { %v4112_v37 = vadd.f32 %v1301_v62, %v1117_v34  ;;  %v3007_v46 = vpop.f32.mrb[61].mxu0  ;;  %v1063_v43 = vpop.f32.mrb[62].mxu1 }
 0x16e   : > { %v1304_v29 = vpop.f32.mrb[62].mxu0  ;;  %v1120_v48 = vadd.f32 %v1063_v43, %v4008_v58  ;;  %v2974_v14 = vpop.f32.mrb[63].mxu1 }
 0x16f   : > { %v4115_v22 = vadd.f32 %v1304_v29, %v1118_v32  ;;  %v3008_v38 = vpop.f32.mrb[63].mxu0 }
 0x173   : > { %v1068_v49 = vpop.f32.mrb[64].mxu1 }
 0x174   : > { %v1309_v21 = vpop.f32.mrb[64].mxu0  ;;  %v1121_v28 = vadd.f32 %v1068_v49, %v4021_v55  ;;  %v2977_v25 = vpop.f32.mrb[65].mxu1 }
 0x175   : > { %v4118_v50 = vadd.f32 %v1309_v21, %v1119_v10  ;;  %v3011_v35 = vpop.f32.mrb[65].mxu0  ;;  %v1071_v44 = vpop.f32.mrb[66].mxu1 }
 0x176   : > { %v1312_v36 = vpop.f32.mrb[66].mxu0  ;;  %v1122_v24 = vadd.f32 %v1071_v44, %v4025_v23  ;;  %v2978_v45 = vpop.f32.mrb[67].mxu1 }
 0x177   : > { %v4121_v26 = vadd.f32 %v1312_v36, %v1120_v48  ;;  %v3012_v5 = vpop.f32.mrb[67].mxu0 }
 0x17b   : > { %v1076_v3 = vpop.f32.mrb[68].mxu1 }
 0x17c   : > { %v1317_v60 = vpop.f32.mrb[68].mxu0  ;;  %v1123_v9 = vadd.f32 %v1076_v3, %v4038_v27  ;;  %v2981_v33 = vpop.f32.mrb[69].mxu1 }
 0x17d   : > { %v4124_v47 = vadd.f32 %v1317_v60, %v1121_v28  ;;  %v3015_v58 = vpop.f32.mrb[69].mxu0  ;;  %v1079_v54 = vpop.f32.mrb[70].mxu1 }
 0x17e   : > { %v1320_v53 = vpop.f32.mrb[70].mxu0  ;;  %v1124_v17 = vadd.f32 %v1079_v54, %v4042_v51  ;;  %v2982_v4 = vpop.f32.mrb[71].mxu1 }
 0x17f   : > { %v4127_v52 = vadd.f32 %v1320_v53, %v1122_v24  ;;  %v3016_v55 = vpop.f32.mrb[71].mxu0 }
 0x183   : > { %v1084_v16 = vpop.f32.mrb[72].mxu1 }
 0x184   : > { %v1325_v57 = vpop.f32.mrb[72].mxu0  ;;  %v1125_v40 = vadd.f32 %v1084_v16, %v4055_v0  ;;  %v2985_v20 = vpop.f32.mrb[73].mxu1 }
 0x185   : > { %v4130_v19 = vadd.f32 %v1325_v57, %v1123_v9  ;;  %v3019_v23 = vpop.f32.mrb[73].mxu0  ;;  %v1087_v61 = vpop.f32.mrb[74].mxu1 }
 0x186   : > { %v1328_v1 = vpop.f32.mrb[74].mxu0  ;;  %v1126_v30 = vadd.f32 %v1087_v61, %v4059_v15  ;;  %v2986_v34 = vpop.f32.mrb[75].mxu1 }
 0x187   : > { %v4133_v63 = vadd.f32 %v1328_v1, %v1124_v17  ;;  %v3020_v27 = vpop.f32.mrb[75].mxu0 }
 0x18b   : > { %v1092_v39 = vpop.f32.mrb[76].mxu1 }
 0x18c   : > { %v1333_v31 = vpop.f32.mrb[76].mxu0  ;;  %v1127_v12 = vadd.f32 %v1092_v39, %v4071_v13  ;;  %v2989_v62 = vpop.f32.mrb[77].mxu1 }
 0x18d   : > { %v4136_v8 = vadd.f32 %v1333_v31, %v1125_v40  ;;  %v3023_v51 = vpop.f32.mrb[77].mxu0  ;;  %v1095_v42 = vpop.f32.mrb[78].mxu1 }
 0x18e   : > { %v1336_v32 = vpop.f32.mrb[78].mxu0  ;;  %v1128_v29 = vadd.f32 %v1095_v42, %v4075_v2  ;;  %v2990_v10 = vpop.f32.mrb[79].mxu1 }
 0x18f   : > { %v4139_v46 = vadd.f32 %v1336_v32, %v1126_v30  ;;  %v3024_v0 = vpop.f32.mrb[79].mxu0 }
 0x193   : > { %v1100_v43 = vpop.f32.mrb[80].mxu1 }
 0x194   : > { %v1341_v18 = vpop.f32.mrb[80].mxu0  ;;  %v1129_v14 = vadd.f32 %v1100_v43, %v4086_v56  ;;  %v2993_v21 = vpop.f32.mrb[81].mxu1 }
 0x195   : > { %v4142_v38 = vadd.f32 %v1341_v18, %v1127_v12  ;;  %v3027_v15 = vpop.f32.mrb[81].mxu0  ;;  %v1103_v49 = vpop.f32.mrb[82].mxu1 }
 0x196   : > { %v1344_v48 = vpop.f32.mrb[82].mxu0  ;;  %v1130_v36 = vadd.f32 %v1103_v49, %v4090_v11  ;;  %v2994_v28 = vpop.f32.mrb[83].mxu1 }
 0x197   : > { %v4145_v35 = vadd.f32 %v1344_v48, %v1128_v29  ;;  %v3028_v13 = vpop.f32.mrb[83].mxu0 }
 0x19b   : > { %v1108_v44 = vpop.f32.mrb[84].mxu1 }
 0x19c   : > { %v1349_v25 = vpop.f32.mrb[84].mxu0  ;;  %v1131_v45 = vadd.f32 %v1108_v44, %v4098_v7  ;;  %v2997_v60 = vpop.f32.mrb[85].mxu1 }
 0x19d   : > { %v4148_v5 = vadd.f32 %v1349_v25, %v1129_v14  ;;  %v3031_v2 = vpop.f32.mrb[85].mxu0  ;;  %v1111_v3 = vpop.f32.mrb[86].mxu1 }
 0x19e   : > { %v1352_v24 = vpop.f32.mrb[86].mxu0  ;;  %v1132_v53 = vadd.f32 %v1111_v3, %v4102_v59  ;;  %v2998_v9 = vpop.f32.mrb[87].mxu1 }
 0x19f   : > { %v4151_v58 = vadd.f32 %v1352_v24, %v1130_v36  ;;  %v3032_v56 = vpop.f32.mrb[87].mxu0 }
 0x1a3   : > { %v1472_v54 = vpop.f32.mrb[88].mxu1 }
 0x1a4   : > { %v1357_v33 = vpop.f32.mrb[88].mxu0  ;;  %v1543_v4 = vadd.f32 %v1472_v54, %v4106_v6  ;;  %v3041_v57 = vpop.f32.mrb[89].mxu1 }
 0x1a5   : > { %v4154_v55 = vadd.f32 %v1357_v33, %v1131_v45  ;;  %v3035_v11 = vpop.f32.mrb[89].mxu0  ;;  %v1475_v16 = vpop.f32.mrb[90].mxu1 }
 0x1a6   : > { %v1360_v17 = vpop.f32.mrb[90].mxu0  ;;  %v1544_v1 = vadd.f32 %v1475_v16, %v4109_v41  ;;  %v3042_v40 = vpop.f32.mrb[91].mxu1 }
 0x1a7   : > { %v4157_v23 = vadd.f32 %v1360_v17, %v1132_v53  ;;  %v3036_v7 = vpop.f32.mrb[91].mxu0 }
 0x1ab   : > { %v1480_v61 = vpop.f32.mrb[92].mxu1 }
 0x1ac   : > { %v1713_v20 = vpop.f32.mrb[92].mxu0  ;;  %v1545_v34 = vadd.f32 %v1480_v61, %v4112_v37  ;;  %v3045_v31 = vpop.f32.mrb[93].mxu1 }
 0x1ad   : > { %v4160_v27 = vadd.f32 %v1713_v20, %v1543_v4  ;;  %v3079_v59 = vpop.f32.mrb[93].mxu0  ;;  %v1483_v39 = vpop.f32.mrb[94].mxu1 }
 0x1ae   : > { %v1716_v30 = vpop.f32.mrb[94].mxu0  ;;  %v1546_v32 = vadd.f32 %v1483_v39, %v4115_v22  ;;  %v3046_v12 = vpop.f32.mrb[95].mxu1 }
 0x1af   : > { %v4163_v51 = vadd.f32 %v1716_v30, %v1544_v1  ;;  %v3080_v6 = vpop.f32.mrb[95].mxu0 }
 0x1b3   : > { %v1488_v42 = vpop.f32.mrb[96].mxu1 }
 0x1b4   : > { %v1721_v62 = vpop.f32.mrb[96].mxu0  ;;  %v1547_v10 = vadd.f32 %v1488_v42, %v4118_v50  ;;  %v3049_v18 = vpop.f32.mrb[97].mxu1 }
 0x1b5   : > { %v4166_v0 = vadd.f32 %v1721_v62, %v1545_v34  ;;  %v3083_v41 = vpop.f32.mrb[97].mxu0  ;;  %v1491_v43 = vpop.f32.mrb[98].mxu1 }
 0x1b6   : > { %v1724_v29 = vpop.f32.mrb[98].mxu0  ;;  %v1548_v48 = vadd.f32 %v1491_v43, %v4121_v26  ;;  %v3050_v14 = vpop.f32.mrb[99].mxu1 }
 0x1b7   : > { %v4169_v15 = vadd.f32 %v1724_v29, %v1546_v32  ;;  %v3084_v37 = vpop.f32.mrb[99].mxu0 }
 0x1bb   : > { %v1496_v49 = vpop.f32.mrb[100].mxu1 }
 0x1bc   : > { %v1729_v21 = vpop.f32.mrb[100].mxu0  ;;  %v1549_v28 = vadd.f32 %v1496_v49, %v4124_v47  ;;  %v3053_v25 = vpop.f32.mrb[101].mxu1 }
 0x1bd   : > { %v4172_v13 = vadd.f32 %v1729_v21, %v1547_v10  ;;  %v3087_v22 = vpop.f32.mrb[101].mxu0  ;;  %v1499_v44 = vpop.f32.mrb[102].mxu1 }
 0x1be   : > { %v1732_v36 = vpop.f32.mrb[102].mxu0  ;;  %v1550_v24 = vadd.f32 %v1499_v44, %v4127_v52  ;;  %v3054_v45 = vpop.f32.mrb[103].mxu1 }
 0x1bf   : > { %v4175_v2 = vadd.f32 %v1732_v36, %v1548_v48  ;;  %v3088_v50 = vpop.f32.mrb[103].mxu0 }
 0x1c3   : > { %v1504_v3 = vpop.f32.mrb[104].mxu1 }
 0x1c4   : > { %v1737_v60 = vpop.f32.mrb[104].mxu0  ;;  %v1551_v9 = vadd.f32 %v1504_v3, %v4130_v19  ;;  %v3057_v33 = vpop.f32.mrb[105].mxu1 }
 0x1c5   : > { %v4178_v56 = vadd.f32 %v1737_v60, %v1549_v28  ;;  %v3091_v26 = vpop.f32.mrb[105].mxu0  ;;  %v1507_v54 = vpop.f32.mrb[106].mxu1 }
 0x1c6   : > { %v1740_v53 = vpop.f32.mrb[106].mxu0  ;;  %v1552_v17 = vadd.f32 %v1507_v54, %v4133_v63  ;;  %v3058_v4 = vpop.f32.mrb[107].mxu1 }
 0x1c7   : > { %v4181_v11 = vadd.f32 %v1740_v53, %v1550_v24  ;;  %v3092_v47 = vpop.f32.mrb[107].mxu0 }
 0x1cb   : > { %v1512_v16 = vpop.f32.mrb[108].mxu1 }
 0x1cc   : > { %v1745_v57 = vpop.f32.mrb[108].mxu0  ;;  %v1553_v40 = vadd.f32 %v1512_v16, %v4136_v8  ;;  %v3061_v20 = vpop.f32.mrb[109].mxu1 }
 0x1cd   : > { %v4184_v7 = vadd.f32 %v1745_v57, %v1551_v9  ;;  %v3095_v52 = vpop.f32.mrb[109].mxu0  ;;  %v1515_v61 = vpop.f32.mrb[110].mxu1 }
 0x1ce   : > { %v1748_v1 = vpop.f32.mrb[110].mxu0  ;;  %v1554_v30 = vadd.f32 %v1515_v61, %v4139_v46  ;;  %v3062_v34 = vpop.f32.mrb[111].mxu1 }
 0x1cf   : > { %v4187_v59 = vadd.f32 %v1748_v1, %v1552_v17  ;;  %v3096_v19 = vpop.f32.mrb[111].mxu0 }
 0x1d0   : > { %v4219_v19 = vld [vmem:[%s4300_s2] ss:$0 sm:$0xff] }
 0x1d3   : > { %v1520_v39 = vpop.f32.mrb[112].mxu1 }
 0x1d4   : > { %v1753_v31 = vpop.f32.mrb[112].mxu0  ;;  %v1555_v12 = vadd.f32 %v1520_v39, %v4142_v38  ;;  %v3065_v62 = vpop.f32.mrb[113].mxu1 }
 0x1d5   : > { %v4190_v6 = vadd.f32 %v1753_v31, %v1553_v40  ;;  %v3099_v63 = vpop.f32.mrb[113].mxu0  ;;  %v1523_v42 = vpop.f32.mrb[114].mxu1 }
 0x1d6   : > { %v1756_v32 = vpop.f32.mrb[114].mxu0  ;;  %v1556_v29 = vadd.f32 %v1523_v42, %v4145_v35  ;;  %v3066_v10 = vpop.f32.mrb[115].mxu1 }
 0x1d7   : > { %v4193_v41 = vadd.f32 %v1756_v32, %v1554_v30  ;;  %v3100_v8 = vpop.f32.mrb[115].mxu0  ;;  %v2294_v40 = vpop.permute.xlu0 %2293 }
 0x1db   : > { %v1528_v43 = vpop.f32.mrb[116].mxu1  ;;  %v2299_v62 = vpop.permute.xlu0 %2298 }
 0x1dc   : > { %v1761_v18 = vpop.f32.mrb[116].mxu0  ;;  %v1557_v14 = vadd.f32 %v1528_v43, %v4148_v5  ;;  %v3069_v21 = vpop.f32.mrb[117].mxu1 }
 0x1dd   : > { %v4196_v37 = vadd.f32 %v1761_v18, %v1555_v12  ;;  %v3103_v46 = vpop.f32.mrb[117].mxu0  ;;  %v1531_v49 = vpop.f32.mrb[118].mxu1 }
 0x1de   : > { %v1764_v48 = vpop.f32.mrb[118].mxu0  ;;  %v1558_v36 = vadd.f32 %v1531_v49, %v4151_v58  ;;  %v3070_v28 = vpop.f32.mrb[119].mxu1 }
 0x1df   : > { %v4199_v22 = vadd.f32 %v1764_v48, %v1556_v29  ;;  %v3104_v38 = vpop.f32.mrb[119].mxu0  ;;  %v2304_v46 = vpop.permute.xlu1 %2303 }
 0x1e3   : > { %v1536_v44 = vpop.f32.mrb[120].mxu1 }
 0x1e4   : > { %v1769_v35 = vpop.f32.mrb[120].mxu0  ;;  %v1559_v45 = vadd.f32 %v1536_v44, %v4154_v55  ;;  %v3073_v60 = vpop.f32.mrb[121].mxu1 }
 0x1e5   : > { %v4202_v25 = vadd.f32 %v1769_v35, %v1557_v14  ;;  %v3107_v50 = vpop.f32.mrb[121].mxu0  ;;  %v1539_v3 = vpop.f32.mrb[122].mxu1 }
 0x1e6   : > { %v1772_v24 = vpop.f32.mrb[122].mxu0  ;;  %v1560_v53 = vadd.f32 %v1539_v3, %v4157_v23  ;;  %v3074_v9 = vpop.f32.mrb[123].mxu1 }
 0x1e7   : > { %v4205_v5 = vadd.f32 %v1772_v24, %v1558_v36  ;;  %v3108_v26 = vpop.f32.mrb[123].mxu0  ;;  %v2309_v9 = vpop.permute.xlu1 %2308 }
 0x1eb   : > { %v1962_v54 = vpop.f32.mrb[124].mxu1 }
 0x1ec   : > { %v1777_v58 = vpop.f32.mrb[124].mxu0  ;;  %v2033_v4 = vadd.f32 %v1962_v54, %v4160_v27  ;;  %v3117_v57 = vpop.f32.mrb[125].mxu1 }
 0x1ed   : > { %v4210_v33 = vadd.f32 %v1777_v58, %v1559_v45  ;;  %v3111_v47 = vpop.f32.mrb[125].mxu0  ;;  %v1965_v16 = vpop.f32.mrb[126].mxu1 }
 0x1ee   : > { %v1780_v17 = vpop.f32.mrb[126].mxu0  ;;  %v2034_v1 = vadd.f32 %v1965_v16, %v4163_v51  ;;  %v3118_v23 = vpop.f32.mrb[127].mxu1 }
 0x1ef   : > { %v4213_v55 = vadd.f32 %v1780_v17, %v1560_v53  ;;  %v3112_v52 = vpop.f32.mrb[127].mxu0 }
 0x1f3   : > { %v1970_v27 = vpop.f32.mrb[128].mxu1 }
 0x1f4   : > { %v2141_v20 = vpop.f32.mrb[128].mxu0  ;;  %v2035_v34 = vadd.f32 %v1970_v27, %v4166_v0  ;;  %v3121_v63 = vpop.f32.mrb[129].mxu1 }
 0x1f5   : > { %v2212_v61 = vadd.f32 %v2141_v20, %v2033_v4  ;;  %v3155_v30 = vpop.f32.mrb[129].mxu0  ;;  %v1973_v12 = vpop.f32.mrb[130].mxu1 }
 0x1f6   : > { %v2144_v51 = vpop.f32.mrb[130].mxu0  ;;  %v2036_v42 = vadd.f32 %v1973_v12, %v4169_v15  ;;  %v3122_v10 = vpop.f32.mrb[131].mxu1 }
 0x1f7   : > { %v2237_v31 = vadd.f32 %v4219_v19, %v2212_v61  ;;  %v2213_v39 = vadd.f32 %v2144_v51, %v2034_v1  ;;  %v3156_v32 = vpop.f32.mrb[131].mxu0  ;;  %v2314_v51 = vpop.permute.xlu0 %2313 }
 0x1f8   : > { %v2319_v12 = vpop.permute.xlu1 %2318 }
 0x1f9   : > { %2255 = vst [vmem:[%s4224_s26] sm:$0xff] %v2237_v31  ;;  %v2381_v8 = vmul.f32 %v2294_v40, %v2237_v31  ;;  %v2238_v29 = vadd.f32 %v4219_v19, %v2213_v39 }
 0x1fb   : > { %2256 = vst [vmem:[%s4224_s26 + $0x8] sm:$0xff] %v2238_v29  ;;  %v2382_v18 = vmul.f32 %v2299_v62, %v2238_v29  ;;  %v2422_v0 = vmul.f32 %v2381_v8, %v2237_v31  ;;  %v1978_v49 = vpop.f32.mrb[132].mxu1 }
 0x1fc   : > { %v2149_v43 = vpop.f32.mrb[132].mxu0  ;;  %v2037_v35 = vadd.f32 %v1978_v49, %v4172_v13  ;;  %v3125_v50 = vpop.f32.mrb[133].mxu1 }
 0x1fd   : > { %v2399_v48 = vadd.f32 %v2382_v18, %v2381_v8  ;;  %v2423_v14 = vmul.f32 %v2382_v18, %v2238_v29  ;;  %v2214_v21 = vadd.f32 %v2149_v43, %v2035_v34  ;;  %v3159_v38 = vpop.f32.mrb[133].mxu0  ;;  %v1981_v45 = vpop.f32.mrb[134].mxu1 }
 0x1fe   : > { %v2152_v36 = vpop.f32.mrb[134].mxu0  ;;  %v2038_v26 = vadd.f32 %v1981_v45, %v4175_v2  ;;  %v3126_v53 = vpop.f32.mrb[135].mxu1 }
 0x1ff   : > { %v2440_v28 = vadd.f32 %v2423_v14, %v2422_v0  ;;  %v2239_v15 = vadd.f32 %v4219_v19, %v2214_v21  ;;  %v2215_v44 = vadd.f32 %v2152_v36, %v2036_v42  ;;  %v3160_v24 = vpop.f32.mrb[135].mxu0  ;;  %v2329_v45 = vpop.permute.xlu1 %2328 }
 0x201   : > { %2257 = vst [vmem:[%s4224_s26 + $0x10] sm:$0xff] %v2239_v15  ;;  %v2383_v60 = vmul.f32 %v2304_v46, %v2239_v15  ;;  %v2240_v3 = vadd.f32 %v4219_v19, %v2215_v44 }
 0x203   : > { %v2400_v58 = vadd.f32 %v2399_v48, %v2383_v60  ;;  %v2424_v47 = vmul.f32 %v2383_v60, %v2239_v15  ;;  %2258 = vst [vmem:[%s4224_s26 + $0x18] sm:$0xff] %v2240_v3  ;;  %v2384_v54 = vmul.f32 %v2309_v9, %v2240_v3  ;;  %v1986_v1 = vpop.f32.mrb[136].mxu1 }
 0x204   : > { %v2157_v17 = vpop.f32.mrb[136].mxu0  ;;  %v2039_v2 = vadd.f32 %v1986_v1, %v4178_v56  ;;  %v3129_v61 = vpop.f32.mrb[137].mxu1 }
 0x205   : > { %v2441_v13 = vadd.f32 %v2440_v28, %v2424_v47  ;;  %v2401_v4 = vadd.f32 %v2400_v58, %v2384_v54  ;;  %v2425_v57 = vmul.f32 %v2384_v54, %v2240_v3  ;;  %v2216_v52 = vadd.f32 %v2157_v17, %v2037_v35  ;;  %v3163_v16 = vpop.f32.mrb[137].mxu0  ;;  %v1989_v34 = vpop.f32.mrb[138].mxu1 }
 0x206   : > { %v2160_v23 = vpop.f32.mrb[138].mxu0  ;;  %v2040_v63 = vadd.f32 %v1989_v34, %v4181_v11  ;;  %v3130_v32 = vpop.f32.mrb[139].mxu1 }
 0x207   : > { %v2442_v40 = vadd.f32 %v2441_v13, %v2425_v57  ;;  %v2241_v20 = vadd.f32 %v4219_v19, %v2216_v52  ;;  %v2217_v30 = vadd.f32 %v2160_v23, %v2038_v26  ;;  %v3164_v27 = vpop.f32.mrb[139].mxu0  ;;  %v2324_v28 = vpop.permute.xlu0 %2323 }
 0x208   : > { %v2339_v27 = vpop.permute.xlu1 %2338 }
 0x209   : > { %2259 = vst [vmem:[%s4224_s26 + $0x20] sm:$0xff] %v2241_v20  ;;  %v2385_v31 = vmul.f32 %v2314_v51, %v2241_v20  ;;  %v2242_v39 = vadd.f32 %v4219_v19, %v2217_v30 }
 0x20b   : > { %v2402_v62 = vadd.f32 %v2401_v4, %v2385_v31  ;;  %v2426_v8 = vmul.f32 %v2385_v31, %v2241_v20  ;;  %2260 = vst [vmem:[%s4224_s26 + $0x28] sm:$0xff] %v2242_v39  ;;  %v2386_v42 = vmul.f32 %v2319_v12, %v2242_v39  ;;  %v1994_v0 = vpop.f32.mrb[140].mxu1  ;;  %v2334_v23 = vpop.permute.xlu0 %2333 }
 0x20c   : > { %v2165_v56 = vpop.f32.mrb[140].mxu0  ;;  %v2041_v11 = vadd.f32 %v1994_v0, %v4184_v7  ;;  %v3133_v38 = vpop.f32.mrb[141].mxu1 }
 0x20d   : > { %v2443_v29 = vadd.f32 %v2442_v40, %v2426_v8  ;;  %v2403_v10 = vadd.f32 %v2402_v62, %v2386_v42  ;;  %v2427_v18 = vmul.f32 %v2386_v42, %v2242_v39  ;;  %v2218_v46 = vadd.f32 %v2165_v56, %v2039_v2  ;;  %v3167_v43 = vpop.f32.mrb[141].mxu0  ;;  %v1997_v35 = vpop.f32.mrb[142].mxu1 }
 0x20e   : > { %v2168_v48 = vpop.f32.mrb[142].mxu0  ;;  %v2042_v50 = vadd.f32 %v1997_v35, %v4187_v59  ;;  %v3134_v24 = vpop.f32.mrb[143].mxu1 }
 0x20f   : > { %v2444_v14 = vadd.f32 %v2443_v29, %v2427_v18  ;;  %v2243_v21 = vadd.f32 %v4219_v19, %v2218_v46  ;;  %v2219_v49 = vadd.f32 %v2168_v48, %v2040_v63  ;;  %v3168_v36 = vpop.f32.mrb[143].mxu0  ;;  %v2344_v43 = vpop.permute.xlu0 %2343 }
 0x210   : > { %v2349_v38 = vpop.permute.xlu1 %2348 }
 0x211   : > { %2261 = vst [vmem:[%s4224_s26 + $0x30] sm:$0xff] %v2243_v21  ;;  %v2387_v15 = vmul.f32 %v2324_v28, %v2243_v21  ;;  %v2244_v44 = vadd.f32 %v4219_v19, %v2219_v49 }
 0x213   : > { %v2404_v60 = vadd.f32 %v2403_v10, %v2387_v15  ;;  %v2428_v26 = vmul.f32 %v2387_v15, %v2243_v21  ;;  %2262 = vst [vmem:[%s4224_s26 + $0x38] sm:$0xff] %v2244_v44  ;;  %v2388_v3 = vmul.f32 %v2329_v45, %v2244_v44  ;;  %v2002_v17 = vpop.f32.mrb[144].mxu1 }
 0x214   : > { %v2173_v7 = vpop.f32.mrb[144].mxu0  ;;  %v2043_v59 = vadd.f32 %v2002_v17, %v4190_v6  ;;  %v3137_v52 = vpop.f32.mrb[145].mxu1 }
 0x215   : > { %v2445_v53 = vadd.f32 %v2444_v14, %v2428_v26  ;;  %v2405_v9 = vadd.f32 %v2404_v60, %v2388_v3  ;;  %v2429_v58 = vmul.f32 %v2388_v3, %v2244_v44  ;;  %v2220_v47 = vadd.f32 %v2173_v7, %v2041_v11  ;;  %v3171_v54 = vpop.f32.mrb[145].mxu0  ;;  %v2005_v40 = vpop.f32.mrb[146].mxu1 }
 0x216   : > { %v2176_v13 = vpop.f32.mrb[146].mxu0  ;;  %v2044_v20 = vadd.f32 %v2005_v40, %v4193_v41  ;;  %v3138_v30 = vpop.f32.mrb[147].mxu1 }
 0x217   : > { %v2446_v4 = vadd.f32 %v2445_v53, %v2429_v58  ;;  %v2245_v57 = vadd.f32 %v4219_v19, %v2220_v47  ;;  %v2221_v16 = vadd.f32 %v2176_v13, %v2042_v50  ;;  %v3172_v1 = vpop.f32.mrb[147].mxu0  ;;  %v2354_v58 = vpop.permute.xlu0 %2353 }
 0x219   : > { %2263 = vst [vmem:[%s4224_s26 + $0x40] sm:$0xff] %v2245_v57  ;;  %v2389_v2 = vmul.f32 %v2334_v23, %v2245_v57  ;;  %v2246_v61 = vadd.f32 %v4219_v19, %v2221_v16 }
 0x21b   : > { %v2406_v51 = vadd.f32 %v2405_v9, %v2389_v2  ;;  %v2430_v34 = vmul.f32 %v2389_v2, %v2245_v57  ;;  %2264 = vst [vmem:[%s4224_s26 + $0x48] sm:$0xff] %v2246_v61  ;;  %v2390_v31 = vmul.f32 %v2339_v27, %v2246_v61  ;;  %v2010_v8 = vpop.f32.mrb[148].mxu1 }
 0x21c   : > { %v2181_v6 = vpop.f32.mrb[148].mxu0  ;;  %v2045_v41 = vadd.f32 %v2010_v8, %v4196_v37  ;;  %v3141_v10 = vpop.f32.mrb[149].mxu1 }
 0x21d   : > { %v2447_v63 = vadd.f32 %v2446_v4, %v2430_v34  ;;  %v2407_v39 = vadd.f32 %v2406_v51, %v2390_v31  ;;  %v2431_v32 = vmul.f32 %v2390_v31, %v2246_v61  ;;  %v2222_v12 = vadd.f32 %v2181_v6, %v2043_v59  ;;  %v3175_v62 = vpop.f32.mrb[149].mxu0  ;;  %v2013_v0 = vpop.f32.mrb[150].mxu1 }
 0x21e   : > { %v2184_v42 = vpop.f32.mrb[150].mxu0  ;;  %v2046_v14 = vadd.f32 %v2013_v0, %v4199_v22  ;;  %v3142_v21 = vpop.f32.mrb[151].mxu1 }
 0x21f   : > { %v2448_v56 = vadd.f32 %v2447_v63, %v2431_v32  ;;  %v2247_v29 = vadd.f32 %v4219_v19, %v2222_v12  ;;  %v2223_v18 = vadd.f32 %v2184_v42, %v2044_v20  ;;  %v3176_v46 = vpop.f32.mrb[151].mxu0  ;;  %v2359_v59 = vpop.permute.xlu1 %2358 }
 0x220   : > { %v2364_v63 = vpop.permute.xlu0 %2363 }
 0x221   : > { %2265 = vst [vmem:[%s4224_s26 + $0x50] sm:$0xff] %v2247_v29  ;;  %v2391_v48 = vmul.f32 %v2344_v43, %v2247_v29  ;;  %v2248_v11 = vadd.f32 %v4219_v19, %v2223_v18 }
 0x223   : > { %v2408_v49 = vadd.f32 %v2407_v39, %v2391_v48  ;;  %v2432_v36 = vmul.f32 %v2391_v48, %v2247_v29  ;;  %2266 = vst [vmem:[%s4224_s26 + $0x58] sm:$0xff] %v2248_v11  ;;  %v2392_v28 = vmul.f32 %v2349_v38, %v2248_v11  ;;  %v2018_v45 = vpop.f32.mrb[152].mxu1  ;;  %v2369_v42 = vpop.permute.xlu1 %2368 }
 0x224   : > { %v2189_v37 = vpop.f32.mrb[152].mxu0  ;;  %v2047_v22 = vadd.f32 %v2018_v45, %v4202_v25  ;;  %v3145_v7 = vpop.f32.mrb[153].mxu1 }
 0x225   : > { %v2449_v35 = vadd.f32 %v2448_v56, %v2432_v36  ;;  %v2409_v15 = vadd.f32 %v2408_v49, %v2392_v28  ;;  %v2433_v50 = vmul.f32 %v2392_v28, %v2248_v11  ;;  %v2224_v44 = vadd.f32 %v2189_v37, %v2045_v41  ;;  %v3179_v24 = vpop.f32.mrb[153].mxu0  ;;  %v2021_v47 = vpop.f32.mrb[154].mxu1 }
 0x226   : > { %v2192_v60 = vpop.f32.mrb[154].mxu0  ;;  %v2048_v17 = vadd.f32 %v2021_v47, %v4205_v5  ;;  %v3146_v4 = vpop.f32.mrb[155].mxu1 }
 0x227   : > { %v2450_v26 = vadd.f32 %v2449_v35, %v2433_v50  ;;  %v2249_v3 = vadd.f32 %v4219_v19, %v2224_v44  ;;  %v2225_v53 = vadd.f32 %v2192_v60, %v2046_v14  ;;  %v3180_v9 = vpop.f32.mrb[155].mxu0  ;;  %v2374_v38 = vpop.permute.xlu0 %2373 }
 0x228   : > { %v2379_v28 = vpop.permute.xlu1 %2378 }
 0x229   : > { %2267 = vst [vmem:[%s4224_s26 + $0x60] sm:$0xff] %v2249_v3  ;;  %v2393_v54 = vmul.f32 %v2354_v58, %v2249_v3  ;;  %v2250_v13 = vadd.f32 %v4219_v19, %v2225_v53 }
 0x22b   : > { %v2410_v57 = vadd.f32 %v2409_v15, %v2393_v54  ;;  %v2434_v52 = vmul.f32 %v2393_v54, %v2249_v3  ;;  %2268 = vst [vmem:[%s4224_s26 + $0x68] sm:$0xff] %v2250_v13  ;;  %v2394_v16 = vmul.f32 %v2359_v59, %v2250_v13  ;;  %v2026_v61 = vpop.f32.mrb[156].mxu1 }
 0x22c   : > { %v2197_v25 = vpop.f32.mrb[156].mxu0  ;;  %v2049_v5 = vadd.f32 %v2026_v61, %v4210_v33  ;;  %v3149_v34 = vpop.f32.mrb[157].mxu1 }
 0x22d   : > { %v2451_v1 = vadd.f32 %v2450_v26, %v2434_v52  ;;  %v2411_v23 = vadd.f32 %v2410_v57, %v2394_v16  ;;  %v2435_v40 = vmul.f32 %v2394_v16, %v2250_v13  ;;  %v2226_v2 = vadd.f32 %v2197_v25, %v2047_v22  ;;  %v3183_v20 = vpop.f32.mrb[157].mxu0  ;;  %v2029_v39 = vpop.f32.mrb[158].mxu1 }
 0x22e   : > { %v2200_v30 = vpop.f32.mrb[158].mxu0  ;;  %v2050_v12 = vadd.f32 %v2029_v39, %v4213_v55  ;;  %v3150_v8 = vpop.f32.mrb[159].mxu1 }
 0x22f   : > { %v2452_v27 = vadd.f32 %v2451_v1, %v2435_v40  ;;  %v2251_v51 = vadd.f32 %v4219_v19, %v2226_v2  ;;  %v2227_v31 = vadd.f32 %v2200_v30, %v2048_v17  ;;  %v3184_v6 = vpop.f32.mrb[159].mxu0 }
 0x231   : > { %2269 = vst [vmem:[%s4224_s26 + $0x70] sm:$0xff] %v2251_v51  ;;  %v2395_v32 = vmul.f32 %v2364_v63, %v2251_v51  ;;  %v2252_v62 = vadd.f32 %v4219_v19, %v2227_v31 }
 0x233   : > { %v2412_v56 = vadd.f32 %v2411_v23, %v2395_v32  ;;  %v2436_v41 = vmul.f32 %v2395_v32, %v2251_v51  ;;  %2270 = vst [vmem:[%s4224_s26 + $0x78] sm:$0xff] %v2252_v62  ;;  %v2396_v33 = vmul.f32 %v2369_v42, %v2252_v62 }
 0x234   : > { %v2205_v29 = vpop.f32.mrb[160].mxu0 }
 0x235   : > { %v2453_v10 = vadd.f32 %v2452_v27, %v2436_v41  ;;  %v2413_v18 = vadd.f32 %v2412_v56, %v2396_v33  ;;  %v2437_v46 = vmul.f32 %v2396_v33, %v2252_v62  ;;  %v2228_v43 = vadd.f32 %v2205_v29, %v2049_v5  ;;  %v3187_v0 = vpop.f32.mrb[161].mxu0 }
 0x236   : > { %v2208_v48 = vpop.f32.mrb[162].mxu0 }
 0x237   : > { %v2454_v14 = vadd.f32 %v2453_v10, %v2437_v46  ;;  %v2253_v55 = vadd.f32 %v4219_v19, %v2228_v43  ;;  %v2229_v11 = vadd.f32 %v2208_v48, %v2050_v12  ;;  %v3188_v21 = vpop.f32.mrb[163].mxu0 }
 0x239   : > { %2271 = vst [vmem:[%s4224_s26 + $0x80] sm:$0xff] %v2253_v55  ;;  %v2397_v49 = vmul.f32 %v2374_v38, %v2253_v55  ;;  %v2254_v36 = vadd.f32 %v4219_v19, %v2229_v11 }
 0x23b   : > { %v2414_v37 = vadd.f32 %v2413_v18, %v2397_v49  ;;  %v2438_v35 = vmul.f32 %v2397_v49, %v2253_v55  ;;  %2272 = vst [vmem:[%s4224_s26 + $0x88] sm:$0xff] %v2254_v36  ;;  %v2398_v15 = vmul.f32 %v2379_v28, %v2254_v36 }
 0x23d   : > { %v2455_v50 = vadd.f32 %v2454_v14, %v2438_v35  ;;  %v2415_v44 = vadd.f32 %v2414_v37, %v2398_v15  ;;  %v2439_v24 = vmul.f32 %v2398_v15, %v2254_v36 }
 0x23f   : > { %v2416_v45 = vrot.slane %v2415_v44, 4  ;;  %v2456_v60 = vadd.f32 %v2455_v50, %v2439_v24 }
 0x241   : > { %v2417_v26 = vadd.f32 %v2416_v45, %v2415_v44  ;;  %v2457_v22 = vrot.slane %v2456_v60, 4 }
 0x243   : > { %v2418_v3 = vrot.slane %v2417_v26, 2  ;;  %v2458_v7 = vadd.f32 %v2457_v22, %v2456_v60 }
 0x245   : > { %v2419_v53 = vadd.f32 %v2418_v3, %v2417_v26  ;;  %v2459_v9 = vrot.slane %v2458_v7, 2 }
 0x247   : > { %v2420_v19 = vrot.slane %v2419_v53, 1  ;;  %v2460_v58 = vadd.f32 %v2459_v9, %v2458_v7 }
 0x249   : > { %v2461_v47 = vrot.slane %v2460_v58, 1  ;;  %v2421_v54 = vadd.f32 %v2420_v19, %v2419_v53 }
 0x24b   : > { %v2462_v17 = vadd.f32 %v2461_v47, %v2460_v58 }
 0x24d   : > { %v2464_v13 = vsel %vm2463_vm9, %v2421_v54, %v2462_v17 }
 0x24e   : > { %2465 = vst [vmem:[%s301_s7] sm:$0x3] %v2464_v13 }
 0x24f PF: > { %s16_s22 = sadd.s32 1, %s3314_s22   ;;  %s4304_s18 = smov %s3306_s20 }
 0x250   : > { %p13_p7 = scmp.ge.s32.totalorder %s16_s22, 6   ;;  %s4305_s19 = smov %s3310_s21 }
 0x251   : > { %s4306_s20 = smov %s4309_s23  ;;  %s4307_s21 = smov %s4313_s24 }
 0x252   :  { %15 = sbr.rel (!%p13_p7) target bundleno = 3 (0x3), region = 89 }

</bundles_post_ra>
